<compile_context>
chip_gen: v7x
topology: tpu7x:2x2x1
jax: 0.10.0
libtpu: 0.0.40
codegen_flags: <defaults>
</compile_context>

<pallas_src>
import functools
import math

import numpy as np
import jax
import jax.numpy as jnp
from jax.experimental import pallas as pl
from jax.experimental.pallas import tpu as pltpu

BN_EPS = 1e-5
_VMEM_LIMIT = 32 * 1024 * 1024   # >> ~6 MiB actual footprint; safe on v5e/v6e/v7x


# ----------------------------------------------------------------------------
# In-kernel helper (operates on lane-dense (H, W*C) values)
# ----------------------------------------------------------------------------
def _conv_bn(x_f32, s_ref, b_ref, sc_ref, sh_ref):
    """KxK conv (stride/pad folded into S / B) + folded BN, lane-dense layout.

    x_f32  : (Hin, Win*Cin)  f32 activation.
    s_ref  : (K, Hout, Hin)  bf16 row-selection / H-shift matrices (ky taps).
    b_ref  : (K, Win*Cin, Wout*Cout) bf16 banded kx/channel matrices.
    sc_ref : (1, Wout*Cout)  f32 folded BN scale (tiled over W).
    sh_ref : (1, Wout*Cout)  f32 folded BN shift (tiled over W).
    Returns (Hout, Wout*Cout) f32.
    """
    xb = x_f32.astype(jnp.bfloat16)
    kk, h_out, _ = s_ref.shape
    n_out = b_ref.shape[2]
    acc = jnp.zeros((h_out, n_out), jnp.float32)
    for t in range(kk):                       # statically unrolled (3 or 1)
        y = jnp.dot(s_ref[t], xb, preferred_element_type=jnp.float32)
        acc = acc + jnp.dot(y.astype(jnp.bfloat16), b_ref[t],
                            preferred_element_type=jnp.float32)
    return acc * sc_ref[...] + sh_ref[...]


def _make_net_kernel(plan, n_weights):
    """Build the fused whole-network kernel from a static op plan."""
    def kernel(*refs):
        x_ref = refs[0]
        w = refs[1:1 + n_weights]
        out_ref = refs[1 + n_weights]

        x = x_ref[0]                                        # (H, W*Cin) f32
        for op in plan:
            kind, i = op[0], op[1]
            if kind == "conv_relu":                         # stem conv1/bn1/relu
                x = jnp.maximum(_conv_bn(x, w[i], w[i + 1], w[i + 2], w[i + 3]),
                                0.0)
            elif kind == "block":                           # fused SVDBasicBlock
                has_down = op[2]
                h = jnp.maximum(_conv_bn(x, w[i], w[i + 1], w[i + 2], w[i + 3]),
                                0.0)
                h = _conv_bn(h, w[i + 4], w[i + 5], w[i + 6], w[i + 7])
                if has_down:
                    res = _conv_bn(x, w[i + 8], w[i + 9], w[i + 10], w[i + 11])
                else:
                    res = x
                x = jnp.maximum(h + res, 0.0)
            else:                                           # "head": avgpool + fc
                pooled = jnp.mean(x, axis=0, keepdims=True)  # (1, W*C) f32
                logits = jnp.dot(pooled.astype(jnp.bfloat16), w[i][...],
                                 preferred_element_type=jnp.float32)
                logits = logits + w[i + 1][...]
                out_ref[0] = logits.astype(out_ref.dtype)
    return kernel


# ----------------------------------------------------------------------------
# Wrapper-side packing: conv weights -> selection (S) and banded (B) matrices
# ----------------------------------------------------------------------------
def _selection_matrices(h_in, k, stride, pad):
    """S[ky, ho, hi] = 1 iff hi == stride*ho + ky - pad (in range)."""
    h_out = (h_in + 2 * pad - k) // stride + 1
    S = np.zeros((k, h_out, h_in), np.float32)
    for ky in range(k):
        for ho in range(h_out):
            hi = stride * ho + ky - pad
            if 0 <= hi < h_in:
                S[ky, ho, hi] = 1.0
    return S, h_out


def _band_matrices(w_oihw, w_in, stride, pad):
    """B[ky, wi*Cin+ci, wo*Cout+co] = W[co,ci,ky,kx] iff wi == stride*wo+kx-pad."""
    cout, cin, k, _ = w_oihw.shape
    w_out = (w_in + 2 * pad - k) // stride + 1
    B = np.zeros((k, w_in * cin, w_out * cout), np.float32)
    w_np = np.asarray(w_oihw, np.float32)
    for ky in range(k):
        for kx in range(k):
            blk = w_np[:, :, ky, kx].T                      # (cin, cout)
            for wo in range(w_out):
                wi = stride * wo + kx - pad
                if 0 <= wi < w_in:
                    B[ky, wi * cin:(wi + 1) * cin,
                      wo * cout:(wo + 1) * cout] = blk
    return B, w_out


def _pack_conv(flat, w_oihw, bn_scale, bn_shift, hw, stride, k, pad):
    """Append (S, B, bn_scale_tiled, bn_shift_tiled) to flat; return start idx."""
    H, W = hw
    S, h_out = _selection_matrices(H, k, stride, pad)
    B, w_out = _band_matrices(w_oihw, W, stride, pad)
    cout = w_oihw.shape[0]
    idx = len(flat)
    flat.append(jnp.asarray(S, jnp.bfloat16))
    flat.append(jnp.asarray(B, jnp.bfloat16))
    flat.append(jnp.tile(jnp.asarray(bn_scale, jnp.float32),
                         w_out).reshape(1, w_out * cout))
    flat.append(jnp.tile(jnp.asarray(bn_shift, jnp.float32),
                         w_out).reshape(1, w_out * cout))
    return idx, (h_out, w_out)


# ----------------------------------------------------------------------------
# Deterministic parameter construction
# ----------------------------------------------------------------------------
def _svd_conv_weight(key, cout, cin, k):
    """SVDConv2d effective weight W = U diag(s) V^T, returned OIHW f32."""
    k1, k2, k3 = jax.random.split(key, 3)
    m, n = cout, cin * k * k
    r = min(m, n)
    U, _ = jnp.linalg.qr(jax.random.normal(k1, (m, r), dtype=jnp.float32))
    V, _ = jnp.linalg.qr(jax.random.normal(k2, (n, r), dtype=jnp.float32))
    s = jax.random.uniform(k3, (r,), minval=0.2, maxval=1.0)
    Wm = (U * s) @ V.T / math.sqrt(n)                       # (cout, cin*k*k)
    return Wm.reshape(cout, cin, k, k)


def _bn_scale_shift(c):
    """Inference BN folded to scale/shift (gamma=1, beta=0, stats 0/1 at init)."""
    gamma = jnp.ones((c,), jnp.float32)
    beta = jnp.zeros((c,), jnp.float32)
    mean = jnp.zeros((c,), jnp.float32)
    var = jnp.ones((c,), jnp.float32)
    scale = gamma / jnp.sqrt(var + BN_EPS)
    shift = beta - mean * scale
    return scale, shift


def build_model(key, depth=8, nfilter=(8, 16, 32), num_classes=10, hw=(32, 32)):
    assert (depth - 2) % 6 == 0, "depth should be 6n+2"
    assert depth < 44, "SVDBottleneck path not implemented"
    n = (depth - 2) // 6
    keys = iter(jax.random.split(key, 8 * depth + 16))

    flat, plan = [], []
    H, W = hw

    # stem: conv1 (3x3, stride 1, pad 1) + bn1 + relu
    w = _svd_conv_weight(next(keys), nfilter[0], 3, 3)
    sc, sh = _bn_scale_shift(nfilter[0])
    idx, (H, W) = _pack_conv(flat, w, sc, sh, (H, W), 1, 3, 1)
    plan.append(("conv_relu", idx))

    inplanes = nfilter[0]
    for planes, layer_stride in zip(nfilter, (1, 2, 2)):
        for b in range(n):
            s = layer_stride if b == 0 else 1
            w1 = _svd_conv_weight(next(keys), planes, inplanes, 3)
            sc1, sh1 = _bn_scale_shift(planes)
            w2 = _svd_conv_weight(next(keys), planes, planes, 3)
            sc2, sh2 = _bn_scale_shift(planes)
            has_down = (s != 1 or inplanes != planes)        # expansion == 1

            idx1, (Ho, Wo) = _pack_conv(flat, w1, sc1, sh1, (H, W), s, 3, 1)
            _pack_conv(flat, w2, sc2, sh2, (Ho, Wo), 1, 3, 1)
            if has_down:
                wd = _svd_conv_weight(next(keys), planes, inplanes, 1)
                scd, shd = _bn_scale_shift(planes)
                _pack_conv(flat, wd, scd, shd, (H, W), s, 1, 0)
            plan.append(("block", idx1, has_down))
            H, W = Ho, Wo
            inplanes = planes

    # head: AvgPool2d(8) (== global mean at final 8x8 map) + Linear
    fcin = nfilter[2]
    kf1, kf2 = jax.random.split(next(keys))
    bound = 1.0 / math.sqrt(fcin)
    fc_w = jax.random.uniform(kf1, (fcin, num_classes),
                              minval=-bound, maxval=bound).astype(jnp.float32)
    fc_b = jax.random.uniform(kf2, (1, num_classes),
                              minval=-bound, maxval=bound).astype(jnp.float32)
    idx_h = len(flat)
    # Fold the W-direction average into the fc weight: lane-dense (W*C, K).
    flat.append((jnp.tile(fc_w, (W, 1)) / float(W)).astype(jnp.bfloat16))
    flat.append(fc_b)
    plan.append(("head", idx_h))

    meta = {"num_classes": num_classes, "in_hw": hw, "in_ch": 3}
    return {"flat": flat, "plan": plan, "meta": meta}


# ----------------------------------------------------------------------------
# Forward pass (single fused pallas_call)
# ----------------------------------------------------------------------------
def snresnet_forward(model, x_nchw):
    """x_nchw: (N, 3, H, W) float32 (PyTorch NCHW) -> logits (N, num_classes)."""
    flat, plan, meta = model["flat"], model["plan"], model["meta"]
    N, Cin, H, W = x_nchw.shape
    assert (H, W) == tuple(meta["in_hw"]) and Cin == meta["in_ch"]
    num_classes = meta["num_classes"]

    # NCHW -> lane-dense (N, H, W*Cin)
    x = jnp.transpose(x_nchw, (0, 2, 3, 1)).reshape(N, H, W * Cin)
    x = x.astype(jnp.float32)

    kernel = _make_net_kernel(plan, len(flat))

    def const_spec(a):
        nd = a.ndim
        return pl.BlockSpec(a.shape, lambda n, _nd=nd: (0,) * _nd)

    out = pl.pallas_call(
        kernel,
        grid=(N,),
        in_specs=[pl.BlockSpec((1, H, W * Cin), lambda n: (n, 0, 0))]
                 + [const_spec(a) for a in flat],
        out_specs=pl.BlockSpec((1, 1, num_classes), lambda n: (n, 0, 0)),
        out_shape=jax.ShapeDtypeStruct((N, 1, num_classes), jnp.float32),
        compiler_params=pltpu.CompilerParams(
            dimension_semantics=("parallel",),
            vmem_limit_bytes=_VMEM_LIMIT),
    )(x, *flat)
    return out.reshape(N, num_classes)


if __name__ == "__main__":
    key = jax.random.PRNGKey(0)
    pkey, xkey = jax.random.split(key)
    # depth=8 -> n=1 SVDBasicBlock per stage; small filter counts for the demo.
    model = build_model(pkey, depth=8, nfilter=(8, 16, 32), num_classes=10)
    x = jax.random.normal(xkey, (2, 3, 32, 32), dtype=jnp.float32)  # NCHW input
    fwd = jax.jit(functools.partial(snresnet_forward, model))
    logits = fwd(x)
    jax.block_until_ready(logits)
    assert logits.shape == (2, 10) and logits.dtype == jnp.float32
    assert bool(jnp.all(jnp.isfinite(logits)))
    print("KERNEL_OK")
</pallas_src>

<mosaic_0001>
module attributes {stable_mosaic.version = 11 : i64} {
  func.func @kernel(%arg0: i32, %arg1: memref<1x32x96xf32, #tpu.memory_space<vmem>>, %arg2: memref<3x32x32xbf16, #tpu.memory_space<vmem>>, %arg3: memref<3x96x256xbf16, #tpu.memory_space<vmem>>, %arg4: memref<1x256xf32, #tpu.memory_space<vmem>>, %arg5: memref<1x256xf32, #tpu.memory_space<vmem>>, %arg6: memref<3x32x32xbf16, #tpu.memory_space<vmem>>, %arg7: memref<3x256x256xbf16, #tpu.memory_space<vmem>>, %arg8: memref<1x256xf32, #tpu.memory_space<vmem>>, %arg9: memref<1x256xf32, #tpu.memory_space<vmem>>, %arg10: memref<3x32x32xbf16, #tpu.memory_space<vmem>>, %arg11: memref<3x256x256xbf16, #tpu.memory_space<vmem>>, %arg12: memref<1x256xf32, #tpu.memory_space<vmem>>, %arg13: memref<1x256xf32, #tpu.memory_space<vmem>>, %arg14: memref<3x16x32xbf16, #tpu.memory_space<vmem>>, %arg15: memref<3x256x256xbf16, #tpu.memory_space<vmem>>, %arg16: memref<1x256xf32, #tpu.memory_space<vmem>>, %arg17: memref<1x256xf32, #tpu.memory_space<vmem>>, %arg18: memref<3x16x16xbf16, #tpu.memory_space<vmem>>, %arg19: memref<3x256x256xbf16, #tpu.memory_space<vmem>>, %arg20: memref<1x256xf32, #tpu.memory_space<vmem>>, %arg21: memref<1x256xf32, #tpu.memory_space<vmem>>, %arg22: memref<1x16x32xbf16, #tpu.memory_space<vmem>>, %arg23: memref<1x256x256xbf16, #tpu.memory_space<vmem>>, %arg24: memref<1x256xf32, #tpu.memory_space<vmem>>, %arg25: memref<1x256xf32, #tpu.memory_space<vmem>>, %arg26: memref<3x8x16xbf16, #tpu.memory_space<vmem>>, %arg27: memref<3x256x256xbf16, #tpu.memory_space<vmem>>, %arg28: memref<1x256xf32, #tpu.memory_space<vmem>>, %arg29: memref<1x256xf32, #tpu.memory_space<vmem>>, %arg30: memref<3x8x8xbf16, #tpu.memory_space<vmem>>, %arg31: memref<3x256x256xbf16, #tpu.memory_space<vmem>>, %arg32: memref<1x256xf32, #tpu.memory_space<vmem>>, %arg33: memref<1x256xf32, #tpu.memory_space<vmem>>, %arg34: memref<1x8x16xbf16, #tpu.memory_space<vmem>>, %arg35: memref<1x256x256xbf16, #tpu.memory_space<vmem>>, %arg36: memref<1x256xf32, #tpu.memory_space<vmem>>, %arg37: memref<1x256xf32, #tpu.memory_space<vmem>>, %arg38: memref<256x10xbf16, #tpu.memory_space<vmem>>, %arg39: memref<1x10xf32, #tpu.memory_space<vmem>>, %arg40: memref<1x1x10xf32, #tpu.memory_space<vmem>>) attributes {dimension_semantics = [#tpu.dimension_semantics<parallel>], iteration_bounds = array<i64: 2>, scalar_prefetch = 0 : i64, scratch_operands = 0 : i64, tpu.core_type = #tpu.core_type<tc>, window_params = [{transform_indices = @transform_0, window_bounds = array<i64: 1, 32, 96>}, {pipeline_mode = #tpu.pipeline_mode<synchronous>, transform_indices = @transform_1, window_bounds = array<i64: 3, 32, 32>}, {pipeline_mode = #tpu.pipeline_mode<synchronous>, transform_indices = @transform_2, window_bounds = array<i64: 3, 96, 256>}, {pipeline_mode = #tpu.pipeline_mode<synchronous>, transform_indices = @transform_3, window_bounds = array<i64: 1, 256>}, {pipeline_mode = #tpu.pipeline_mode<synchronous>, transform_indices = @transform_4, window_bounds = array<i64: 1, 256>}, {pipeline_mode = #tpu.pipeline_mode<synchronous>, transform_indices = @transform_5, window_bounds = array<i64: 3, 32, 32>}, {pipeline_mode = #tpu.pipeline_mode<synchronous>, transform_indices = @transform_6, window_bounds = array<i64: 3, 256, 256>}, {pipeline_mode = #tpu.pipeline_mode<synchronous>, transform_indices = @transform_7, window_bounds = array<i64: 1, 256>}, {pipeline_mode = #tpu.pipeline_mode<synchronous>, transform_indices = @transform_8, window_bounds = array<i64: 1, 256>}, {pipeline_mode = #tpu.pipeline_mode<synchronous>, transform_indices = @transform_9, window_bounds = array<i64: 3, 32, 32>}, {pipeline_mode = #tpu.pipeline_mode<synchronous>, transform_indices = @transform_10, window_bounds = array<i64: 3, 256, 256>}, {pipeline_mode = #tpu.pipeline_mode<synchronous>, transform_indices = @transform_11, window_bounds = array<i64: 1, 256>}, {pipeline_mode = #tpu.pipeline_mode<synchronous>, transform_indices = @transform_12, window_bounds = array<i64: 1, 256>}, {pipeline_mode = #tpu.pipeline_mode<synchronous>, transform_indices = @transform_13, window_bounds = array<i64: 3, 16, 32>}, {pipeline_mode = #tpu.pipeline_mode<synchronous>, transform_indices = @transform_14, window_bounds = array<i64: 3, 256, 256>}, {pipeline_mode = #tpu.pipeline_mode<synchronous>, transform_indices = @transform_15, window_bounds = array<i64: 1, 256>}, {pipeline_mode = #tpu.pipeline_mode<synchronous>, transform_indices = @transform_16, window_bounds = array<i64: 1, 256>}, {pipeline_mode = #tpu.pipeline_mode<synchronous>, transform_indices = @transform_17, window_bounds = array<i64: 3, 16, 16>}, {pipeline_mode = #tpu.pipeline_mode<synchronous>, transform_indices = @transform_18, window_bounds = array<i64: 3, 256, 256>}, {pipeline_mode = #tpu.pipeline_mode<synchronous>, transform_indices = @transform_19, window_bounds = array<i64: 1, 256>}, {pipeline_mode = #tpu.pipeline_mode<synchronous>, transform_indices = @transform_20, window_bounds = array<i64: 1, 256>}, {pipeline_mode = #tpu.pipeline_mode<synchronous>, transform_indices = @transform_21, window_bounds = array<i64: 1, 16, 32>}, {pipeline_mode = #tpu.pipeline_mode<synchronous>, transform_indices = @transform_22, window_bounds = array<i64: 1, 256, 256>}, {pipeline_mode = #tpu.pipeline_mode<synchronous>, transform_indices = @transform_23, window_bounds = array<i64: 1, 256>}, {pipeline_mode = #tpu.pipeline_mode<synchronous>, transform_indices = @transform_24, window_bounds = array<i64: 1, 256>}, {pipeline_mode = #tpu.pipeline_mode<synchronous>, transform_indices = @transform_25, window_bounds = array<i64: 3, 8, 16>}, {pipeline_mode = #tpu.pipeline_mode<synchronous>, transform_indices = @transform_26, window_bounds = array<i64: 3, 256, 256>}, {pipeline_mode = #tpu.pipeline_mode<synchronous>, transform_indices = @transform_27, window_bounds = array<i64: 1, 256>}, {pipeline_mode = #tpu.pipeline_mode<synchronous>, transform_indices = @transform_28, window_bounds = array<i64: 1, 256>}, {pipeline_mode = #tpu.pipeline_mode<synchronous>, transform_indices = @transform_29, window_bounds = array<i64: 3, 8, 8>}, {pipeline_mode = #tpu.pipeline_mode<synchronous>, transform_indices = @transform_30, window_bounds = array<i64: 3, 256, 256>}, {pipeline_mode = #tpu.pipeline_mode<synchronous>, transform_indices = @transform_31, window_bounds = array<i64: 1, 256>}, {pipeline_mode = #tpu.pipeline_mode<synchronous>, transform_indices = @transform_32, window_bounds = array<i64: 1, 256>}, {pipeline_mode = #tpu.pipeline_mode<synchronous>, transform_indices = @transform_33, window_bounds = array<i64: 1, 8, 16>}, {pipeline_mode = #tpu.pipeline_mode<synchronous>, transform_indices = @transform_34, window_bounds = array<i64: 1, 256, 256>}, {pipeline_mode = #tpu.pipeline_mode<synchronous>, transform_indices = @transform_35, window_bounds = array<i64: 1, 256>}, {pipeline_mode = #tpu.pipeline_mode<synchronous>, transform_indices = @transform_36, window_bounds = array<i64: 1, 256>}, {pipeline_mode = #tpu.pipeline_mode<synchronous>, transform_indices = @transform_37, window_bounds = array<i64: 256, 10>}, {pipeline_mode = #tpu.pipeline_mode<synchronous>, transform_indices = @transform_38, window_bounds = array<i64: 1, 10>}, {transform_indices = @transform_39, window_bounds = array<i64: 1, 1, 10>}]} {
    %c0 = arith.constant 0 : index
    %c0_0 = arith.constant 0 : index
    %c0_1 = arith.constant 0 : index
    %0 = vector.load %arg1[%c0, %c0_0, %c0_1] : memref<1x32x96xf32, #tpu.memory_space<vmem>>, vector<1x32x96xf32>
    %1 = vector.shape_cast %0 : vector<1x32x96xf32> to vector<32x96xf32>
    %2 = arith.truncf %1 : vector<32x96xf32> to vector<32x96xbf16>
    %cst = arith.constant 0.000000e+00 : f32
    %3 = vector.broadcast %cst : f32 to vector<32x256xf32>
    %c0_2 = arith.constant 0 : index
    %c0_3 = arith.constant 0 : index
    %c0_4 = arith.constant 0 : index
    %4 = vector.load %arg2[%c0_2, %c0_3, %c0_4] : memref<3x32x32xbf16, #tpu.memory_space<vmem>>, vector<1x32x32xbf16>
    %5 = vector.shape_cast %4 : vector<1x32x32xbf16> to vector<32x32xbf16>
    %cst_5 = arith.constant dense<0.000000e+00> : vector<32x96xf32>
    %6 = tpu.matmul %5, %2, %cst_5 {dimension_numbers = #tpu.dot_dimension_numbers<[1], [0], [0], [1], [0, 0, 1, 1], [], []>} : vector<32x32xbf16>, vector<32x96xbf16>, vector<32x96xf32> -> vector<32x96xf32>
    %7 = arith.truncf %6 : vector<32x96xf32> to vector<32x96xbf16>
    %c0_6 = arith.constant 0 : index
    %c0_7 = arith.constant 0 : index
    %c0_8 = arith.constant 0 : index
    %8 = vector.load %arg3[%c0_6, %c0_7, %c0_8] : memref<3x96x256xbf16, #tpu.memory_space<vmem>>, vector<1x96x256xbf16>
    %9 = vector.shape_cast %8 : vector<1x96x256xbf16> to vector<96x256xbf16>
    %cst_9 = arith.constant dense<0.000000e+00> : vector<32x256xf32>
    %10 = tpu.matmul %7, %9, %cst_9 {dimension_numbers = #tpu.dot_dimension_numbers<[1], [0], [0], [1], [0, 0, 1, 1], [], []>} : vector<32x96xbf16>, vector<96x256xbf16>, vector<32x256xf32> -> vector<32x256xf32>
    %11 = arith.addf %3, %10 : vector<32x256xf32>
    %c1 = arith.constant 1 : index
    %c0_10 = arith.constant 0 : index
    %c0_11 = arith.constant 0 : index
    %12 = vector.load %arg2[%c1, %c0_10, %c0_11] : memref<3x32x32xbf16, #tpu.memory_space<vmem>>, vector<1x32x32xbf16>
    %13 = vector.shape_cast %12 : vector<1x32x32xbf16> to vector<32x32xbf16>
    %cst_12 = arith.constant dense<0.000000e+00> : vector<32x96xf32>
    %14 = tpu.matmul %13, %2, %cst_12 {dimension_numbers = #tpu.dot_dimension_numbers<[1], [0], [0], [1], [0, 0, 1, 1], [], []>} : vector<32x32xbf16>, vector<32x96xbf16>, vector<32x96xf32> -> vector<32x96xf32>
    %15 = arith.truncf %14 : vector<32x96xf32> to vector<32x96xbf16>
    %c1_13 = arith.constant 1 : index
    %c0_14 = arith.constant 0 : index
    %c0_15 = arith.constant 0 : index
    %16 = vector.load %arg3[%c1_13, %c0_14, %c0_15] : memref<3x96x256xbf16, #tpu.memory_space<vmem>>, vector<1x96x256xbf16>
    %17 = vector.shape_cast %16 : vector<1x96x256xbf16> to vector<96x256xbf16>
    %cst_16 = arith.constant dense<0.000000e+00> : vector<32x256xf32>
    %18 = tpu.matmul %15, %17, %cst_16 {dimension_numbers = #tpu.dot_dimension_numbers<[1], [0], [0], [1], [0, 0, 1, 1], [], []>} : vector<32x96xbf16>, vector<96x256xbf16>, vector<32x256xf32> -> vector<32x256xf32>
    %19 = arith.addf %11, %18 : vector<32x256xf32>
    %c2 = arith.constant 2 : index
    %c0_17 = arith.constant 0 : index
    %c0_18 = arith.constant 0 : index
    %20 = vector.load %arg2[%c2, %c0_17, %c0_18] : memref<3x32x32xbf16, #tpu.memory_space<vmem>>, vector<1x32x32xbf16>
    %21 = vector.shape_cast %20 : vector<1x32x32xbf16> to vector<32x32xbf16>
    %cst_19 = arith.constant dense<0.000000e+00> : vector<32x96xf32>
    %22 = tpu.matmul %21, %2, %cst_19 {dimension_numbers = #tpu.dot_dimension_numbers<[1], [0], [0], [1], [0, 0, 1, 1], [], []>} : vector<32x32xbf16>, vector<32x96xbf16>, vector<32x96xf32> -> vector<32x96xf32>
    %23 = arith.truncf %22 : vector<32x96xf32> to vector<32x96xbf16>
    %c2_20 = arith.constant 2 : index
    %c0_21 = arith.constant 0 : index
    %c0_22 = arith.constant 0 : index
    %24 = vector.load %arg3[%c2_20, %c0_21, %c0_22] : memref<3x96x256xbf16, #tpu.memory_space<vmem>>, vector<1x96x256xbf16>
    %25 = vector.shape_cast %24 : vector<1x96x256xbf16> to vector<96x256xbf16>
    %cst_23 = arith.constant dense<0.000000e+00> : vector<32x256xf32>
    %26 = tpu.matmul %23, %25, %cst_23 {dimension_numbers = #tpu.dot_dimension_numbers<[1], [0], [0], [1], [0, 0, 1, 1], [], []>} : vector<32x96xbf16>, vector<96x256xbf16>, vector<32x256xf32> -> vector<32x256xf32>
    %27 = arith.addf %19, %26 : vector<32x256xf32>
    %c0_24 = arith.constant 0 : index
    %c0_25 = arith.constant 0 : index
    %28 = vector.load %arg4[%c0_24, %c0_25] : memref<1x256xf32, #tpu.memory_space<vmem>>, vector<1x256xf32>
    %29 = vector.broadcast %28 : vector<1x256xf32> to vector<32x256xf32>
    %30 = arith.mulf %27, %29 : vector<32x256xf32>
    %c0_26 = arith.constant 0 : index
    %c0_27 = arith.constant 0 : index
    %31 = vector.load %arg5[%c0_26, %c0_27] : memref<1x256xf32, #tpu.memory_space<vmem>>, vector<1x256xf32>
    %32 = vector.broadcast %31 : vector<1x256xf32> to vector<32x256xf32>
    %33 = arith.addf %30, %32 : vector<32x256xf32>
    %cst_28 = arith.constant 0.000000e+00 : f32
    %34 = vector.broadcast %cst_28 : f32 to vector<32x256xf32>
    %35 = arith.maximumf %33, %34 : vector<32x256xf32>
    %36 = arith.truncf %35 : vector<32x256xf32> to vector<32x256xbf16>
    %cst_29 = arith.constant 0.000000e+00 : f32
    %37 = vector.broadcast %cst_29 : f32 to vector<32x256xf32>
    %c0_30 = arith.constant 0 : index
    %c0_31 = arith.constant 0 : index
    %c0_32 = arith.constant 0 : index
    %38 = vector.load %arg6[%c0_30, %c0_31, %c0_32] : memref<3x32x32xbf16, #tpu.memory_space<vmem>>, vector<1x32x32xbf16>
    %39 = vector.shape_cast %38 : vector<1x32x32xbf16> to vector<32x32xbf16>
    %cst_33 = arith.constant dense<0.000000e+00> : vector<32x256xf32>
    %40 = tpu.matmul %39, %36, %cst_33 {dimension_numbers = #tpu.dot_dimension_numbers<[1], [0], [0], [1], [0, 0, 1, 1], [], []>} : vector<32x32xbf16>, vector<32x256xbf16>, vector<32x256xf32> -> vector<32x256xf32>
    %41 = arith.truncf %40 : vector<32x256xf32> to vector<32x256xbf16>
    %c0_34 = arith.constant 0 : index
    %c0_35 = arith.constant 0 : index
    %c0_36 = arith.constant 0 : index
    %42 = vector.load %arg7[%c0_34, %c0_35, %c0_36] : memref<3x256x256xbf16, #tpu.memory_space<vmem>>, vector<1x256x256xbf16>
    %43 = vector.shape_cast %42 : vector<1x256x256xbf16> to vector<256x256xbf16>
    %cst_37 = arith.constant dense<0.000000e+00> : vector<32x256xf32>
    %44 = tpu.matmul %41, %43, %cst_37 {dimension_numbers = #tpu.dot_dimension_numbers<[1], [0], [0], [1], [0, 0, 1, 1], [], []>} : vector<32x256xbf16>, vector<256x256xbf16>, vector<32x256xf32> -> vector<32x256xf32>
    %45 = arith.addf %37, %44 : vector<32x256xf32>
    %c1_38 = arith.constant 1 : index
    %c0_39 = arith.constant 0 : index
    %c0_40 = arith.constant 0 : index
    %46 = vector.load %arg6[%c1_38, %c0_39, %c0_40] : memref<3x32x32xbf16, #tpu.memory_space<vmem>>, vector<1x32x32xbf16>
    %47 = vector.shape_cast %46 : vector<1x32x32xbf16> to vector<32x32xbf16>
    %cst_41 = arith.constant dense<0.000000e+00> : vector<32x256xf32>
    %48 = tpu.matmul %47, %36, %cst_41 {dimension_numbers = #tpu.dot_dimension_numbers<[1], [0], [0], [1], [0, 0, 1, 1], [], []>} : vector<32x32xbf16>, vector<32x256xbf16>, vector<32x256xf32> -> vector<32x256xf32>
    %49 = arith.truncf %48 : vector<32x256xf32> to vector<32x256xbf16>
    %c1_42 = arith.constant 1 : index
    %c0_43 = arith.constant 0 : index
    %c0_44 = arith.constant 0 : index
    %50 = vector.load %arg7[%c1_42, %c0_43, %c0_44] : memref<3x256x256xbf16, #tpu.memory_space<vmem>>, vector<1x256x256xbf16>
    %51 = vector.shape_cast %50 : vector<1x256x256xbf16> to vector<256x256xbf16>
    %cst_45 = arith.constant dense<0.000000e+00> : vector<32x256xf32>
    %52 = tpu.matmul %49, %51, %cst_45 {dimension_numbers = #tpu.dot_dimension_numbers<[1], [0], [0], [1], [0, 0, 1, 1], [], []>} : vector<32x256xbf16>, vector<256x256xbf16>, vector<32x256xf32> -> vector<32x256xf32>
    %53 = arith.addf %45, %52 : vector<32x256xf32>
    %c2_46 = arith.constant 2 : index
    %c0_47 = arith.constant 0 : index
    %c0_48 = arith.constant 0 : index
    %54 = vector.load %arg6[%c2_46, %c0_47, %c0_48] : memref<3x32x32xbf16, #tpu.memory_space<vmem>>, vector<1x32x32xbf16>
    %55 = vector.shape_cast %54 : vector<1x32x32xbf16> to vector<32x32xbf16>
    %cst_49 = arith.constant dense<0.000000e+00> : vector<32x256xf32>
    %56 = tpu.matmul %55, %36, %cst_49 {dimension_numbers = #tpu.dot_dimension_numbers<[1], [0], [0], [1], [0, 0, 1, 1], [], []>} : vector<32x32xbf16>, vector<32x256xbf16>, vector<32x256xf32> -> vector<32x256xf32>
    %57 = arith.truncf %56 : vector<32x256xf32> to vector<32x256xbf16>
    %c2_50 = arith.constant 2 : index
    %c0_51 = arith.constant 0 : index
    %c0_52 = arith.constant 0 : index
    %58 = vector.load %arg7[%c2_50, %c0_51, %c0_52] : memref<3x256x256xbf16, #tpu.memory_space<vmem>>, vector<1x256x256xbf16>
    %59 = vector.shape_cast %58 : vector<1x256x256xbf16> to vector<256x256xbf16>
    %cst_53 = arith.constant dense<0.000000e+00> : vector<32x256xf32>
    %60 = tpu.matmul %57, %59, %cst_53 {dimension_numbers = #tpu.dot_dimension_numbers<[1], [0], [0], [1], [0, 0, 1, 1], [], []>} : vector<32x256xbf16>, vector<256x256xbf16>, vector<32x256xf32> -> vector<32x256xf32>
    %61 = arith.addf %53, %60 : vector<32x256xf32>
    %c0_54 = arith.constant 0 : index
    %c0_55 = arith.constant 0 : index
    %62 = vector.load %arg8[%c0_54, %c0_55] : memref<1x256xf32, #tpu.memory_space<vmem>>, vector<1x256xf32>
    %63 = vector.broadcast %62 : vector<1x256xf32> to vector<32x256xf32>
    %64 = arith.mulf %61, %63 : vector<32x256xf32>
    %c0_56 = arith.constant 0 : index
    %c0_57 = arith.constant 0 : index
    %65 = vector.load %arg9[%c0_56, %c0_57] : memref<1x256xf32, #tpu.memory_space<vmem>>, vector<1x256xf32>
    %66 = vector.broadcast %65 : vector<1x256xf32> to vector<32x256xf32>
    %67 = arith.addf %64, %66 : vector<32x256xf32>
    %cst_58 = arith.constant 0.000000e+00 : f32
    %68 = vector.broadcast %cst_58 : f32 to vector<32x256xf32>
    %69 = arith.maximumf %67, %68 : vector<32x256xf32>
    %70 = arith.truncf %69 : vector<32x256xf32> to vector<32x256xbf16>
    %cst_59 = arith.constant 0.000000e+00 : f32
    %71 = vector.broadcast %cst_59 : f32 to vector<32x256xf32>
    %c0_60 = arith.constant 0 : index
    %c0_61 = arith.constant 0 : index
    %c0_62 = arith.constant 0 : index
    %72 = vector.load %arg10[%c0_60, %c0_61, %c0_62] : memref<3x32x32xbf16, #tpu.memory_space<vmem>>, vector<1x32x32xbf16>
    %73 = vector.shape_cast %72 : vector<1x32x32xbf16> to vector<32x32xbf16>
    %cst_63 = arith.constant dense<0.000000e+00> : vector<32x256xf32>
    %74 = tpu.matmul %73, %70, %cst_63 {dimension_numbers = #tpu.dot_dimension_numbers<[1], [0], [0], [1], [0, 0, 1, 1], [], []>} : vector<32x32xbf16>, vector<32x256xbf16>, vector<32x256xf32> -> vector<32x256xf32>
    %75 = arith.truncf %74 : vector<32x256xf32> to vector<32x256xbf16>
    %c0_64 = arith.constant 0 : index
    %c0_65 = arith.constant 0 : index
    %c0_66 = arith.constant 0 : index
    %76 = vector.load %arg11[%c0_64, %c0_65, %c0_66] : memref<3x256x256xbf16, #tpu.memory_space<vmem>>, vector<1x256x256xbf16>
    %77 = vector.shape_cast %76 : vector<1x256x256xbf16> to vector<256x256xbf16>
    %cst_67 = arith.constant dense<0.000000e+00> : vector<32x256xf32>
    %78 = tpu.matmul %75, %77, %cst_67 {dimension_numbers = #tpu.dot_dimension_numbers<[1], [0], [0], [1], [0, 0, 1, 1], [], []>} : vector<32x256xbf16>, vector<256x256xbf16>, vector<32x256xf32> -> vector<32x256xf32>
    %79 = arith.addf %71, %78 : vector<32x256xf32>
    %c1_68 = arith.constant 1 : index
    %c0_69 = arith.constant 0 : index
    %c0_70 = arith.constant 0 : index
    %80 = vector.load %arg10[%c1_68, %c0_69, %c0_70] : memref<3x32x32xbf16, #tpu.memory_space<vmem>>, vector<1x32x32xbf16>
    %81 = vector.shape_cast %80 : vector<1x32x32xbf16> to vector<32x32xbf16>
    %cst_71 = arith.constant dense<0.000000e+00> : vector<32x256xf32>
    %82 = tpu.matmul %81, %70, %cst_71 {dimension_numbers = #tpu.dot_dimension_numbers<[1], [0], [0], [1], [0, 0, 1, 1], [], []>} : vector<32x32xbf16>, vector<32x256xbf16>, vector<32x256xf32> -> vector<32x256xf32>
    %83 = arith.truncf %82 : vector<32x256xf32> to vector<32x256xbf16>
    %c1_72 = arith.constant 1 : index
    %c0_73 = arith.constant 0 : index
    %c0_74 = arith.constant 0 : index
    %84 = vector.load %arg11[%c1_72, %c0_73, %c0_74] : memref<3x256x256xbf16, #tpu.memory_space<vmem>>, vector<1x256x256xbf16>
    %85 = vector.shape_cast %84 : vector<1x256x256xbf16> to vector<256x256xbf16>
    %cst_75 = arith.constant dense<0.000000e+00> : vector<32x256xf32>
    %86 = tpu.matmul %83, %85, %cst_75 {dimension_numbers = #tpu.dot_dimension_numbers<[1], [0], [0], [1], [0, 0, 1, 1], [], []>} : vector<32x256xbf16>, vector<256x256xbf16>, vector<32x256xf32> -> vector<32x256xf32>
    %87 = arith.addf %79, %86 : vector<32x256xf32>
    %c2_76 = arith.constant 2 : index
    %c0_77 = arith.constant 0 : index
    %c0_78 = arith.constant 0 : index
    %88 = vector.load %arg10[%c2_76, %c0_77, %c0_78] : memref<3x32x32xbf16, #tpu.memory_space<vmem>>, vector<1x32x32xbf16>
    %89 = vector.shape_cast %88 : vector<1x32x32xbf16> to vector<32x32xbf16>
    %cst_79 = arith.constant dense<0.000000e+00> : vector<32x256xf32>
    %90 = tpu.matmul %89, %70, %cst_79 {dimension_numbers = #tpu.dot_dimension_numbers<[1], [0], [0], [1], [0, 0, 1, 1], [], []>} : vector<32x32xbf16>, vector<32x256xbf16>, vector<32x256xf32> -> vector<32x256xf32>
    %91 = arith.truncf %90 : vector<32x256xf32> to vector<32x256xbf16>
    %c2_80 = arith.constant 2 : index
    %c0_81 = arith.constant 0 : index
    %c0_82 = arith.constant 0 : index
    %92 = vector.load %arg11[%c2_80, %c0_81, %c0_82] : memref<3x256x256xbf16, #tpu.memory_space<vmem>>, vector<1x256x256xbf16>
    %93 = vector.shape_cast %92 : vector<1x256x256xbf16> to vector<256x256xbf16>
    %cst_83 = arith.constant dense<0.000000e+00> : vector<32x256xf32>
    %94 = tpu.matmul %91, %93, %cst_83 {dimension_numbers = #tpu.dot_dimension_numbers<[1], [0], [0], [1], [0, 0, 1, 1], [], []>} : vector<32x256xbf16>, vector<256x256xbf16>, vector<32x256xf32> -> vector<32x256xf32>
    %95 = arith.addf %87, %94 : vector<32x256xf32>
    %c0_84 = arith.constant 0 : index
    %c0_85 = arith.constant 0 : index
    %96 = vector.load %arg12[%c0_84, %c0_85] : memref<1x256xf32, #tpu.memory_space<vmem>>, vector<1x256xf32>
    %97 = vector.broadcast %96 : vector<1x256xf32> to vector<32x256xf32>
    %98 = arith.mulf %95, %97 : vector<32x256xf32>
    %c0_86 = arith.constant 0 : index
    %c0_87 = arith.constant 0 : index
    %99 = vector.load %arg13[%c0_86, %c0_87] : memref<1x256xf32, #tpu.memory_space<vmem>>, vector<1x256xf32>
    %100 = vector.broadcast %99 : vector<1x256xf32> to vector<32x256xf32>
    %101 = arith.addf %98, %100 : vector<32x256xf32>
    %102 = arith.addf %101, %35 : vector<32x256xf32>
    %cst_88 = arith.constant 0.000000e+00 : f32
    %103 = vector.broadcast %cst_88 : f32 to vector<32x256xf32>
    %104 = arith.maximumf %102, %103 : vector<32x256xf32>
    %105 = arith.truncf %104 : vector<32x256xf32> to vector<32x256xbf16>
    %cst_89 = arith.constant 0.000000e+00 : f32
    %106 = vector.broadcast %cst_89 : f32 to vector<16x256xf32>
    %c0_90 = arith.constant 0 : index
    %c0_91 = arith.constant 0 : index
    %c0_92 = arith.constant 0 : index
    %107 = vector.load %arg14[%c0_90, %c0_91, %c0_92] : memref<3x16x32xbf16, #tpu.memory_space<vmem>>, vector<1x16x32xbf16>
    %108 = vector.shape_cast %107 : vector<1x16x32xbf16> to vector<16x32xbf16>
    %cst_93 = arith.constant dense<0.000000e+00> : vector<16x256xf32>
    %109 = tpu.matmul %108, %105, %cst_93 {dimension_numbers = #tpu.dot_dimension_numbers<[1], [0], [0], [1], [0, 0, 1, 1], [], []>} : vector<16x32xbf16>, vector<32x256xbf16>, vector<16x256xf32> -> vector<16x256xf32>
    %110 = arith.truncf %109 : vector<16x256xf32> to vector<16x256xbf16>
    %c0_94 = arith.constant 0 : index
    %c0_95 = arith.constant 0 : index
    %c0_96 = arith.constant 0 : index
    %111 = vector.load %arg15[%c0_94, %c0_95, %c0_96] : memref<3x256x256xbf16, #tpu.memory_space<vmem>>, vector<1x256x256xbf16>
    %112 = vector.shape_cast %111 : vector<1x256x256xbf16> to vector<256x256xbf16>
    %cst_97 = arith.constant dense<0.000000e+00> : vector<16x256xf32>
    %113 = tpu.matmul %110, %112, %cst_97 {dimension_numbers = #tpu.dot_dimension_numbers<[1], [0], [0], [1], [0, 0, 1, 1], [], []>} : vector<16x256xbf16>, vector<256x256xbf16>, vector<16x256xf32> -> vector<16x256xf32>
    %114 = arith.addf %106, %113 : vector<16x256xf32>
    %c1_98 = arith.constant 1 : index
    %c0_99 = arith.constant 0 : index
    %c0_100 = arith.constant 0 : index
    %115 = vector.load %arg14[%c1_98, %c0_99, %c0_100] : memref<3x16x32xbf16, #tpu.memory_space<vmem>>, vector<1x16x32xbf16>
    %116 = vector.shape_cast %115 : vector<1x16x32xbf16> to vector<16x32xbf16>
    %cst_101 = arith.constant dense<0.000000e+00> : vector<16x256xf32>
    %117 = tpu.matmul %116, %105, %cst_101 {dimension_numbers = #tpu.dot_dimension_numbers<[1], [0], [0], [1], [0, 0, 1, 1], [], []>} : vector<16x32xbf16>, vector<32x256xbf16>, vector<16x256xf32> -> vector<16x256xf32>
    %118 = arith.truncf %117 : vector<16x256xf32> to vector<16x256xbf16>
    %c1_102 = arith.constant 1 : index
    %c0_103 = arith.constant 0 : index
    %c0_104 = arith.constant 0 : index
    %119 = vector.load %arg15[%c1_102, %c0_103, %c0_104] : memref<3x256x256xbf16, #tpu.memory_space<vmem>>, vector<1x256x256xbf16>
    %120 = vector.shape_cast %119 : vector<1x256x256xbf16> to vector<256x256xbf16>
    %cst_105 = arith.constant dense<0.000000e+00> : vector<16x256xf32>
    %121 = tpu.matmul %118, %120, %cst_105 {dimension_numbers = #tpu.dot_dimension_numbers<[1], [0], [0], [1], [0, 0, 1, 1], [], []>} : vector<16x256xbf16>, vector<256x256xbf16>, vector<16x256xf32> -> vector<16x256xf32>
    %122 = arith.addf %114, %121 : vector<16x256xf32>
    %c2_106 = arith.constant 2 : index
    %c0_107 = arith.constant 0 : index
    %c0_108 = arith.constant 0 : index
    %123 = vector.load %arg14[%c2_106, %c0_107, %c0_108] : memref<3x16x32xbf16, #tpu.memory_space<vmem>>, vector<1x16x32xbf16>
    %124 = vector.shape_cast %123 : vector<1x16x32xbf16> to vector<16x32xbf16>
    %cst_109 = arith.constant dense<0.000000e+00> : vector<16x256xf32>
    %125 = tpu.matmul %124, %105, %cst_109 {dimension_numbers = #tpu.dot_dimension_numbers<[1], [0], [0], [1], [0, 0, 1, 1], [], []>} : vector<16x32xbf16>, vector<32x256xbf16>, vector<16x256xf32> -> vector<16x256xf32>
    %126 = arith.truncf %125 : vector<16x256xf32> to vector<16x256xbf16>
    %c2_110 = arith.constant 2 : index
    %c0_111 = arith.constant 0 : index
    %c0_112 = arith.constant 0 : index
    %127 = vector.load %arg15[%c2_110, %c0_111, %c0_112] : memref<3x256x256xbf16, #tpu.memory_space<vmem>>, vector<1x256x256xbf16>
    %128 = vector.shape_cast %127 : vector<1x256x256xbf16> to vector<256x256xbf16>
    %cst_113 = arith.constant dense<0.000000e+00> : vector<16x256xf32>
    %129 = tpu.matmul %126, %128, %cst_113 {dimension_numbers = #tpu.dot_dimension_numbers<[1], [0], [0], [1], [0, 0, 1, 1], [], []>} : vector<16x256xbf16>, vector<256x256xbf16>, vector<16x256xf32> -> vector<16x256xf32>
    %130 = arith.addf %122, %129 : vector<16x256xf32>
    %c0_114 = arith.constant 0 : index
    %c0_115 = arith.constant 0 : index
    %131 = vector.load %arg16[%c0_114, %c0_115] : memref<1x256xf32, #tpu.memory_space<vmem>>, vector<1x256xf32>
    %132 = vector.broadcast %131 : vector<1x256xf32> to vector<16x256xf32>
    %133 = arith.mulf %130, %132 : vector<16x256xf32>
    %c0_116 = arith.constant 0 : index
    %c0_117 = arith.constant 0 : index
    %134 = vector.load %arg17[%c0_116, %c0_117] : memref<1x256xf32, #tpu.memory_space<vmem>>, vector<1x256xf32>
    %135 = vector.broadcast %134 : vector<1x256xf32> to vector<16x256xf32>
    %136 = arith.addf %133, %135 : vector<16x256xf32>
    %cst_118 = arith.constant 0.000000e+00 : f32
    %137 = vector.broadcast %cst_118 : f32 to vector<16x256xf32>
    %138 = arith.maximumf %136, %137 : vector<16x256xf32>
    %139 = arith.truncf %138 : vector<16x256xf32> to vector<16x256xbf16>
    %cst_119 = arith.constant 0.000000e+00 : f32
    %140 = vector.broadcast %cst_119 : f32 to vector<16x256xf32>
    %c0_120 = arith.constant 0 : index
    %c0_121 = arith.constant 0 : index
    %c0_122 = arith.constant 0 : index
    %141 = vector.load %arg18[%c0_120, %c0_121, %c0_122] : memref<3x16x16xbf16, #tpu.memory_space<vmem>>, vector<1x16x16xbf16>
    %142 = vector.shape_cast %141 : vector<1x16x16xbf16> to vector<16x16xbf16>
    %cst_123 = arith.constant dense<0.000000e+00> : vector<16x256xf32>
    %143 = tpu.matmul %142, %139, %cst_123 {dimension_numbers = #tpu.dot_dimension_numbers<[1], [0], [0], [1], [0, 0, 1, 1], [], []>} : vector<16x16xbf16>, vector<16x256xbf16>, vector<16x256xf32> -> vector<16x256xf32>
    %144 = arith.truncf %143 : vector<16x256xf32> to vector<16x256xbf16>
    %c0_124 = arith.constant 0 : index
    %c0_125 = arith.constant 0 : index
    %c0_126 = arith.constant 0 : index
    %145 = vector.load %arg19[%c0_124, %c0_125, %c0_126] : memref<3x256x256xbf16, #tpu.memory_space<vmem>>, vector<1x256x256xbf16>
    %146 = vector.shape_cast %145 : vector<1x256x256xbf16> to vector<256x256xbf16>
    %cst_127 = arith.constant dense<0.000000e+00> : vector<16x256xf32>
    %147 = tpu.matmul %144, %146, %cst_127 {dimension_numbers = #tpu.dot_dimension_numbers<[1], [0], [0], [1], [0, 0, 1, 1], [], []>} : vector<16x256xbf16>, vector<256x256xbf16>, vector<16x256xf32> -> vector<16x256xf32>
    %148 = arith.addf %140, %147 : vector<16x256xf32>
    %c1_128 = arith.constant 1 : index
    %c0_129 = arith.constant 0 : index
    %c0_130 = arith.constant 0 : index
    %149 = vector.load %arg18[%c1_128, %c0_129, %c0_130] : memref<3x16x16xbf16, #tpu.memory_space<vmem>>, vector<1x16x16xbf16>
    %150 = vector.shape_cast %149 : vector<1x16x16xbf16> to vector<16x16xbf16>
    %cst_131 = arith.constant dense<0.000000e+00> : vector<16x256xf32>
    %151 = tpu.matmul %150, %139, %cst_131 {dimension_numbers = #tpu.dot_dimension_numbers<[1], [0], [0], [1], [0, 0, 1, 1], [], []>} : vector<16x16xbf16>, vector<16x256xbf16>, vector<16x256xf32> -> vector<16x256xf32>
    %152 = arith.truncf %151 : vector<16x256xf32> to vector<16x256xbf16>
    %c1_132 = arith.constant 1 : index
    %c0_133 = arith.constant 0 : index
    %c0_134 = arith.constant 0 : index
    %153 = vector.load %arg19[%c1_132, %c0_133, %c0_134] : memref<3x256x256xbf16, #tpu.memory_space<vmem>>, vector<1x256x256xbf16>
    %154 = vector.shape_cast %153 : vector<1x256x256xbf16> to vector<256x256xbf16>
    %cst_135 = arith.constant dense<0.000000e+00> : vector<16x256xf32>
    %155 = tpu.matmul %152, %154, %cst_135 {dimension_numbers = #tpu.dot_dimension_numbers<[1], [0], [0], [1], [0, 0, 1, 1], [], []>} : vector<16x256xbf16>, vector<256x256xbf16>, vector<16x256xf32> -> vector<16x256xf32>
    %156 = arith.addf %148, %155 : vector<16x256xf32>
    %c2_136 = arith.constant 2 : index
    %c0_137 = arith.constant 0 : index
    %c0_138 = arith.constant 0 : index
    %157 = vector.load %arg18[%c2_136, %c0_137, %c0_138] : memref<3x16x16xbf16, #tpu.memory_space<vmem>>, vector<1x16x16xbf16>
    %158 = vector.shape_cast %157 : vector<1x16x16xbf16> to vector<16x16xbf16>
    %cst_139 = arith.constant dense<0.000000e+00> : vector<16x256xf32>
    %159 = tpu.matmul %158, %139, %cst_139 {dimension_numbers = #tpu.dot_dimension_numbers<[1], [0], [0], [1], [0, 0, 1, 1], [], []>} : vector<16x16xbf16>, vector<16x256xbf16>, vector<16x256xf32> -> vector<16x256xf32>
    %160 = arith.truncf %159 : vector<16x256xf32> to vector<16x256xbf16>
    %c2_140 = arith.constant 2 : index
    %c0_141 = arith.constant 0 : index
    %c0_142 = arith.constant 0 : index
    %161 = vector.load %arg19[%c2_140, %c0_141, %c0_142] : memref<3x256x256xbf16, #tpu.memory_space<vmem>>, vector<1x256x256xbf16>
    %162 = vector.shape_cast %161 : vector<1x256x256xbf16> to vector<256x256xbf16>
    %cst_143 = arith.constant dense<0.000000e+00> : vector<16x256xf32>
    %163 = tpu.matmul %160, %162, %cst_143 {dimension_numbers = #tpu.dot_dimension_numbers<[1], [0], [0], [1], [0, 0, 1, 1], [], []>} : vector<16x256xbf16>, vector<256x256xbf16>, vector<16x256xf32> -> vector<16x256xf32>
    %164 = arith.addf %156, %163 : vector<16x256xf32>
    %c0_144 = arith.constant 0 : index
    %c0_145 = arith.constant 0 : index
    %165 = vector.load %arg20[%c0_144, %c0_145] : memref<1x256xf32, #tpu.memory_space<vmem>>, vector<1x256xf32>
    %166 = vector.broadcast %165 : vector<1x256xf32> to vector<16x256xf32>
    %167 = arith.mulf %164, %166 : vector<16x256xf32>
    %c0_146 = arith.constant 0 : index
    %c0_147 = arith.constant 0 : index
    %168 = vector.load %arg21[%c0_146, %c0_147] : memref<1x256xf32, #tpu.memory_space<vmem>>, vector<1x256xf32>
    %169 = vector.broadcast %168 : vector<1x256xf32> to vector<16x256xf32>
    %170 = arith.addf %167, %169 : vector<16x256xf32>
    %171 = arith.truncf %104 : vector<32x256xf32> to vector<32x256xbf16>
    %cst_148 = arith.constant 0.000000e+00 : f32
    %172 = vector.broadcast %cst_148 : f32 to vector<16x256xf32>
    %c0_149 = arith.constant 0 : index
    %c0_150 = arith.constant 0 : index
    %c0_151 = arith.constant 0 : index
    %173 = vector.load %arg22[%c0_149, %c0_150, %c0_151] : memref<1x16x32xbf16, #tpu.memory_space<vmem>>, vector<1x16x32xbf16>
    %174 = vector.shape_cast %173 : vector<1x16x32xbf16> to vector<16x32xbf16>
    %cst_152 = arith.constant dense<0.000000e+00> : vector<16x256xf32>
    %175 = tpu.matmul %174, %171, %cst_152 {dimension_numbers = #tpu.dot_dimension_numbers<[1], [0], [0], [1], [0, 0, 1, 1], [], []>} : vector<16x32xbf16>, vector<32x256xbf16>, vector<16x256xf32> -> vector<16x256xf32>
    %176 = arith.truncf %175 : vector<16x256xf32> to vector<16x256xbf16>
    %c0_153 = arith.constant 0 : index
    %c0_154 = arith.constant 0 : index
    %c0_155 = arith.constant 0 : index
    %177 = vector.load %arg23[%c0_153, %c0_154, %c0_155] : memref<1x256x256xbf16, #tpu.memory_space<vmem>>, vector<1x256x256xbf16>
    %178 = vector.shape_cast %177 : vector<1x256x256xbf16> to vector<256x256xbf16>
    %cst_156 = arith.constant dense<0.000000e+00> : vector<16x256xf32>
    %179 = tpu.matmul %176, %178, %cst_156 {dimension_numbers = #tpu.dot_dimension_numbers<[1], [0], [0], [1], [0, 0, 1, 1], [], []>} : vector<16x256xbf16>, vector<256x256xbf16>, vector<16x256xf32> -> vector<16x256xf32>
    %180 = arith.addf %172, %179 : vector<16x256xf32>
    %c0_157 = arith.constant 0 : index
    %c0_158 = arith.constant 0 : index
    %181 = vector.load %arg24[%c0_157, %c0_158] : memref<1x256xf32, #tpu.memory_space<vmem>>, vector<1x256xf32>
    %182 = vector.broadcast %181 : vector<1x256xf32> to vector<16x256xf32>
    %183 = arith.mulf %180, %182 : vector<16x256xf32>
    %c0_159 = arith.constant 0 : index
    %c0_160 = arith.constant 0 : index
    %184 = vector.load %arg25[%c0_159, %c0_160] : memref<1x256xf32, #tpu.memory_space<vmem>>, vector<1x256xf32>
    %185 = vector.broadcast %184 : vector<1x256xf32> to vector<16x256xf32>
    %186 = arith.addf %183, %185 : vector<16x256xf32>
    %187 = arith.addf %170, %186 : vector<16x256xf32>
    %cst_161 = arith.constant 0.000000e+00 : f32
    %188 = vector.broadcast %cst_161 : f32 to vector<16x256xf32>
    %189 = arith.maximumf %187, %188 : vector<16x256xf32>
    %190 = arith.truncf %189 : vector<16x256xf32> to vector<16x256xbf16>
    %cst_162 = arith.constant 0.000000e+00 : f32
    %191 = vector.broadcast %cst_162 : f32 to vector<8x256xf32>
    %c0_163 = arith.constant 0 : index
    %c0_164 = arith.constant 0 : index
    %c0_165 = arith.constant 0 : index
    %192 = vector.load %arg26[%c0_163, %c0_164, %c0_165] : memref<3x8x16xbf16, #tpu.memory_space<vmem>>, vector<1x8x16xbf16>
    %193 = vector.shape_cast %192 : vector<1x8x16xbf16> to vector<8x16xbf16>
    %cst_166 = arith.constant dense<0.000000e+00> : vector<8x256xf32>
    %194 = tpu.matmul %193, %190, %cst_166 {dimension_numbers = #tpu.dot_dimension_numbers<[1], [0], [0], [1], [0, 0, 1, 1], [], []>} : vector<8x16xbf16>, vector<16x256xbf16>, vector<8x256xf32> -> vector<8x256xf32>
    %195 = arith.truncf %194 : vector<8x256xf32> to vector<8x256xbf16>
    %c0_167 = arith.constant 0 : index
    %c0_168 = arith.constant 0 : index
    %c0_169 = arith.constant 0 : index
    %196 = vector.load %arg27[%c0_167, %c0_168, %c0_169] : memref<3x256x256xbf16, #tpu.memory_space<vmem>>, vector<1x256x256xbf16>
    %197 = vector.shape_cast %196 : vector<1x256x256xbf16> to vector<256x256xbf16>
    %cst_170 = arith.constant dense<0.000000e+00> : vector<8x256xf32>
    %198 = tpu.matmul %195, %197, %cst_170 {dimension_numbers = #tpu.dot_dimension_numbers<[1], [0], [0], [1], [0, 0, 1, 1], [], []>} : vector<8x256xbf16>, vector<256x256xbf16>, vector<8x256xf32> -> vector<8x256xf32>
    %199 = arith.addf %191, %198 : vector<8x256xf32>
    %c1_171 = arith.constant 1 : index
    %c0_172 = arith.constant 0 : index
    %c0_173 = arith.constant 0 : index
    %200 = vector.load %arg26[%c1_171, %c0_172, %c0_173] : memref<3x8x16xbf16, #tpu.memory_space<vmem>>, vector<1x8x16xbf16>
    %201 = vector.shape_cast %200 : vector<1x8x16xbf16> to vector<8x16xbf16>
    %cst_174 = arith.constant dense<0.000000e+00> : vector<8x256xf32>
    %202 = tpu.matmul %201, %190, %cst_174 {dimension_numbers = #tpu.dot_dimension_numbers<[1], [0], [0], [1], [0, 0, 1, 1], [], []>} : vector<8x16xbf16>, vector<16x256xbf16>, vector<8x256xf32> -> vector<8x256xf32>
    %203 = arith.truncf %202 : vector<8x256xf32> to vector<8x256xbf16>
    %c1_175 = arith.constant 1 : index
    %c0_176 = arith.constant 0 : index
    %c0_177 = arith.constant 0 : index
    %204 = vector.load %arg27[%c1_175, %c0_176, %c0_177] : memref<3x256x256xbf16, #tpu.memory_space<vmem>>, vector<1x256x256xbf16>
    %205 = vector.shape_cast %204 : vector<1x256x256xbf16> to vector<256x256xbf16>
    %cst_178 = arith.constant dense<0.000000e+00> : vector<8x256xf32>
    %206 = tpu.matmul %203, %205, %cst_178 {dimension_numbers = #tpu.dot_dimension_numbers<[1], [0], [0], [1], [0, 0, 1, 1], [], []>} : vector<8x256xbf16>, vector<256x256xbf16>, vector<8x256xf32> -> vector<8x256xf32>
    %207 = arith.addf %199, %206 : vector<8x256xf32>
    %c2_179 = arith.constant 2 : index
    %c0_180 = arith.constant 0 : index
    %c0_181 = arith.constant 0 : index
    %208 = vector.load %arg26[%c2_179, %c0_180, %c0_181] : memref<3x8x16xbf16, #tpu.memory_space<vmem>>, vector<1x8x16xbf16>
    %209 = vector.shape_cast %208 : vector<1x8x16xbf16> to vector<8x16xbf16>
    %cst_182 = arith.constant dense<0.000000e+00> : vector<8x256xf32>
    %210 = tpu.matmul %209, %190, %cst_182 {dimension_numbers = #tpu.dot_dimension_numbers<[1], [0], [0], [1], [0, 0, 1, 1], [], []>} : vector<8x16xbf16>, vector<16x256xbf16>, vector<8x256xf32> -> vector<8x256xf32>
    %211 = arith.truncf %210 : vector<8x256xf32> to vector<8x256xbf16>
    %c2_183 = arith.constant 2 : index
    %c0_184 = arith.constant 0 : index
    %c0_185 = arith.constant 0 : index
    %212 = vector.load %arg27[%c2_183, %c0_184, %c0_185] : memref<3x256x256xbf16, #tpu.memory_space<vmem>>, vector<1x256x256xbf16>
    %213 = vector.shape_cast %212 : vector<1x256x256xbf16> to vector<256x256xbf16>
    %cst_186 = arith.constant dense<0.000000e+00> : vector<8x256xf32>
    %214 = tpu.matmul %211, %213, %cst_186 {dimension_numbers = #tpu.dot_dimension_numbers<[1], [0], [0], [1], [0, 0, 1, 1], [], []>} : vector<8x256xbf16>, vector<256x256xbf16>, vector<8x256xf32> -> vector<8x256xf32>
    %215 = arith.addf %207, %214 : vector<8x256xf32>
    %c0_187 = arith.constant 0 : index
    %c0_188 = arith.constant 0 : index
    %216 = vector.load %arg28[%c0_187, %c0_188] : memref<1x256xf32, #tpu.memory_space<vmem>>, vector<1x256xf32>
    %217 = vector.broadcast %216 : vector<1x256xf32> to vector<8x256xf32>
    %218 = arith.mulf %215, %217 : vector<8x256xf32>
    %c0_189 = arith.constant 0 : index
    %c0_190 = arith.constant 0 : index
    %219 = vector.load %arg29[%c0_189, %c0_190] : memref<1x256xf32, #tpu.memory_space<vmem>>, vector<1x256xf32>
    %220 = vector.broadcast %219 : vector<1x256xf32> to vector<8x256xf32>
    %221 = arith.addf %218, %220 : vector<8x256xf32>
    %cst_191 = arith.constant 0.000000e+00 : f32
    %222 = vector.broadcast %cst_191 : f32 to vector<8x256xf32>
    %223 = arith.maximumf %221, %222 : vector<8x256xf32>
    %224 = arith.truncf %223 : vector<8x256xf32> to vector<8x256xbf16>
    %cst_192 = arith.constant 0.000000e+00 : f32
    %225 = vector.broadcast %cst_192 : f32 to vector<8x256xf32>
    %c0_193 = arith.constant 0 : index
    %c0_194 = arith.constant 0 : index
    %c0_195 = arith.constant 0 : index
    %226 = vector.load %arg30[%c0_193, %c0_194, %c0_195] : memref<3x8x8xbf16, #tpu.memory_space<vmem>>, vector<1x8x8xbf16>
    %227 = vector.shape_cast %226 : vector<1x8x8xbf16> to vector<8x8xbf16>
    %cst_196 = arith.constant dense<0.000000e+00> : vector<8x256xf32>
    %228 = tpu.matmul %227, %224, %cst_196 {dimension_numbers = #tpu.dot_dimension_numbers<[1], [0], [0], [1], [0, 0, 1, 1], [], []>} : vector<8x8xbf16>, vector<8x256xbf16>, vector<8x256xf32> -> vector<8x256xf32>
    %229 = arith.truncf %228 : vector<8x256xf32> to vector<8x256xbf16>
    %c0_197 = arith.constant 0 : index
    %c0_198 = arith.constant 0 : index
    %c0_199 = arith.constant 0 : index
    %230 = vector.load %arg31[%c0_197, %c0_198, %c0_199] : memref<3x256x256xbf16, #tpu.memory_space<vmem>>, vector<1x256x256xbf16>
    %231 = vector.shape_cast %230 : vector<1x256x256xbf16> to vector<256x256xbf16>
    %cst_200 = arith.constant dense<0.000000e+00> : vector<8x256xf32>
    %232 = tpu.matmul %229, %231, %cst_200 {dimension_numbers = #tpu.dot_dimension_numbers<[1], [0], [0], [1], [0, 0, 1, 1], [], []>} : vector<8x256xbf16>, vector<256x256xbf16>, vector<8x256xf32> -> vector<8x256xf32>
    %233 = arith.addf %225, %232 : vector<8x256xf32>
    %c1_201 = arith.constant 1 : index
    %c0_202 = arith.constant 0 : index
    %c0_203 = arith.constant 0 : index
    %234 = vector.load %arg30[%c1_201, %c0_202, %c0_203] : memref<3x8x8xbf16, #tpu.memory_space<vmem>>, vector<1x8x8xbf16>
    %235 = vector.shape_cast %234 : vector<1x8x8xbf16> to vector<8x8xbf16>
    %cst_204 = arith.constant dense<0.000000e+00> : vector<8x256xf32>
    %236 = tpu.matmul %235, %224, %cst_204 {dimension_numbers = #tpu.dot_dimension_numbers<[1], [0], [0], [1], [0, 0, 1, 1], [], []>} : vector<8x8xbf16>, vector<8x256xbf16>, vector<8x256xf32> -> vector<8x256xf32>
    %237 = arith.truncf %236 : vector<8x256xf32> to vector<8x256xbf16>
    %c1_205 = arith.constant 1 : index
    %c0_206 = arith.constant 0 : index
    %c0_207 = arith.constant 0 : index
    %238 = vector.load %arg31[%c1_205, %c0_206, %c0_207] : memref<3x256x256xbf16, #tpu.memory_space<vmem>>, vector<1x256x256xbf16>
    %239 = vector.shape_cast %238 : vector<1x256x256xbf16> to vector<256x256xbf16>
    %cst_208 = arith.constant dense<0.000000e+00> : vector<8x256xf32>
    %240 = tpu.matmul %237, %239, %cst_208 {dimension_numbers = #tpu.dot_dimension_numbers<[1], [0], [0], [1], [0, 0, 1, 1], [], []>} : vector<8x256xbf16>, vector<256x256xbf16>, vector<8x256xf32> -> vector<8x256xf32>
    %241 = arith.addf %233, %240 : vector<8x256xf32>
    %c2_209 = arith.constant 2 : index
    %c0_210 = arith.constant 0 : index
    %c0_211 = arith.constant 0 : index
    %242 = vector.load %arg30[%c2_209, %c0_210, %c0_211] : memref<3x8x8xbf16, #tpu.memory_space<vmem>>, vector<1x8x8xbf16>
    %243 = vector.shape_cast %242 : vector<1x8x8xbf16> to vector<8x8xbf16>
    %cst_212 = arith.constant dense<0.000000e+00> : vector<8x256xf32>
    %244 = tpu.matmul %243, %224, %cst_212 {dimension_numbers = #tpu.dot_dimension_numbers<[1], [0], [0], [1], [0, 0, 1, 1], [], []>} : vector<8x8xbf16>, vector<8x256xbf16>, vector<8x256xf32> -> vector<8x256xf32>
    %245 = arith.truncf %244 : vector<8x256xf32> to vector<8x256xbf16>
    %c2_213 = arith.constant 2 : index
    %c0_214 = arith.constant 0 : index
    %c0_215 = arith.constant 0 : index
    %246 = vector.load %arg31[%c2_213, %c0_214, %c0_215] : memref<3x256x256xbf16, #tpu.memory_space<vmem>>, vector<1x256x256xbf16>
    %247 = vector.shape_cast %246 : vector<1x256x256xbf16> to vector<256x256xbf16>
    %cst_216 = arith.constant dense<0.000000e+00> : vector<8x256xf32>
    %248 = tpu.matmul %245, %247, %cst_216 {dimension_numbers = #tpu.dot_dimension_numbers<[1], [0], [0], [1], [0, 0, 1, 1], [], []>} : vector<8x256xbf16>, vector<256x256xbf16>, vector<8x256xf32> -> vector<8x256xf32>
    %249 = arith.addf %241, %248 : vector<8x256xf32>
    %c0_217 = arith.constant 0 : index
    %c0_218 = arith.constant 0 : index
    %250 = vector.load %arg32[%c0_217, %c0_218] : memref<1x256xf32, #tpu.memory_space<vmem>>, vector<1x256xf32>
    %251 = vector.broadcast %250 : vector<1x256xf32> to vector<8x256xf32>
    %252 = arith.mulf %249, %251 : vector<8x256xf32>
    %c0_219 = arith.constant 0 : index
    %c0_220 = arith.constant 0 : index
    %253 = vector.load %arg33[%c0_219, %c0_220] : memref<1x256xf32, #tpu.memory_space<vmem>>, vector<1x256xf32>
    %254 = vector.broadcast %253 : vector<1x256xf32> to vector<8x256xf32>
    %255 = arith.addf %252, %254 : vector<8x256xf32>
    %256 = arith.truncf %189 : vector<16x256xf32> to vector<16x256xbf16>
    %cst_221 = arith.constant 0.000000e+00 : f32
    %257 = vector.broadcast %cst_221 : f32 to vector<8x256xf32>
    %c0_222 = arith.constant 0 : index
    %c0_223 = arith.constant 0 : index
    %c0_224 = arith.constant 0 : index
    %258 = vector.load %arg34[%c0_222, %c0_223, %c0_224] : memref<1x8x16xbf16, #tpu.memory_space<vmem>>, vector<1x8x16xbf16>
    %259 = vector.shape_cast %258 : vector<1x8x16xbf16> to vector<8x16xbf16>
    %cst_225 = arith.constant dense<0.000000e+00> : vector<8x256xf32>
    %260 = tpu.matmul %259, %256, %cst_225 {dimension_numbers = #tpu.dot_dimension_numbers<[1], [0], [0], [1], [0, 0, 1, 1], [], []>} : vector<8x16xbf16>, vector<16x256xbf16>, vector<8x256xf32> -> vector<8x256xf32>
    %261 = arith.truncf %260 : vector<8x256xf32> to vector<8x256xbf16>
    %c0_226 = arith.constant 0 : index
    %c0_227 = arith.constant 0 : index
    %c0_228 = arith.constant 0 : index
    %262 = vector.load %arg35[%c0_226, %c0_227, %c0_228] : memref<1x256x256xbf16, #tpu.memory_space<vmem>>, vector<1x256x256xbf16>
    %263 = vector.shape_cast %262 : vector<1x256x256xbf16> to vector<256x256xbf16>
    %cst_229 = arith.constant dense<0.000000e+00> : vector<8x256xf32>
    %264 = tpu.matmul %261, %263, %cst_229 {dimension_numbers = #tpu.dot_dimension_numbers<[1], [0], [0], [1], [0, 0, 1, 1], [], []>} : vector<8x256xbf16>, vector<256x256xbf16>, vector<8x256xf32> -> vector<8x256xf32>
    %265 = arith.addf %257, %264 : vector<8x256xf32>
    %c0_230 = arith.constant 0 : index
    %c0_231 = arith.constant 0 : index
    %266 = vector.load %arg36[%c0_230, %c0_231] : memref<1x256xf32, #tpu.memory_space<vmem>>, vector<1x256xf32>
    %267 = vector.broadcast %266 : vector<1x256xf32> to vector<8x256xf32>
    %268 = arith.mulf %265, %267 : vector<8x256xf32>
    %c0_232 = arith.constant 0 : index
    %c0_233 = arith.constant 0 : index
    %269 = vector.load %arg37[%c0_232, %c0_233] : memref<1x256xf32, #tpu.memory_space<vmem>>, vector<1x256xf32>
    %270 = vector.broadcast %269 : vector<1x256xf32> to vector<8x256xf32>
    %271 = arith.addf %268, %270 : vector<8x256xf32>
    %272 = arith.addf %255, %271 : vector<8x256xf32>
    %cst_234 = arith.constant 0.000000e+00 : f32
    %273 = vector.broadcast %cst_234 : f32 to vector<8x256xf32>
    %274 = arith.maximumf %272, %273 : vector<8x256xf32>
    %cst_235 = arith.constant dense<0.000000e+00> : vector<256xf32>
    %275 = vector.multi_reduction <add>, %274, %cst_235 [0] : vector<8x256xf32> to vector<256xf32>
    %276 = vector.shape_cast %275 : vector<256xf32> to vector<1x256xf32>
    %cst_236 = arith.constant 8.000000e+00 : f32
    %277 = vector.broadcast %cst_236 : f32 to vector<1x256xf32>
    %278 = arith.divf %276, %277 : vector<1x256xf32>
    %279 = arith.truncf %278 : vector<1x256xf32> to vector<1x256xbf16>
    %c0_237 = arith.constant 0 : index
    %c0_238 = arith.constant 0 : index
    %280 = vector.load %arg38[%c0_237, %c0_238] : memref<256x10xbf16, #tpu.memory_space<vmem>>, vector<256x10xbf16>
    %cst_239 = arith.constant dense<0.000000e+00> : vector<1x10xf32>
    %281 = tpu.matmul %279, %280, %cst_239 {dimension_numbers = #tpu.dot_dimension_numbers<[1], [0], [0], [1], [0, 0, 1, 1], [], []>} : vector<1x256xbf16>, vector<256x10xbf16>, vector<1x10xf32> -> vector<1x10xf32>
    %c0_240 = arith.constant 0 : index
    %c0_241 = arith.constant 0 : index
    %282 = vector.load %arg39[%c0_240, %c0_241] : memref<1x10xf32, #tpu.memory_space<vmem>>, vector<1x10xf32>
    %283 = arith.addf %281, %282 : vector<1x10xf32>
    %c0_242 = arith.constant 0 : index
    %c0_243 = arith.constant 0 : index
    %c0_244 = arith.constant 0 : index
    %284 = vector.load %arg40[%c0_242, %c0_243, %c0_244] : memref<1x1x10xf32, #tpu.memory_space<vmem>>, vector<1x1x10xf32>
    %285 = vector.shape_cast %284 : vector<1x1x10xf32> to vector<1x10xf32>
    %286 = vector.shape_cast %283 : vector<1x10xf32> to vector<1x1x10xf32>
    tpu.vector_store %arg40[%c0_242, %c0_243, %c0_244], %286 {strides = array<i32>} : memref<1x1x10xf32, #tpu.memory_space<vmem>>, vector<1x1x10xf32>,
    return
  }
  func.func @transform_0(%arg0: i32) -> (i32, i32, i32) {
    %c0_i32 = arith.constant 0 : i32
    %c0_i32_0 = arith.constant 0 : i32
    %c0_i32_1 = arith.constant 0 : i32
    return %arg0, %c0_i32, %c0_i32_0 : i32, i32, i32
  }
  func.func @transform_1(%arg0: i32) -> (i32, i32, i32) {
    %c0_i32 = arith.constant 0 : i32
    %c0_i32_0 = arith.constant 0 : i32
    %c0_i32_1 = arith.constant 0 : i32
    %c0_i32_2 = arith.constant 0 : i32
    return %c0_i32, %c0_i32_0, %c0_i32_1 : i32, i32, i32
  }
  func.func @transform_2(%arg0: i32) -> (i32, i32, i32) {
    %c0_i32 = arith.constant 0 : i32
    %c0_i32_0 = arith.constant 0 : i32
    %c0_i32_1 = arith.constant 0 : i32
    %c0_i32_2 = arith.constant 0 : i32
    return %c0_i32, %c0_i32_0, %c0_i32_1 : i32, i32, i32
  }
  func.func @transform_3(%arg0: i32) -> (i32, i32) {
    %c0_i32 = arith.constant 0 : i32
    %c0_i32_0 = arith.constant 0 : i32
    %c0_i32_1 = arith.constant 0 : i32
    return %c0_i32, %c0_i32_0 : i32, i32
  }
  func.func @transform_4(%arg0: i32) -> (i32, i32) {
    %c0_i32 = arith.constant 0 : i32
    %c0_i32_0 = arith.constant 0 : i32
    %c0_i32_1 = arith.constant 0 : i32
    return %c0_i32, %c0_i32_0 : i32, i32
  }
  func.func @transform_5(%arg0: i32) -> (i32, i32, i32) {
    %c0_i32 = arith.constant 0 : i32
    %c0_i32_0 = arith.constant 0 : i32
    %c0_i32_1 = arith.constant 0 : i32
    %c0_i32_2 = arith.constant 0 : i32
    return %c0_i32, %c0_i32_0, %c0_i32_1 : i32, i32, i32
  }
  func.func @transform_6(%arg0: i32) -> (i32, i32, i32) {
    %c0_i32 = arith.constant 0 : i32
    %c0_i32_0 = arith.constant 0 : i32
    %c0_i32_1 = arith.constant 0 : i32
    %c0_i32_2 = arith.constant 0 : i32
    return %c0_i32, %c0_i32_0, %c0_i32_1 : i32, i32, i32
  }
  func.func @transform_7(%arg0: i32) -> (i32, i32) {
    %c0_i32 = arith.constant 0 : i32
    %c0_i32_0 = arith.constant 0 : i32
    %c0_i32_1 = arith.constant 0 : i32
    return %c0_i32, %c0_i32_0 : i32, i32
  }
  func.func @transform_8(%arg0: i32) -> (i32, i32) {
    %c0_i32 = arith.constant 0 : i32
    %c0_i32_0 = arith.constant 0 : i32
    %c0_i32_1 = arith.constant 0 : i32
    return %c0_i32, %c0_i32_0 : i32, i32
  }
  func.func @transform_9(%arg0: i32) -> (i32, i32, i32) {
    %c0_i32 = arith.constant 0 : i32
    %c0_i32_0 = arith.constant 0 : i32
    %c0_i32_1 = arith.constant 0 : i32
    %c0_i32_2 = arith.constant 0 : i32
    return %c0_i32, %c0_i32_0, %c0_i32_1 : i32, i32, i32
  }
  func.func @transform_10(%arg0: i32) -> (i32, i32, i32) {
    %c0_i32 = arith.constant 0 : i32
    %c0_i32_0 = arith.constant 0 : i32
    %c0_i32_1 = arith.constant 0 : i32
    %c0_i32_2 = arith.constant 0 : i32
    return %c0_i32, %c0_i32_0, %c0_i32_1 : i32, i32, i32
  }
  func.func @transform_11(%arg0: i32) -> (i32, i32) {
    %c0_i32 = arith.constant 0 : i32
    %c0_i32_0 = arith.constant 0 : i32
    %c0_i32_1 = arith.constant 0 : i32
    return %c0_i32, %c0_i32_0 : i32, i32
  }
  func.func @transform_12(%arg0: i32) -> (i32, i32) {
    %c0_i32 = arith.constant 0 : i32
    %c0_i32_0 = arith.constant 0 : i32
    %c0_i32_1 = arith.constant 0 : i32
    return %c0_i32, %c0_i32_0 : i32, i32
  }
  func.func @transform_13(%arg0: i32) -> (i32, i32, i32) {
    %c0_i32 = arith.constant 0 : i32
    %c0_i32_0 = arith.constant 0 : i32
    %c0_i32_1 = arith.constant 0 : i32
    %c0_i32_2 = arith.constant 0 : i32
    return %c0_i32, %c0_i32_0, %c0_i32_1 : i32, i32, i32
  }
  func.func @transform_14(%arg0: i32) -> (i32, i32, i32) {
    %c0_i32 = arith.constant 0 : i32
    %c0_i32_0 = arith.constant 0 : i32
    %c0_i32_1 = arith.constant 0 : i32
    %c0_i32_2 = arith.constant 0 : i32
    return %c0_i32, %c0_i32_0, %c0_i32_1 : i32, i32, i32
  }
  func.func @transform_15(%arg0: i32) -> (i32, i32) {
    %c0_i32 = arith.constant 0 : i32
    %c0_i32_0 = arith.constant 0 : i32
    %c0_i32_1 = arith.constant 0 : i32
    return %c0_i32, %c0_i32_0 : i32, i32
  }
  func.func @transform_16(%arg0: i32) -> (i32, i32) {
    %c0_i32 = arith.constant 0 : i32
    %c0_i32_0 = arith.constant 0 : i32
    %c0_i32_1 = arith.constant 0 : i32
    return %c0_i32, %c0_i32_0 : i32, i32
  }
  func.func @transform_17(%arg0: i32) -> (i32, i32, i32) {
    %c0_i32 = arith.constant 0 : i32
    %c0_i32_0 = arith.constant 0 : i32
    %c0_i32_1 = arith.constant 0 : i32
    %c0_i32_2 = arith.constant 0 : i32
    return %c0_i32, %c0_i32_0, %c0_i32_1 : i32, i32, i32
  }
  func.func @transform_18(%arg0: i32) -> (i32, i32, i32) {
    %c0_i32 = arith.constant 0 : i32
    %c0_i32_0 = arith.constant 0 : i32
    %c0_i32_1 = arith.constant 0 : i32
    %c0_i32_2 = arith.constant 0 : i32
    return %c0_i32, %c0_i32_0, %c0_i32_1 : i32, i32, i32
  }
  func.func @transform_19(%arg0: i32) -> (i32, i32) {
    %c0_i32 = arith.constant 0 : i32
    %c0_i32_0 = arith.constant 0 : i32
    %c0_i32_1 = arith.constant 0 : i32
    return %c0_i32, %c0_i32_0 : i32, i32
  }
  func.func @transform_20(%arg0: i32) -> (i32, i32) {
    %c0_i32 = arith.constant 0 : i32
    %c0_i32_0 = arith.constant 0 : i32
    %c0_i32_1 = arith.constant 0 : i32
    return %c0_i32, %c0_i32_0 : i32, i32
  }
  func.func @transform_21(%arg0: i32) -> (i32, i32, i32) {
    %c0_i32 = arith.constant 0 : i32
    %c0_i32_0 = arith.constant 0 : i32
    %c0_i32_1 = arith.constant 0 : i32
    %c0_i32_2 = arith.constant 0 : i32
    return %c0_i32, %c0_i32_0, %c0_i32_1 : i32, i32, i32
  }
  func.func @transform_22(%arg0: i32) -> (i32, i32, i32) {
    %c0_i32 = arith.constant 0 : i32
    %c0_i32_0 = arith.constant 0 : i32
    %c0_i32_1 = arith.constant 0 : i32
    %c0_i32_2 = arith.constant 0 : i32
    return %c0_i32, %c0_i32_0, %c0_i32_1 : i32, i32, i32
  }
  func.func @transform_23(%arg0: i32) -> (i32, i32) {
    %c0_i32 = arith.constant 0 : i32
    %c0_i32_0 = arith.constant 0 : i32
    %c0_i32_1 = arith.constant 0 : i32
    return %c0_i32, %c0_i32_0 : i32, i32
  }
  func.func @transform_24(%arg0: i32) -> (i32, i32) {
    %c0_i32 = arith.constant 0 : i32
    %c0_i32_0 = arith.constant 0 : i32
    %c0_i32_1 = arith.constant 0 : i32
    return %c0_i32, %c0_i32_0 : i32, i32
  }
  func.func @transform_25(%arg0: i32) -> (i32, i32, i32) {
    %c0_i32 = arith.constant 0 : i32
    %c0_i32_0 = arith.constant 0 : i32
    %c0_i32_1 = arith.constant 0 : i32
    %c0_i32_2 = arith.constant 0 : i32
    return %c0_i32, %c0_i32_0, %c0_i32_1 : i32, i32, i32
  }
  func.func @transform_26(%arg0: i32) -> (i32, i32, i32) {
    %c0_i32 = arith.constant 0 : i32
    %c0_i32_0 = arith.constant 0 : i32
    %c0_i32_1 = arith.constant 0 : i32
    %c0_i32_2 = arith.constant 0 : i32
    return %c0_i32, %c0_i32_0, %c0_i32_1 : i32, i32, i32
  }
  func.func @transform_27(%arg0: i32) -> (i32, i32) {
    %c0_i32 = arith.constant 0 : i32
    %c0_i32_0 = arith.constant 0 : i32
    %c0_i32_1 = arith.constant 0 : i32
    return %c0_i32, %c0_i32_0 : i32, i32
  }
  func.func @transform_28(%arg0: i32) -> (i32, i32) {
    %c0_i32 = arith.constant 0 : i32
    %c0_i32_0 = arith.constant 0 : i32
    %c0_i32_1 = arith.constant 0 : i32
    return %c0_i32, %c0_i32_0 : i32, i32
  }
  func.func @transform_29(%arg0: i32) -> (i32, i32, i32) {
    %c0_i32 = arith.constant 0 : i32
    %c0_i32_0 = arith.constant 0 : i32
    %c0_i32_1 = arith.constant 0 : i32
    %c0_i32_2 = arith.constant 0 : i32
    return %c0_i32, %c0_i32_0, %c0_i32_1 : i32, i32, i32
  }
  func.func @transform_30(%arg0: i32) -> (i32, i32, i32) {
    %c0_i32 = arith.constant 0 : i32
    %c0_i32_0 = arith.constant 0 : i32
    %c0_i32_1 = arith.constant 0 : i32
    %c0_i32_2 = arith.constant 0 : i32
    return %c0_i32, %c0_i32_0, %c0_i32_1 : i32, i32, i32
  }
  func.func @transform_31(%arg0: i32) -> (i32, i32) {
    %c0_i32 = arith.constant 0 : i32
    %c0_i32_0 = arith.constant 0 : i32
    %c0_i32_1 = arith.constant 0 : i32
    return %c0_i32, %c0_i32_0 : i32, i32
  }
  func.func @transform_32(%arg0: i32) -> (i32, i32) {
    %c0_i32 = arith.constant 0 : i32
    %c0_i32_0 = arith.constant 0 : i32
    %c0_i32_1 = arith.constant 0 : i32
    return %c0_i32, %c0_i32_0 : i32, i32
  }
  func.func @transform_33(%arg0: i32) -> (i32, i32, i32) {
    %c0_i32 = arith.constant 0 : i32
    %c0_i32_0 = arith.constant 0 : i32
    %c0_i32_1 = arith.constant 0 : i32
    %c0_i32_2 = arith.constant 0 : i32
    return %c0_i32, %c0_i32_0, %c0_i32_1 : i32, i32, i32
  }
  func.func @transform_34(%arg0: i32) -> (i32, i32, i32) {
    %c0_i32 = arith.constant 0 : i32
    %c0_i32_0 = arith.constant 0 : i32
    %c0_i32_1 = arith.constant 0 : i32
    %c0_i32_2 = arith.constant 0 : i32
    return %c0_i32, %c0_i32_0, %c0_i32_1 : i32, i32, i32
  }
  func.func @transform_35(%arg0: i32) -> (i32, i32) {
    %c0_i32 = arith.constant 0 : i32
    %c0_i32_0 = arith.constant 0 : i32
    %c0_i32_1 = arith.constant 0 : i32
    return %c0_i32, %c0_i32_0 : i32, i32
  }
  func.func @transform_36(%arg0: i32) -> (i32, i32) {
    %c0_i32 = arith.constant 0 : i32
    %c0_i32_0 = arith.constant 0 : i32
    %c0_i32_1 = arith.constant 0 : i32
    return %c0_i32, %c0_i32_0 : i32, i32
  }
  func.func @transform_37(%arg0: i32) -> (i32, i32) {
    %c0_i32 = arith.constant 0 : i32
    %c0_i32_0 = arith.constant 0 : i32
    %c0_i32_1 = arith.constant 0 : i32
    return %c0_i32, %c0_i32_0 : i32, i32
  }
  func.func @transform_38(%arg0: i32) -> (i32, i32) {
    %c0_i32 = arith.constant 0 : i32
    %c0_i32_0 = arith.constant 0 : i32
    %c0_i32_1 = arith.constant 0 : i32
    return %c0_i32, %c0_i32_0 : i32, i32
  }
  func.func @transform_39(%arg0: i32) -> (i32, i32, i32) {
    %c0_i32 = arith.constant 0 : i32
    %c0_i32_0 = arith.constant 0 : i32
    %c0_i32_1 = arith.constant 0 : i32
    return %arg0, %c0_i32, %c0_i32_0 : i32, i32, i32
  }
}

</mosaic_0001>

<bundles_post_ra>
// kernel: snresnet_forward.1
= control target key start
LH: loop header
LB: loop body
LE: loop exit
PB: predicated region body
PF: predicated region fallthrough
CT: control target
= control target key end

     0   :  { %s11001_s6 = smov 1   ;;  %s11002_s10 = smov 2   ;;  %s12494_s0 = inlined_call_operand.smem [shape: u32[40], index: -1, kind: input, shape index: {}] }
   0x1   :  { %s11050_s5 = sld [smem:[%s12494_s0]]   ;;  %s11003_s14 = smov 3  }
   0x2   :  { %s11055_s9 = sld [smem:[%s12494_s0 + %s11001_s6]]   ;;  %s11004_s18 = smov 4  }
   0x3   :  { %s11060_s13 = sld [smem:[%s12494_s0 + %s11002_s10]]   ;;  %s11005_s22 = smov 5  }
   0x4   :  { %s11065_s17 = sld [smem:[%s12494_s0 + %s11003_s14]]   ;;  %s11006_s26 = smov 6  }
   0x5   :  { %s11070_s21 = sld [smem:[%s12494_s0 + %s11004_s18]]   ;;  %s11007_s30 = smov 7  }
   0x6   :  { %s11075_s25 = sld [smem:[%s12494_s0 + %s11005_s22]]   ;;  %s11008_s4 = smov 8  }
   0x7   :  { %12515 = sst [smem:[#allocation5_spill]] %s11050_s5  ;;  %s11009_s10 = smov 9  }
   0x8   :  { %12516 = sst [smem:[#allocation6_spill]] %s11055_s9  ;;  %s11010_s15 = smov 10  }
   0x9   :  { %s11080_s29 = sld [smem:[%s12494_s0 + %s11006_s26]]   ;;  %s11011_s20 = smov 11  }
   0xa   :  { %s11085_s3 = sld [smem:[%s12494_s0 + %s11007_s30]]   ;;  %s11012_s26 = smov 12  }
   0xb   :  { %s11090_s8 = sld [smem:[%s12494_s0 + %s11008_s4]]   ;;  %s11013_s1 = smov 13  }
   0xc   :  { %s11095_s14 = sld [smem:[%s12494_s0 + %s11009_s10]]   ;;  %s11014_s7 = smov 14  }
   0xd   :  { %s11100_s19 = sld [smem:[%s12494_s0 + %s11010_s15]]   ;;  %s11015_s15 = smov 15  }
   0xe   :  { %s11105_s24 = sld [smem:[%s12494_s0 + %s11011_s20]]   ;;  %s11016_s22 = smov 16  }
   0xf   :  { %s11110_s30 = sld [smem:[%s12494_s0 + %s11012_s26]]   ;;  %s11017_s28 = smov 17  }
  0x10   :  { %12517 = sst [smem:[#allocation7_spill]] %s11085_s3 }
  0x11   :  { %12518 = sst [smem:[#allocation8_spill]] %s11090_s8 }
  0x12   :  { %s11115_s6 = sld [smem:[%s12494_s0 + %s11013_s1]]  }
  0x13   :  { %s11120_s12 = sld [smem:[%s12494_s0 + %s11014_s7]]   ;;  %s11018_s7 = smov 18  }
  0x14   :  { %s11125_s20 = sld [smem:[%s12494_s0 + %s11015_s15]]   ;;  %s11019_s15 = smov 19  }
  0x15   :  { %s11130_s27 = sld [smem:[%s12494_s0 + %s11016_s22]]   ;;  %s11020_s22 = smov 20  }
  0x16   :  { %s11135_s4 = sld [smem:[%s12494_s0 + %s11017_s28]]   ;;  %s11021_s28 = smov 21  }
  0x18   :  { %12519 = sst [smem:[#allocation9_spill]] %s11115_s6 }
  0x19   :  { %12520 = sst [smem:[#allocation10_spill]] %s11120_s12 }
  0x1a   :  { %12521 = sst [smem:[#allocation11_spill]] %s11125_s20 }
  0x1b   :  { %12522 = sst [smem:[#allocation12_spill]] %s11130_s27 }
  0x1c   :  { %12523 = sst [smem:[#allocation13_spill]] %s11135_s4 }
  0x1d   :  { %s11140_s12 = sld [smem:[%s12494_s0 + %s11018_s7]]   ;;  %s11022_s7 = smov 22  }
  0x1e   :  { %s11145_s20 = sld [smem:[%s12494_s0 + %s11019_s15]]   ;;  %s11023_s15 = smov 23  }
  0x1f   :  { %s11150_s27 = sld [smem:[%s12494_s0 + %s11020_s22]]   ;;  %s11024_s22 = smov 24  }
  0x20   :  { %s11155_s4 = sld [smem:[%s12494_s0 + %s11021_s28]]   ;;  %s11025_s28 = smov 25  }
  0x23   :  { %12524 = sst [smem:[#allocation14_spill]] %s11140_s12 }
  0x24   :  { %12525 = sst [smem:[#allocation15_spill]] %s11145_s20 }
  0x25   :  { %12526 = sst [smem:[#allocation16_spill]] %s11150_s27 }
  0x26   :  { %12527 = sst [smem:[#allocation17_spill]] %s11155_s4 }
  0x27   :  { %s11160_s12 = sld [smem:[%s12494_s0 + %s11022_s7]]   ;;  %s11026_s7 = smov 26  }
  0x28   :  { %s11165_s20 = sld [smem:[%s12494_s0 + %s11023_s15]]   ;;  %s11027_s15 = smov 27  }
  0x29   :  { %s11170_s27 = sld [smem:[%s12494_s0 + %s11024_s22]]   ;;  %s11028_s22 = smov 28  }
  0x2a   :  { %s11175_s4 = sld [smem:[%s12494_s0 + %s11025_s28]]   ;;  %s11029_s28 = smov 29  }
  0x2d   :  { %12528 = sst [smem:[#allocation18_spill]] %s11160_s12 }
  0x2e   :  { %12529 = sst [smem:[#allocation19_spill]] %s11165_s20 }
  0x2f   :  { %12530 = sst [smem:[#allocation20_spill]] %s11170_s27 }
  0x30   :  { %12531 = sst [smem:[#allocation21_spill]] %s11175_s4 }
  0x31   :  { %s11180_s12 = sld [smem:[%s12494_s0 + %s11026_s7]]   ;;  %s11030_s7 = smov 30  }
  0x32   :  { %s11185_s20 = sld [smem:[%s12494_s0 + %s11027_s15]]   ;;  %s11031_s15 = smov 31  }
  0x33   :  { %s11190_s27 = sld [smem:[%s12494_s0 + %s11028_s22]]   ;;  %s11032_s22 = smov 32  }
  0x34   :  { %s11195_s4 = sld [smem:[%s12494_s0 + %s11029_s28]]   ;;  %s11033_s28 = smov 33  }
  0x37   :  { %12532 = sst [smem:[#allocation22_spill]] %s11180_s12 }
  0x38   :  { %12533 = sst [smem:[#allocation23_spill]] %s11185_s20 }
  0x39   :  { %12534 = sst [smem:[#allocation24_spill]] %s11190_s27 }
  0x3a   :  { %12535 = sst [smem:[#allocation25_spill]] %s11195_s4 }
  0x3b   :  { %s11200_s12 = sld [smem:[%s12494_s0 + %s11030_s7]]   ;;  %s11034_s7 = smov 34  }
  0x3c   :  { %s11205_s20 = sld [smem:[%s12494_s0 + %s11031_s15]]   ;;  %s11035_s15 = smov 35  }
  0x3d   :  { %s11210_s27 = sld [smem:[%s12494_s0 + %s11032_s22]]   ;;  %s11036_s22 = smov 36  }
  0x3e   :  { %s11215_s4 = sld [smem:[%s12494_s0 + %s11033_s28]]   ;;  %s11037_s28 = smov 37  }
  0x41   :  { %12536 = sst [smem:[#allocation26_spill]] %s11200_s12 }
  0x42   :  { %12537 = sst [smem:[#allocation27_spill]] %s11205_s20 }
  0x43   :  { %12538 = sst [smem:[#allocation28_spill]] %s11210_s27 }
  0x44   :  { %12539 = sst [smem:[#allocation29_spill]] %s11215_s4 }
  0x45   :  { %s11220_s12 = sld [smem:[%s12494_s0 + %s11034_s7]]   ;;  %s11038_s7 = smov 38  }
  0x46   :  { %s11225_s20 = sld [smem:[%s12494_s0 + %s11035_s15]]   ;;  %s11039_s15 = smov 39  }
  0x47   :  { %s11230_s27 = sld [smem:[%s12494_s0 + %s11036_s22]]  }
  0x48   :  { %s11235_s4 = sld [smem:[%s12494_s0 + %s11037_s28]]  }
  0x4b   :  { %12540 = sst [smem:[#allocation30_spill]] %s11220_s12 }
  0x4c   :  { %12541 = sst [smem:[#allocation31_spill]] %s11225_s20 }
  0x4d   :  { %s11240_s12 = sld [smem:[%s12494_s0 + %s11038_s7]]  }
  0x4e   :  { %12542 = sst [smem:[#allocation32_spill]] %s11235_s4 }
  0x4f   :  { %s11245_s20 = sld [smem:[%s12494_s0 + %s11039_s15]]  }
  0x50   :  { %84 = vsyncpa [#allocation3], 0 }
  0x51   :  { %86 = vsyncpa [#allocation3 + $0x1], 0  ;;  %s11247_s22 = smov 0   ;;  %s11249_s23 = smov 0  }
  0x52   :  { %s11251_s26 = smov 0   ;;  %s11253_s28 = smov 0  }
  0x53 LB: > { %s12543_s9 = sld [smem:[#allocation6_spill]]  ;;  %s12544_s4 = sld [smem:[#allocation32_spill]]  ;;  %s10995_s26 = sphi %s11251_s26, %s12575_s26   ;;  %s10991_s23 = sphi %s11249_s23, %s12574_s23   ;;  %s10987_s22 = sphi %s11247_s22, %s12573_s22   ;;  %s10999_s28 = sphi %s11253_s28, %s12576_s28  }
  0x54   : > { %s12545_s6 = sld [smem:[#allocation9_spill]]  ;;  %s11268_s0 = sadd.s32 4294967295, %s10999_s28  }
  0x55   : > { %s8453_s1 = sadd.s32 4294967294, %s10999_s28   ;;  %s11272_s2 = sadd.s32 1, %s10999_s28  }
  0x56   : > { %s923_s7 = sadd.s32 1, %s10995_s26  ;;  %s920_s10 = ssub.s32 %s10999_s28, %s11272_s2 }
  0x57   : > { %p933_p0 = scmp.ne.s32.totalorder %s10995_s26, %s10991_s23  ;;  %p921_p1 = scmp.eq.s32.totalorder %s920_s10, 0 }
  0x58   : > { %p934_p2 = scmp.eq.s32.totalorder %s11268_s0, 1  ;;  %p939_p3 = scmp.ne.s32.totalorder %s10991_s23, %s10987_s22 }
  0x59   : > { %p940_p4 = scmp.eq.s32.totalorder %s8453_s1, 1  ;;  %p8456_p7 = scmp.ge.s32.totalorder %s10999_s28, 1 }
  0x5a   : > { %s11283_s11 = scalar_select %p921_p1, %s10995_s26, %s923_s7  }
  0x5b   : > { %p11285_p5 = por %p934_p2, %p933_p0  ;;  %p11289_p6 = por %p940_p4, %p939_p3 }
  0x5c   : > { %p1080_p8 = scmp.lt.s32.totalorder %s10999_s28, 3 }
  0x5e   : > { %p1081_p9 = pnand %p8456_p7, %p1080_p8 }
  0x5f   : > { %s12548_s5 = sld [smem:[#allocation5_spill]] (!%p1081_p9)  ;;  %p1175_p10 = scmp.lt.s32.totalorder (!%p1081_p9), %s11268_s0, 1  ;;  %vm1201_vm0 = vcmask (!%p1081_p9), 261120   ;;  %v9882_v0 = vld [vmem:[%s12543_s9 + $0x10] sm:$0xff] (!%p1081_p9)   ;;  %v9884_v1 = vld [vmem:[%s12543_s9] sm:$0xff] (!%p1081_p9)   ;;  %v9883_v8 = vld [vmem:[%s12543_s9 + $0x18] sm:$0xff] (!%p1081_p9)  }
  0x60   : > { %1084 = sbr.rel (%p1081_p9) target bundleno = 4528 (0x11b0), region = 176  ;;  %9711 = vmatprep.mubr.msk.bf16.mxu1 (!%p1081_p9), %vm1201_vm0, %v9882_v0  ;;  %9703 = vmatprep.mubr.msk.bf16.mxu0 (!%p1081_p9), %vm1201_vm0, %v9884_v1  ;;  %v9890_v9 = vld [vmem:[%s11060_s13 + $0x64] ss:$8 sps:$4 sm:$0xff] (!%p1081_p9)   ;;  %v9888_v12 = vld [vmem:[%s11060_s13 + $0x60] ss:$8 sps:$4 sm:$0xff] (!%p1081_p9)   ;;  %v11040_v25 = vmov (!%p1081_p9), 0  }
  0x61   : > { %v9885_v10 = vld [vmem:[%s12543_s9 + $0x8] sm:$0xff] (!%p1081_p9)   ;;  %v9886_v11 = vld [vmem:[%s12543_s9 + $0x20] sm:$0xff] (!%p1081_p9)   ;;  %v9893_v13 = vld [vmem:[%s11060_s13 + $0x74] ss:$8 sps:$4 sm:$0xff] (!%p1081_p9)   ;;  %vm1416_vm1 = vcmask (!%p1081_p9), 785408   ;;  %s12549_s3 = sld [smem:[#allocation7_spill]] (!%p1081_p9) }
  0x62   : > { %v9891_v14 = vld [vmem:[%s11060_s13 + $0x70] ss:$8 sps:$4 sm:$0xff] (!%p1081_p9)   ;;  %v9896_v15 = vld [vmem:[%s11060_s13 + $0x84] ss:$8 sps:$4 sm:$0xff] (!%p1081_p9)   ;;  %v9894_v17 = vld [vmem:[%s11060_s13 + $0x80] ss:$8 sps:$4 sm:$0xff] (!%p1081_p9)  }
  0x63   : > { %v9887_v16 = vld [vmem:[%s12543_s9 + $0x28] sm:$0xff] (!%p1081_p9)   ;;  %v9899_v18 = vld [vmem:[%s11060_s13 + $0x94] ss:$8 sps:$4 sm:$0xff] (!%p1081_p9)   ;;  %v9897_v19 = vld [vmem:[%s11060_s13 + $0x90] ss:$8 sps:$4 sm:$0xff] (!%p1081_p9)   ;;  %s12550_s8 = sld [smem:[#allocation8_spill]] (!%p1081_p9) }
  0x64   : > { %v9902_v20 = vld [vmem:[%s11060_s13 + $0xa4] ss:$8 sps:$4 sm:$0xff] (!%p1081_p9)   ;;  %v9900_v21 = vld [vmem:[%s11060_s13 + $0xa0] ss:$8 sps:$4 sm:$0xff] (!%p1081_p9)   ;;  %v9905_v22 = vld [vmem:[%s11060_s13 + $0xb4] ss:$8 sps:$4 sm:$0xff] (!%p1081_p9)  }
  0x65   : > { %v9903_v23 = vld [vmem:[%s11060_s13 + $0xb0] ss:$8 sps:$4 sm:$0xff] (!%p1081_p9)   ;;  %v9908_v24 = vld [vmem:[%s11060_s13 + $0x4] ss:$8 sps:$4 sm:$0xff] (!%p1081_p9)   ;;  %v9906_v29 = vld [vmem:[%s11060_s13] ss:$8 sps:$4 sm:$0xff] (!%p1081_p9)  }
  0x66   : > { %v9911_v32 = vld [vmem:[%s11060_s13 + $0x14] ss:$8 sps:$4 sm:$0xff] (!%p1081_p9)   ;;  %v9909_v40 = vld [vmem:[%s11060_s13 + $0x10] ss:$8 sps:$4 sm:$0xff] (!%p1081_p9)   ;;  %v9914_v41 = vld [vmem:[%s11060_s13 + $0x24] ss:$8 sps:$4 sm:$0xff] (!%p1081_p9)  }
  0x67   : > { %s1176_s18 = scalar_select %p1175_p10, %s11268_s0, 1  ;;  %v9912_v43 = vld [vmem:[%s11060_s13 + $0x20] ss:$8 sps:$4 sm:$0xff]   ;;  %v9917_v45 = vld [vmem:[%s11060_s13 + $0x34] ss:$8 sps:$4 sm:$0xff]   ;;  %vm4850_vm2 = vcmask 130048  }
  0x68   : > { %v9915_v50 = vld [vmem:[%s11060_s13 + $0x30] ss:$8 sps:$4 sm:$0xff]   ;;  %v9920_v51 = vld [vmem:[%s11060_s13 + $0x44] ss:$8 sps:$4 sm:$0xff]   ;;  %v9918_v52 = vld [vmem:[%s11060_s13 + $0x40] ss:$8 sps:$4 sm:$0xff]  }
  0x69   : > { %s9664_s1 = sshll.u32 %s1176_s18, 5  ;;  %v9923_v53 = vld [vmem:[%s11060_s13 + $0x54] ss:$8 sps:$4 sm:$0xff]   ;;  %v9921_v54 = vld [vmem:[%s11060_s13 + $0x50] ss:$8 sps:$4 sm:$0xff]   ;;  %s12551_s10 = sld [smem:[#allocation10_spill]] }
  0x6a   : > { %s1179_s7 = scalar_lea.vmem %s12548_s5, %s9664_s1  ;;  %v9926_v55 = vld [vmem:[%s11060_s13 + $0xc4] ss:$8 sps:$4 sm:$0xff]   ;;  %v9924_v56 = vld [vmem:[%s11060_s13 + $0xc0] ss:$8 sps:$4 sm:$0xff]   ;;  %v9929_v57 = vld [vmem:[%s11060_s13 + $0xd4] ss:$8 sps:$4 sm:$0xff]  }
  0x6b   : > { %v1181_v2 = vld [vmem:[%s1179_s7] sm:$0xff]  ;;  %v1182_v3 = vld [vmem:[%s1179_s7 + $0x8] sm:$0xff]  ;;  %v1183_v4 = vld [vmem:[%s1179_s7 + $0x10] sm:$0xff]  ;;  %s12552_s18 = sld [smem:[#allocation11_spill]]  ;;  %s12553_s1 = sld [smem:[#allocation12_spill]]  ;;  %vm6969_vm3 = vcmask 1043456  }
  0x6c   : > { %v1185_v5 = vpack.c.bf16 %v1182_v3, %v1181_v2  ;;  %v1184_v6 = vld [vmem:[%s1179_s7 + $0x18] sm:$0xff]  ;;  %v9932_v59 = vld [vmem:[%s11060_s13 + $0xe4] ss:$8 sps:$4 sm:$0xff]   ;;  %v9930_v60 = vld [vmem:[%s11060_s13 + $0xe0] ss:$8 sps:$4 sm:$0xff]   ;;  %v1809_v3 = vlaneseq  ;;  %s12554_s7 = sld [smem:[#allocation13_spill]] }
  0x6d   : > { %v1186_v7 = vpack.c.bf16 %v1184_v6, %v1183_v4  ;;  %v9927_v58 = vld [vmem:[%s11060_s13 + $0xd0] ss:$8 sps:$4 sm:$0xff]   ;;  %v9935_v61 = vld [vmem:[%s11060_s13 + $0xf4] ss:$8 sps:$4 sm:$0xff]   ;;  %v9938_v63 = vld [vmem:[%s11060_s13 + $0x104] ss:$8 sps:$4 sm:$0xff]  }
  0x6e   : > { %9707 = vmatprep.subr.bf16.mxu1 %v1185_v5  ;;  %9699 = vmatprep.subr.bf16.mxu0 %v1185_v5  ;;  %v9933_v62 = vld [vmem:[%s11060_s13 + $0xf0] ss:$8 sps:$4 sm:$0xff]   ;;  %v9936_v0 = vld [vmem:[%s11060_s13 + $0x100] ss:$8 sps:$4 sm:$0xff]   ;;  %v9941_v1 = vld [vmem:[%s11060_s13 + $0x114] ss:$8 sps:$4 sm:$0xff]  }
  0x6f   : > { %9708 = vmatpush3.bf16.msra.mxu1 %v1185_v5  ;;  %9700 = vmatpush3.bf16.msra.mxu0 %v1185_v5  ;;  %v9939_v2 = vld [vmem:[%s11060_s13 + $0x110] ss:$8 sps:$4 sm:$0xff]   ;;  %v1810_v4 = vshrl.u32 %v1809_v3, 7  ;;  %v1807_v6 = vld [vmem:[%s11065_s17] sm:$0x3]  ;;  %s12560_s5 = sld [smem:[#allocation20_spill]] }
  0x70   : > { %9709 = vmatprep.subr.bf16.mxu1 %v1186_v7  ;;  %9701 = vmatprep.subr.bf16.mxu0 %v1186_v7  ;;  %v9963_v3 = vld [vmem:[%s11080_s29 + $0x150] ss:$8 sps:$4 sm:$0xff]   ;;  %vm6965_vm4 = vcmask 64512   ;;  %vm8344_vm5 = vcmask 73728  }
  0x73   : > { %9710 = vmatpush3.bf16.msra.mxu1 %v1186_v7  ;;  %9702 = vmatpush3.bf16.msra.mxu0 %v1186_v7 }
  0x74   : > { %9715 = vmatprep.subr.bf16.mxu1 %v1185_v5  ;;  %1423 = vmatprep.subr.bf16.mxu0 %v9890_v9  ;;  %v1827_v9 = vld [vmem:[%s11070_s21] sm:$0x3] }
  0x76   : > { %9712 = vmatmul.mubr.msk.bf16.vlgmr.msra.gmra.mrb[0].mxu1 %vm1201_vm0, %v9883_v8  ;;  %9704 = vmatmul.mubr.msk.bf16.vlgmr.msra.gmra.mrb[0].mxu0 %vm1201_vm0, %v9885_v10 }
  0x77   : > { %9716 = vmatpush3.bf16.msra.mxu1 %v1185_v5  ;;  %9719 = vmatprep.mubr.msk.bf16.mxu1 %vm1201_vm0, %v9886_v11  ;;  %v11360_v5 = vsub.s32 0, %v1810_v4 }
  0x78   : > { %9717 = vmatprep.subr.bf16.mxu1 %v1186_v7  ;;  %1424 = vmatpush1.bf16.msra.mxu0 %v9888_v12 }
  0x79   : > { %1425 = vmatprep.subr.bf16.mxu0 %v9893_v13  ;;  %1455 = vmatprep.mubr.bf16.mxu0 %v11040_v25  ;;  %v1812_v8 = vrot.slane %v1807_v6, %v11360_v5 }
  0x7b   : > { %9718 = vmatpush3.bf16.msra.mxu1 %v1186_v7  ;;  %v11363_v7 = vsub.s32 1, %v1810_v4  ;;  %v9968_v4 = vld [vmem:[%s11080_s29 + $0x164] ss:$8 sps:$4 sm:$0xff]  }
  0x7c   : > { %1426 = vmatpush1.bf16.msra.mxu0 %v9891_v14  ;;  %v1832_v14 = vrot.slane %v1827_v9, %v11360_v5 }
  0x7d   : > { %1427 = vmatprep.subr.bf16.mxu0 %v9896_v15  ;;  %v1816_v10 = vrot.slane %v1807_v6, %v11363_v7  ;;  %v1836_v12 = vrot.slane %v1827_v9, %v11363_v7  ;;  %v9966_v6 = vld [vmem:[%s11080_s29 + $0x160] ss:$8 sps:$4 sm:$0xff]   ;;  %v9969_v9 = vld [vmem:[%s11080_s29 + $0x170] ss:$8 sps:$4 sm:$0xff]  }
  0x7e   : > { %9720 = vmatmul.mubr.msk.bf16.vlgmr.msra.gmra.mrb[4].mxu1 %vm1201_vm0, %v9887_v16 }
  0x7f   : > { %1911 = vmatprep.mubr.bf16.mxu1 %v11040_v25 }
  0x80   : > { %1428 = vmatpush1.bf16.msra.mxu0 %v9894_v17 }
  0x81   : > { %1429 = vmatprep.subr.bf16.mxu0 %v9899_v18 }
  0x84   : > { %1430 = vmatpush1.bf16.msra.mxu0 %v9897_v19 }
  0x85   : > { %1431 = vmatprep.subr.bf16.mxu0 %v9902_v20 }
  0x88   : > { %1432 = vmatpush1.bf16.msra.mxu0 %v9900_v21 }
  0x89   : > { %1433 = vmatprep.subr.bf16.mxu0 %v9905_v22 }
  0x8c   : > { %1434 = vmatpush1.bf16.msra.mxu0 %v9903_v23 }
  0x8d   : > { %1542 = vmatprep.subr.bf16.mxu0 %v9908_v24 }
 0x149   : > { %v9713_v26 = vpop.f32.mrb[0].mxu1  ;;  %v9705_v27 = vpop.f32.mrb[0].mxu0 }
 0x14a   : > { %v1326_v28 = vpop.f32.mrb[1].mxu1  ;;  %v1242_v30 = vpop.f32.mrb[1].mxu0 }
 0x14b   : > { %v9714_v31 = vpop.f32.mrb[2].mxu1  ;;  %v9706_v33 = vpop.f32.mrb[2].mxu0 }
 0x14c   : > { %v1342_v34 = vpack.c.bf16 %v9714_v31, %v9713_v26  ;;  %v1329_v35 = vpop.f32.mrb[3].mxu1  ;;  %v1258_v36 = vpack.c.bf16 %v9706_v33, %v9705_v27  ;;  %v1245_v37 = vpop.f32.mrb[3].mxu0 }
 0x14d   : > { %v1341_v38 = vpack.c.bf16 %v1329_v35, %v1326_v28  ;;  %v1257_v39 = vpack.c.bf16 %v1245_v37, %v1242_v30 }
 0x14f   : > { %8495 = vmatmul.mubr.msk.bf16.vlgmr.msra.gmra.mrb[4].mxu0 %vm1416_vm1, %v1341_v38 }
 0x150   : > { %1543 = vmatpush1.bf16.msra.mxu0 %v9906_v29  ;;  %1465 = vmatprep.mubr.bf16.mxu0 %v11040_v25 }
 0x151   : > { %1544 = vmatprep.subr.bf16.mxu0 %v9911_v32  ;;  %v9721_v42 = vpop.f32.mrb[4].mxu1 }
 0x152   : > { %v1650_v44 = vpop.f32.mrb[5].mxu1 }
 0x153   : > { %v9722_v46 = vpop.f32.mrb[6].mxu1 }
 0x154   : > { %1545 = vmatpush1.bf16.msra.mxu0 %v9909_v40  ;;  %v1666_v47 = vpack.c.bf16 %v9722_v46, %v9721_v42  ;;  %v1653_v48 = vpop.f32.mrb[7].mxu1 }
 0x155   : > { %1546 = vmatprep.subr.bf16.mxu0 %v9914_v41  ;;  %v1665_v49 = vpack.c.bf16 %v1653_v48, %v1650_v44 }
 0x157   : > { %8496 = vmatmul.mubr.msk.bf16.gmra.mrb[8].mxu0 %vm1416_vm1, %v1342_v34 }
 0x158   : > { %1547 = vmatpush1.bf16.msra.mxu0 %v9912_v43  ;;  %1574 = vmatprep.mubr.bf16.mxu0 %v11040_v25 }
 0x159   : > { %1548 = vmatprep.subr.bf16.mxu0 %v9917_v45 }
 0x15c   : > { %1549 = vmatpush1.bf16.msra.mxu0 %v9915_v50  ;;  %v9942_v50 = vld [vmem:[%s11075_s25] sm:$0xff]  }
 0x15d   : > { %1550 = vmatprep.subr.bf16.mxu0 %v9920_v51  ;;  %v9946_v51 = vld [vmem:[%s11075_s25 + $0x20] sm:$0xff]  }
 0x160   : > { %1551 = vmatpush1.bf16.msra.mxu0 %v9918_v52  ;;  %v9950_v52 = vld [vmem:[%s11080_s29 + $0x104] ss:$8 sps:$4 sm:$0xff]  }
 0x161   : > { %1552 = vmatprep.subr.bf16.mxu0 %v9923_v53  ;;  %v9943_v53 = vld [vmem:[%s11075_s25 + $0x8] sm:$0xff]  }
 0x164   : > { %1553 = vmatpush1.bf16.msra.mxu0 %v9921_v54  ;;  %v9947_v54 = vld [vmem:[%s11075_s25 + $0x28] sm:$0xff]  }
 0x165   : > { %1746 = vmatprep.subr.bf16.mxu0 %v9926_v55  ;;  %v9944_v55 = vld [vmem:[%s11075_s25 + $0x10] sm:$0xff]  }
 0x167   : > { %8509 = vmatmul.mubr.msk.bf16.vlgmr.msra.gmra.mrb[4].mxu0 %vm1416_vm1, %v1257_v39 }
 0x168   : > { %1747 = vmatpush1.bf16.msra.mxu0 %v9924_v56  ;;  %1584 = vmatprep.mubr.bf16.mxu0 %v11040_v25  ;;  %v9948_v56 = vld [vmem:[%s11080_s29 + $0x100] ss:$8 sps:$4 sm:$0xff]  }
 0x169   : > { %1748 = vmatprep.subr.bf16.mxu0 %v9929_v57  ;;  %v9953_v57 = vld [vmem:[%s11080_s29 + $0x114] ss:$8 sps:$4 sm:$0xff]  }
 0x16c   : > { %1749 = vmatpush1.bf16.msra.mxu0 %v9927_v58  ;;  %v9951_v58 = vld [vmem:[%s11080_s29 + $0x110] ss:$8 sps:$4 sm:$0xff]  }
 0x16d   : > { %1750 = vmatprep.subr.bf16.mxu0 %v9932_v59  ;;  %v9956_v59 = vld [vmem:[%s11080_s29 + $0x124] ss:$8 sps:$4 sm:$0xff]  }
 0x16f   : > { %8510 = vmatmul.mubr.msk.bf16.gmra.mrb[8].mxu0 %vm1416_vm1, %v1258_v36 }
 0x170   : > { %1751 = vmatpush1.bf16.msra.mxu0 %v9930_v60  ;;  %1778 = vmatprep.mubr.bf16.mxu0 %v11040_v25  ;;  %v9945_v60 = vld [vmem:[%s11075_s25 + $0x18] sm:$0xff]  }
 0x171   : > { %1752 = vmatprep.subr.bf16.mxu0 %v9935_v61  ;;  %v9954_v61 = vld [vmem:[%s11080_s29 + $0x120] ss:$8 sps:$4 sm:$0xff]  }
 0x174   : > { %1753 = vmatpush1.bf16.msra.mxu0 %v9933_v62  ;;  %v9959_v62 = vld [vmem:[%s11080_s29 + $0x134] ss:$8 sps:$4 sm:$0xff]  }
 0x175   : > { %1754 = vmatprep.subr.bf16.mxu0 %v9938_v63  ;;  %v9957_v63 = vld [vmem:[%s11080_s29 + $0x130] ss:$8 sps:$4 sm:$0xff]  }
 0x178   : > { %1755 = vmatpush1.bf16.msra.mxu0 %v9936_v0  ;;  %v9962_v0 = vld [vmem:[%s11080_s29 + $0x144] ss:$8 sps:$4 sm:$0xff]  }
 0x179   : > { %1756 = vmatprep.subr.bf16.mxu0 %v9941_v1  ;;  %v9960_v1 = vld [vmem:[%s11080_s29 + $0x140] ss:$8 sps:$4 sm:$0xff]  }
 0x17c   : > { %1757 = vmatpush1.bf16.msra.mxu0 %v9939_v2  ;;  %v9965_v2 = vld [vmem:[%s11080_s29 + $0x154] ss:$8 sps:$4 sm:$0xff]  }
 0x17f   : > { %8543 = vmatmul.mubr.msk.bf16.vlgmr.msra.gmra.mrb[4].mxu0 %vm1416_vm1, %v1665_v49 }
 0x180   : > { %1788 = vmatprep.mubr.bf16.mxu0 %v11040_v25 }
 0x187   : > { %8544 = vmatmul.mubr.msk.bf16.gmra.mrb[8].mxu0 %vm1416_vm1, %v1666_v47 }
 0x188   : > { %2558 = vmatprep.mubr.bf16.mxu0 %v11040_v25 }
 0x252   : > { %v1780_v11 = vpop.f32.mrb[4].mxu0 }
 0x253   : > { %v1819_v13 = vmul.f32 %v1812_v8, %v1780_v11  ;;  %v1782_v15 = vpop.f32.mrb[5].mxu0  ;;  %v9972_v11 = vld [vmem:[%s11080_s29 + $0x180] ss:$8 sps:$4 sm:$0xff]  }
 0x254   : > { %v1820_v16 = vmul.f32 %v1816_v10, %v1782_v15  ;;  %v1784_v17 = vpop.f32.mrb[6].mxu0  ;;  %v9978_v15 = vld [vmem:[%s11080_s29 + $0x1a0] ss:$8 sps:$4 sm:$0xff]  }
 0x255   : > { %v1821_v18 = vmul.f32 %v1812_v8, %v1784_v17  ;;  %v1786_v19 = vpop.f32.mrb[7].mxu0  ;;  %v11372_v22 = vadd.f32 %v1832_v14, %v1819_v13  ;;  %v9975_v13 = vld [vmem:[%s11080_s29 + $0x190] ss:$8 sps:$4 sm:$0xff]  }
 0x256   : > { %v11370_v20 = vadd.f32 %v1836_v12, %v1820_v16  ;;  %v1822_v21 = vmul.f32 %v1816_v10, %v1786_v19  ;;  %v9983_v16 = vld [vmem:[%s11080_s29 + $0x1b4] ss:$8 sps:$4 sm:$0xff]   ;;  %v9981_v17 = vld [vmem:[%s11080_s29 + $0x1b0] ss:$8 sps:$4 sm:$0xff]   ;;  %v9986_v19 = vld [vmem:[%s11080_s29 + $0x1c4] ss:$8 sps:$4 sm:$0xff]  }
 0x257   : > { %v11374_v23 = vadd.f32 %v1832_v14, %v1821_v18  ;;  %v1847_v30 = vmax.f32 %v11372_v22, 0.0  ;;  %v9984_v18 = vld [vmem:[%s11080_s29 + $0x1c0] ss:$8 sps:$4 sm:$0xff]  }
 0x258   : > { %v11376_v24 = vadd.f32 %v1836_v12, %v1822_v21  ;;  %v1848_v27 = vmax.f32 %v11370_v20, 0.0  ;;  %v9989_v21 = vld [vmem:[%s11080_s29 + $0x1d4] ss:$8 sps:$4 sm:$0xff]  }
 0x259   : > { %v1849_v26 = vmax.f32 %v11374_v23, 0.0 }
 0x25a   : > { %v1850_v28 = vmax.f32 %v11376_v24, 0.0  ;;  %v1790_v29 = vpop.f32.mrb[8].mxu0 }
 0x25b   : > { %v1823_v31 = vmul.f32 %v1812_v8, %v1790_v29  ;;  %v1792_v32 = vpop.f32.mrb[9].mxu0  ;;  %v1855_v36 = vpack.c.bf16 %v1849_v26, %v1847_v30  ;;  %v9987_v29 = vld [vmem:[%s11080_s29 + $0x1d0] ss:$8 sps:$4 sm:$0xff]  }
 0x25c   : > { %v1824_v33 = vmul.f32 %v1816_v10, %v1792_v32  ;;  %v1794_v34 = vpop.f32.mrb[10].mxu0  ;;  %v1856_v35 = vpack.c.bf16 %v1850_v28, %v1848_v27  ;;  %v9992_v32 = vld [vmem:[%s11080_s29 + $0x1e4] ss:$8 sps:$4 sm:$0xff]  }
 0x25d   : > { %v1825_v37 = vmul.f32 %v1812_v8, %v1794_v34  ;;  %v1796_v38 = vpop.f32.mrb[11].mxu0  ;;  %v11392_v41 = vadd.f32 %v1832_v14, %v1823_v31  ;;  %v9971_v8 = vld [vmem:[%s11080_s29 + $0x174] ss:$8 sps:$4 sm:$0xff]   ;;  %v9990_v31 = vld [vmem:[%s11080_s29 + $0x1e0] ss:$8 sps:$4 sm:$0xff]  }
 0x25e   : > { %v11390_v39 = vadd.f32 %v1836_v12, %v1824_v33  ;;  %v1826_v40 = vmul.f32 %v1816_v10, %v1796_v38  ;;  %1879 = vmatprep.subr.bf16.mxu1 %v1856_v35  ;;  %2526 = vmatprep.subr.bf16.mxu0 %v1856_v35  ;;  %v9974_v10 = vld [vmem:[%s11080_s29 + $0x184] ss:$8 sps:$4 sm:$0xff]   ;;  %v9995_v33 = vld [vmem:[%s11080_s29 + $0x1f4] ss:$8 sps:$4 sm:$0xff]   ;;  %v9993_v34 = vld [vmem:[%s11080_s29 + $0x1f0] ss:$8 sps:$4 sm:$0xff]  }
 0x25f   : > { %v11394_v42 = vadd.f32 %v1832_v14, %v1825_v37  ;;  %1880 = vmatpush1.bf16.msra.mxu1 %v1855_v36  ;;  %2527 = vmatpush1.bf16.msra.mxu0 %v1855_v36  ;;  %v1851_v47 = vmax.f32 %v11392_v41, 0.0  ;;  %v9980_v14 = vld [vmem:[%s11080_s29 + $0x1a4] ss:$8 sps:$4 sm:$0xff]  }
 0x260   : > { %v11396_v43 = vadd.f32 %v1836_v12, %v1826_v40  ;;  %v1852_v45 = vmax.f32 %v11390_v39, 0.0  ;;  %v9977_v12 = vld [vmem:[%s11080_s29 + $0x194] ss:$8 sps:$4 sm:$0xff]  }
 0x261   : > { %v1853_v44 = vmax.f32 %v11394_v42, 0.0  ;;  %v10242_v42 = vld [vmem:[%s12545_s6] sm:$0xff]  }
 0x262   : > { %v1854_v46 = vmax.f32 %v11396_v43, 0.0  ;;  %v10247_v43 = vld [vmem:[%s12551_s10 + $0x104] ss:$8 sps:$4 sm:$0xff]  }
 0x263   : > { %v1857_v49 = vpack.c.bf16 %v1853_v44, %v1851_v47 }
 0x264   : > { %v1858_v48 = vpack.c.bf16 %v1854_v46, %v1852_v45 }
 0x266   : > { %1881 = vmatprep.subr.bf16.mxu1 %v1858_v48  ;;  %2528 = vmatprep.subr.bf16.mxu0 %v1858_v48 }
 0x267   : > { %1882 = vmatpush1.bf16.msra.mxu1 %v1857_v49  ;;  %2529 = vmatpush1.bf16.msra.mxu0 %v1857_v49 }
 0x268   : > { %1989 = vmatprep.subr.bf16.mxu1 %v1856_v35  ;;  %v9998_v35 = vld [vmem:[%s11080_s29 + $0x4] ss:$8 sps:$4 sm:$0xff]  }
 0x26a   : > { %8547 = vmatmul.mubr.msk.bf16.vlgmr.msra.gmra.mrb[8].mxu1 %vm1201_vm0, %v9942_v50  ;;  %8659 = vmatmul.mubr.msk.bf16.vlgmr.msra.gmra.mrb[12].mxu0 %vm1201_vm0, %v9946_v51 }
 0x26b   : > { %1990 = vmatpush1.bf16.msra.mxu1 %v1855_v36  ;;  %1921 = vmatprep.mubr.bf16.mxu1 %v11040_v25 }
 0x26c   : > { %1991 = vmatprep.subr.bf16.mxu1 %v1858_v48  ;;  %2568 = vmatprep.mubr.bf16.mxu0 %v11040_v25 }
 0x26f   : > { %1992 = vmatpush1.bf16.msra.mxu1 %v1857_v49 }
 0x270   : > { %2239 = vmatprep.subr.bf16.mxu1 %v9950_v52 }
 0x272   : > { %8548 = vmatmul.mubr.msk.bf16.gmra.mrb[12].mxu1 %vm1201_vm0, %v9943_v53  ;;  %8660 = vmatmul.mubr.msk.bf16.gmra.mrb[16].mxu0 %vm1201_vm0, %v9947_v54 }
 0x273   : > { %2021 = vmatprep.mubr.bf16.mxu1 %v11040_v25  ;;  %2941 = vmatprep.mubr.bf16.mxu0 %v11040_v25 }
 0x27a   : > { %8555 = vmatmul.mubr.msk.bf16.vlgmr.msra.gmra.mrb[16].mxu1 %vm1201_vm0, %v9944_v55 }
 0x27b   : > { %2031 = vmatprep.mubr.bf16.mxu1 %v11040_v25  ;;  %2240 = vmatpush1.bf16.msra.mxu1 %v9948_v56 }
 0x27c   : > { %2241 = vmatprep.subr.bf16.mxu1 %v9953_v57 }
 0x27f   : > { %2242 = vmatpush1.bf16.msra.mxu1 %v9951_v58 }
 0x280   : > { %2243 = vmatprep.subr.bf16.mxu1 %v9956_v59 }
 0x282   : > { %8556 = vmatmul.mubr.msk.bf16.gmra.mrb[20].mxu1 %vm1201_vm0, %v9945_v60 }
 0x283   : > { %2244 = vmatpush1.bf16.msra.mxu1 %v9954_v61 }
 0x284   : > { %2245 = vmatprep.subr.bf16.mxu1 %v9959_v62 }
 0x287   : > { %2246 = vmatpush1.bf16.msra.mxu1 %v9957_v63 }
 0x288   : > { %2247 = vmatprep.subr.bf16.mxu1 %v9962_v0 }
 0x28b   : > { %2248 = vmatpush1.bf16.msra.mxu1 %v9960_v1 }
 0x28c   : > { %2249 = vmatprep.subr.bf16.mxu1 %v9965_v2 }
 0x28f   : > { %2250 = vmatpush1.bf16.msra.mxu1 %v9963_v3 }
 0x290   : > { %2251 = vmatprep.subr.bf16.mxu1 %v9968_v4  ;;  %v9996_v4 = vld [vmem:[%s11080_s29] ss:$8 sps:$4 sm:$0xff]  }
 0x293   : > { %2252 = vmatpush1.bf16.msra.mxu1 %v9966_v6 }
 0x294   : > { %2253 = vmatprep.subr.bf16.mxu1 %v9971_v8  ;;  %v10001_v8 = vld [vmem:[%s11080_s29 + $0x14] ss:$8 sps:$4 sm:$0xff]  }
 0x297   : > { %2254 = vmatpush1.bf16.msra.mxu1 %v9969_v9 }
 0x298   : > { %2255 = vmatprep.subr.bf16.mxu1 %v9974_v10 }
 0x29b   : > { %2256 = vmatpush1.bf16.msra.mxu1 %v9972_v11 }
 0x29c   : > { %2257 = vmatprep.subr.bf16.mxu1 %v9977_v12 }
 0x29f   : > { %2258 = vmatpush1.bf16.msra.mxu1 %v9975_v13 }
 0x2a0   : > { %2259 = vmatprep.subr.bf16.mxu1 %v9980_v14  ;;  %v9999_v14 = vld [vmem:[%s11080_s29 + $0x10] ss:$8 sps:$4 sm:$0xff]  }
 0x2a3   : > { %2260 = vmatpush1.bf16.msra.mxu1 %v9978_v15 }
 0x2a4   : > { %2261 = vmatprep.subr.bf16.mxu1 %v9983_v16 }
 0x2a7   : > { %2262 = vmatpush1.bf16.msra.mxu1 %v9981_v17  ;;  %v10004_v17 = vld [vmem:[%s11080_s29 + $0x24] ss:$8 sps:$4 sm:$0xff]  }
 0x2a8   : > { %2263 = vmatprep.subr.bf16.mxu1 %v9986_v19 }
 0x2ab   : > { %2264 = vmatpush1.bf16.msra.mxu1 %v9984_v18 }
 0x2ac   : > { %2265 = vmatprep.subr.bf16.mxu1 %v9989_v21 }
 0x2af   : > { %2266 = vmatpush1.bf16.msra.mxu1 %v9987_v29 }
 0x2b0   : > { %2267 = vmatprep.subr.bf16.mxu1 %v9992_v32  ;;  %v10007_v32 = vld [vmem:[%s11080_s29 + $0x34] ss:$8 sps:$4 sm:$0xff]  }
 0x2b3   : > { %2268 = vmatpush1.bf16.msra.mxu1 %v9990_v31  ;;  %v10002_v31 = vld [vmem:[%s11080_s29 + $0x20] ss:$8 sps:$4 sm:$0xff]  }
 0x2b4   : > { %2269 = vmatprep.subr.bf16.mxu1 %v9995_v33  ;;  %v10005_v33 = vld [vmem:[%s11080_s29 + $0x30] ss:$8 sps:$4 sm:$0xff]  }
 0x2b7   : > { %2270 = vmatpush1.bf16.msra.mxu1 %v9993_v34  ;;  %v10010_v34 = vld [vmem:[%s11080_s29 + $0x44] ss:$8 sps:$4 sm:$0xff]  }
 0x2b8   : > { %2452 = vmatprep.subr.bf16.mxu1 %v9998_v35  ;;  %v10008_v35 = vld [vmem:[%s11080_s29 + $0x40] ss:$8 sps:$4 sm:$0xff]  }
 0x33d   : > { %v11460_v36 = vpop.f32.mrb[8].mxu1  ;;  %v11478_v56 = vpop.f32.mrb[12].mxu0 }
 0x33e   : > { %v1915_v37 = vpop.f32.mrb[9].mxu1  ;;  %v11480_v57 = vpop.f32.mrb[13].mxu0 }
 0x33f   : > { %v11462_v38 = vpop.f32.mrb[10].mxu1  ;;  %v11482_v58 = vpop.f32.mrb[14].mxu0 }
 0x340   : > { %v1932_v40 = vpack.c.bf16 %v11462_v38, %v11460_v36  ;;  %v1919_v48 = vpop.f32.mrb[11].mxu1  ;;  %v2579_v59 = vpack.c.bf16 %v11482_v58, %v11478_v56  ;;  %v11486_v60 = vpop.f32.mrb[15].mxu0  ;;  %v10053_v36 = vld [vmem:[%s11080_s29 + $0x230] ss:$8 sps:$4 sm:$0xff]   ;;  %v10058_v38 = vld [vmem:[%s11080_s29 + $0x244] ss:$8 sps:$4 sm:$0xff]  }
 0x341   : > { %v1933_v49 = vpack.c.bf16 %v1919_v48, %v1915_v37  ;;  %v2580_v62 = vpack.c.bf16 %v11486_v60, %v11480_v57  ;;  %v10013_v37 = vld [vmem:[%s11080_s29 + $0x54] ss:$8 sps:$4 sm:$0xff]   ;;  %v10011_v48 = vld [vmem:[%s11080_s29 + $0x50] ss:$8 sps:$4 sm:$0xff]   ;;  %v10070_v57 = vld [vmem:[%s11080_s29 + $0x284] ss:$8 sps:$4 sm:$0xff]  }
 0x342   : > { %v10068_v60 = vld [vmem:[%s11080_s29 + $0x280] ss:$8 sps:$4 sm:$0xff]  }
 0x345   : > { %v11466_v50 = vpop.f32.mrb[12].mxu1  ;;  %v11491_v6 = vpop.f32.mrb[16].mxu0 }
 0x346   : > { %v11468_v51 = vpop.f32.mrb[13].mxu1  ;;  %v11494_v9 = vpop.f32.mrb[17].mxu0 }
 0x347   : > { %v11470_v52 = vpop.f32.mrb[14].mxu1  ;;  %v11496_v10 = vpop.f32.mrb[18].mxu0 }
 0x348   : > { %v1934_v53 = vpack.c.bf16 %v11470_v52, %v11466_v50  ;;  %v11474_v54 = vpop.f32.mrb[15].mxu1  ;;  %v2581_v11 = vpack.c.bf16 %v11496_v10, %v11491_v6  ;;  %v11500_v12 = vpop.f32.mrb[19].mxu0  ;;  %v10059_v50 = vld [vmem:[%s11080_s29 + $0x250] ss:$8 sps:$4 sm:$0xff]   ;;  %v10064_v52 = vld [vmem:[%s11080_s29 + $0x264] ss:$8 sps:$4 sm:$0xff]  }
 0x349   : > { %v1935_v55 = vpack.c.bf16 %v11474_v54, %v11468_v51  ;;  %v2582_v15 = vpack.c.bf16 %v11500_v12, %v11494_v9  ;;  %v10061_v51 = vld [vmem:[%s11080_s29 + $0x254] ss:$8 sps:$4 sm:$0xff]  }
 0x34a   : > { %v10067_v54 = vld [vmem:[%s11080_s29 + $0x274] ss:$8 sps:$4 sm:$0xff]  }
 0x34d   : > { %v2023_v61 = vpop.f32.mrb[16].mxu1 }
 0x34e   : > { %v2025_v63 = vpop.f32.mrb[17].mxu1 }
 0x34f   : > { %v2027_v0 = vpop.f32.mrb[18].mxu1 }
 0x350   : > { %v2042_v1 = vpack.c.bf16 %v2027_v0, %v2023_v61  ;;  %v2029_v2 = vpop.f32.mrb[19].mxu1  ;;  %v10016_v61 = vld [vmem:[%s11080_s29 + $0x64] ss:$8 sps:$4 sm:$0xff]   ;;  %v10017_v0 = vld [vmem:[%s11080_s29 + $0x70] ss:$8 sps:$4 sm:$0xff]  }
 0x351   : > { %v2043_v3 = vpack.c.bf16 %v2029_v2, %v2025_v63  ;;  %v10014_v63 = vld [vmem:[%s11080_s29 + $0x60] ss:$8 sps:$4 sm:$0xff]  }
 0x352   : > { %v10020_v2 = vld [vmem:[%s11080_s29 + $0x80] ss:$8 sps:$4 sm:$0xff]  }
 0x353   : > { %2271 = vmatprep.mubr.bf16.mxu1 %v2043_v3  ;;  %v10025_v3 = vld [vmem:[%s11080_s29 + $0x94] ss:$8 sps:$4 sm:$0xff]  }
 0x354   : > { %2272 = vmatmul.mubr.bf16.vlgmr.msra.gmra.mrb[24].mxu1 %v2042_v1  ;;  %v10022_v1 = vld [vmem:[%s11080_s29 + $0x84] ss:$8 sps:$4 sm:$0xff]  }
 0x355   : > { %2453 = vmatpush1.bf16.msra.mxu1 %v9996_v4  ;;  %v2033_v13 = vpop.f32.mrb[20].mxu1  ;;  %v10023_v4 = vld [vmem:[%s11080_s29 + $0x90] ss:$8 sps:$4 sm:$0xff]  }
 0x356   : > { %v2035_v16 = vpop.f32.mrb[21].mxu1  ;;  %2454 = vmatprep.subr.bf16.mxu1 %v10001_v8  ;;  %v10028_v8 = vld [vmem:[%s11080_s29 + $0xa4] ss:$8 sps:$4 sm:$0xff]  }
 0x357   : > { %v2037_v18 = vpop.f32.mrb[22].mxu1 }
 0x358   : > { %v2044_v19 = vpack.c.bf16 %v2037_v18, %v2033_v13  ;;  %v2039_v21 = vpop.f32.mrb[23].mxu1  ;;  %v10026_v13 = vld [vmem:[%s11080_s29 + $0xa0] ss:$8 sps:$4 sm:$0xff]  }
 0x359   : > { %v2045_v29 = vpack.c.bf16 %v2039_v21, %v2035_v16  ;;  %2455 = vmatpush1.bf16.msra.mxu1 %v9999_v14  ;;  %v10031_v14 = vld [vmem:[%s11080_s29 + $0xb4] ss:$8 sps:$4 sm:$0xff]   ;;  %v10029_v16 = vld [vmem:[%s11080_s29 + $0xb0] ss:$8 sps:$4 sm:$0xff]   ;;  %v10032_v18 = vld [vmem:[%s11080_s29 + $0xc0] ss:$8 sps:$4 sm:$0xff]  }
 0x35a   : > { %2456 = vmatprep.subr.bf16.mxu1 %v10004_v17  ;;  %v10034_v17 = vld [vmem:[%s11080_s29 + $0xc4] ss:$8 sps:$4 sm:$0xff]   ;;  %v10035_v21 = vld [vmem:[%s11080_s29 + $0xd0] ss:$8 sps:$4 sm:$0xff]  }
 0x35b   : > { %2281 = vmatprep.mubr.bf16.mxu1 %v2045_v29  ;;  %v10040_v29 = vld [vmem:[%s11080_s29 + $0xe4] ss:$8 sps:$4 sm:$0xff]  }
 0x35c   : > { %2282 = vmatmul.mubr.bf16.gmra.mrb[28].mxu1 %v2044_v19  ;;  %v10037_v19 = vld [vmem:[%s11080_s29 + $0xd4] ss:$8 sps:$4 sm:$0xff]  }
 0x35d   : > { %2457 = vmatpush1.bf16.msra.mxu1 %v10002_v31  ;;  %2484 = vmatprep.mubr.bf16.mxu1 %v1933_v49  ;;  %v10019_v49 = vld [vmem:[%s11080_s29 + $0x74] ss:$8 sps:$4 sm:$0xff]   ;;  %v10038_v31 = vld [vmem:[%s11080_s29 + $0xe0] ss:$8 sps:$4 sm:$0xff]  }
 0x35e   : > { %2458 = vmatprep.subr.bf16.mxu1 %v10007_v32  ;;  %v10043_v32 = vld [vmem:[%s11080_s29 + $0xf4] ss:$8 sps:$4 sm:$0xff]  }
 0x361   : > { %2459 = vmatpush1.bf16.msra.mxu1 %v10005_v33  ;;  %v10041_v33 = vld [vmem:[%s11080_s29 + $0xf0] ss:$8 sps:$4 sm:$0xff]  }
 0x362   : > { %2460 = vmatprep.subr.bf16.mxu1 %v10010_v34  ;;  %v10046_v34 = vld [vmem:[%s11080_s29 + $0x204] ss:$8 sps:$4 sm:$0xff]  }
 0x365   : > { %2461 = vmatpush1.bf16.msra.mxu1 %v10008_v35  ;;  %v10044_v35 = vld [vmem:[%s11080_s29 + $0x200] ss:$8 sps:$4 sm:$0xff]  }
 0x366   : > { %2462 = vmatprep.subr.bf16.mxu1 %v10013_v37  ;;  %v10049_v37 = vld [vmem:[%s11080_s29 + $0x214] ss:$8 sps:$4 sm:$0xff]  }
 0x369   : > { %2463 = vmatpush1.bf16.msra.mxu1 %v10011_v48  ;;  %v10047_v48 = vld [vmem:[%s11080_s29 + $0x210] ss:$8 sps:$4 sm:$0xff]  }
 0x36a   : > { %2464 = vmatprep.subr.bf16.mxu1 %v10016_v61  ;;  %v10052_v61 = vld [vmem:[%s11080_s29 + $0x224] ss:$8 sps:$4 sm:$0xff]  }
 0x36d   : > { %2465 = vmatpush1.bf16.msra.mxu1 %v10014_v63  ;;  %v10050_v63 = vld [vmem:[%s11080_s29 + $0x220] ss:$8 sps:$4 sm:$0xff]  }
 0x36e   : > { %2466 = vmatprep.subr.bf16.mxu1 %v10019_v49  ;;  %v10055_v49 = vld [vmem:[%s11080_s29 + $0x234] ss:$8 sps:$4 sm:$0xff]  }
 0x371   : > { %2467 = vmatpush1.bf16.msra.mxu1 %v10017_v0  ;;  %v10071_v0 = vld [vmem:[%s11080_s29 + $0x290] ss:$8 sps:$4 sm:$0xff]  }
 0x372   : > { %2468 = vmatprep.subr.bf16.mxu1 %v10022_v1  ;;  %v10076_v1 = vld [vmem:[%s11080_s29 + $0x2a4] ss:$8 sps:$4 sm:$0xff]  }
 0x375   : > { %2469 = vmatpush1.bf16.msra.mxu1 %v10020_v2  ;;  %v10074_v2 = vld [vmem:[%s11080_s29 + $0x2a0] ss:$8 sps:$4 sm:$0xff]  }
 0x376   : > { %2470 = vmatprep.subr.bf16.mxu1 %v10025_v3  ;;  %v10079_v3 = vld [vmem:[%s11080_s29 + $0x2b4] ss:$8 sps:$4 sm:$0xff]  }
 0x379   : > { %2471 = vmatpush1.bf16.msra.mxu1 %v10023_v4  ;;  %v10077_v4 = vld [vmem:[%s11080_s29 + $0x2b0] ss:$8 sps:$4 sm:$0xff]  }
 0x37a   : > { %2472 = vmatprep.subr.bf16.mxu1 %v10028_v8  ;;  %v10082_v8 = vld [vmem:[%s11080_s29 + $0x2c4] ss:$8 sps:$4 sm:$0xff]  }
 0x37d   : > { %2473 = vmatpush1.bf16.msra.mxu1 %v10026_v13  ;;  %v10080_v13 = vld [vmem:[%s11080_s29 + $0x2c0] ss:$8 sps:$4 sm:$0xff]  }
 0x37e   : > { %2474 = vmatprep.subr.bf16.mxu1 %v10031_v14  ;;  %v10085_v14 = vld [vmem:[%s11080_s29 + $0x2d4] ss:$8 sps:$4 sm:$0xff]  }
 0x381   : > { %2475 = vmatpush1.bf16.msra.mxu1 %v10029_v16  ;;  %v10083_v16 = vld [vmem:[%s11080_s29 + $0x2d0] ss:$8 sps:$4 sm:$0xff]  }
 0x382   : > { %2476 = vmatprep.subr.bf16.mxu1 %v10034_v17  ;;  %v10088_v17 = vld [vmem:[%s11080_s29 + $0x2e4] ss:$8 sps:$4 sm:$0xff]  }
 0x385   : > { %2477 = vmatpush1.bf16.msra.mxu1 %v10032_v18  ;;  %v10086_v18 = vld [vmem:[%s11080_s29 + $0x2e0] ss:$8 sps:$4 sm:$0xff]  }
 0x386   : > { %2478 = vmatprep.subr.bf16.mxu1 %v10037_v19  ;;  %v10091_v19 = vld [vmem:[%s11080_s29 + $0x2f4] ss:$8 sps:$4 sm:$0xff]  }
 0x389   : > { %2479 = vmatpush1.bf16.msra.mxu1 %v10035_v21  ;;  %v10089_v21 = vld [vmem:[%s11080_s29 + $0x2f0] ss:$8 sps:$4 sm:$0xff]  }
 0x38a   : > { %2480 = vmatprep.subr.bf16.mxu1 %v10040_v29  ;;  %v2837_v29 = vld [vmem:[%s12549_s3] sm:$0x3]  ;;  %s12559_s3 = sld [smem:[#allocation15_spill]] }
 0x38d   : > { %2481 = vmatpush1.bf16.msra.mxu1 %v10038_v31  ;;  %v2857_v31 = vld [vmem:[%s12550_s8] sm:$0x3] }
 0x38e   : > { %2482 = vmatprep.subr.bf16.mxu1 %v10043_v32  ;;  %v2842_v32 = vrot.slane %v2837_v29, %v11360_v5  ;;  %v2866_v58 = vrot.slane %v2857_v31, %v11363_v7 }
 0x391   : > { %2483 = vmatpush1.bf16.msra.mxu1 %v10041_v33  ;;  %v2846_v33 = vrot.slane %v2837_v29, %v11363_v7  ;;  %v10093_v29 = vld [vmem:[%s11095_s14 + $0x8] sm:$0xff]  }
 0x392   : > { %2776 = vmatprep.subr.bf16.mxu1 %v10046_v34  ;;  %v2862_v34 = vrot.slane %v2857_v31, %v11360_v5  ;;  %v10097_v31 = vld [vmem:[%s11095_s14 + $0x28] sm:$0xff]  }
 0x394   : > { %2485 = vmatmul.mubr.bf16.vlgmr.msra.gmra.mrb[24].mxu1 %v1932_v40  ;;  %v10056_v40 = vld [vmem:[%s11080_s29 + $0x240] ss:$8 sps:$4 sm:$0xff]  }
 0x395   : > { %2494 = vmatprep.mubr.bf16.mxu1 %v1935_v55  ;;  %2777 = vmatpush1.bf16.msra.mxu1 %v10044_v35  ;;  %v10065_v55 = vld [vmem:[%s11080_s29 + $0x270] ss:$8 sps:$4 sm:$0xff]  }
 0x396   : > { %2778 = vmatprep.subr.bf16.mxu1 %v10049_v37 }
 0x399   : > { %2779 = vmatpush1.bf16.msra.mxu1 %v10047_v48 }
 0x39a   : > { %2780 = vmatprep.subr.bf16.mxu1 %v10052_v61 }
 0x39c   : > { %2495 = vmatmul.mubr.bf16.gmra.mrb[28].mxu1 %v1934_v53  ;;  %v10062_v53 = vld [vmem:[%s11080_s29 + $0x260] ss:$8 sps:$4 sm:$0xff]  }
 0x39d   : > { %2781 = vmatpush1.bf16.msra.mxu1 %v10050_v63  ;;  %2808 = vmatprep.mubr.bf16.mxu1 %v2580_v62  ;;  %v10073_v62 = vld [vmem:[%s11080_s29 + $0x294] ss:$8 sps:$4 sm:$0xff]  }
 0x39e   : > { %2782 = vmatprep.subr.bf16.mxu1 %v10055_v49 }
 0x3a1   : > { %2783 = vmatpush1.bf16.msra.mxu1 %v10053_v36 }
 0x3a2   : > { %2784 = vmatprep.subr.bf16.mxu1 %v10058_v38 }
 0x3a5   : > { %2785 = vmatpush1.bf16.msra.mxu1 %v10056_v40 }
 0x3a6   : > { %2786 = vmatprep.subr.bf16.mxu1 %v10061_v51 }
 0x3a9   : > { %2787 = vmatpush1.bf16.msra.mxu1 %v10059_v50 }
 0x3aa   : > { %2788 = vmatprep.subr.bf16.mxu1 %v10064_v52 }
 0x3ad   : > { %2789 = vmatpush1.bf16.msra.mxu1 %v10062_v53 }
 0x3ae   : > { %2790 = vmatprep.subr.bf16.mxu1 %v10067_v54 }
 0x3b1   : > { %2791 = vmatpush1.bf16.msra.mxu1 %v10065_v55 }
 0x3b2   : > { %2792 = vmatprep.subr.bf16.mxu1 %v10070_v57 }
 0x3b5   : > { %2793 = vmatpush1.bf16.msra.mxu1 %v10068_v60 }
 0x3b6   : > { %2794 = vmatprep.subr.bf16.mxu1 %v10073_v62 }
 0x3b9   : > { %2795 = vmatpush1.bf16.msra.mxu1 %v10071_v0 }
 0x3ba   : > { %2796 = vmatprep.subr.bf16.mxu1 %v10076_v1 }
 0x3bd   : > { %2797 = vmatpush1.bf16.msra.mxu1 %v10074_v2 }
 0x3be   : > { %2798 = vmatprep.subr.bf16.mxu1 %v10079_v3 }
 0x3c1   : > { %2799 = vmatpush1.bf16.msra.mxu1 %v10077_v4 }
 0x3c2   : > { %2800 = vmatprep.subr.bf16.mxu1 %v10082_v8 }
 0x3c5   : > { %2801 = vmatpush1.bf16.msra.mxu1 %v10080_v13 }
 0x3c6   : > { %2802 = vmatprep.subr.bf16.mxu1 %v10085_v14 }
 0x3c9   : > { %2803 = vmatpush1.bf16.msra.mxu1 %v10083_v16 }
 0x3ca   : > { %2804 = vmatprep.subr.bf16.mxu1 %v10088_v17 }
 0x3cd   : > { %2805 = vmatpush1.bf16.msra.mxu1 %v10086_v18  ;;  %v10092_v18 = vld [vmem:[%s11095_s14] sm:$0xff]  }
 0x3ce   : > { %2806 = vmatprep.subr.bf16.mxu1 %v10091_v19  ;;  %v10096_v19 = vld [vmem:[%s11095_s14 + $0x20] sm:$0xff]  }
 0x3d1   : > { %2807 = vmatpush1.bf16.msra.mxu1 %v10089_v21  ;;  %v10100_v21 = vld [vmem:[%s11100_s19 + $0x104] ss:$8 sps:$4 sm:$0xff]  }
 0x3d4   : > { %2809 = vmatmul.mubr.bf16.vlgmr.msra.gmra.mrb[24].mxu1 %v2579_v59 }
 0x3d5   : > { %2818 = vmatprep.mubr.bf16.mxu1 %v2582_v15 }
 0x3dc   : > { %2819 = vmatmul.mubr.bf16.gmra.mrb[28].mxu1 %v2581_v11 }
 0x3dd   : > { %3588 = vmatprep.mubr.bf16.mxu1 %v11040_v25 }
 0x4a7   : > { %v2810_v56 = vpop.f32.mrb[24].mxu1 }
 0x4a8   : > { %v2849_v59 = vmul.f32 %v2842_v32, %v2810_v56  ;;  %v2812_v9 = vpop.f32.mrb[25].mxu1  ;;  %v10101_v56 = vld [vmem:[%s11100_s19 + $0x110] ss:$8 sps:$4 sm:$0xff]  }
 0x4a9   : > { %v2850_v12 = vmul.f32 %v2846_v33, %v2812_v9  ;;  %v2814_v15 = vpop.f32.mrb[26].mxu1  ;;  %v10104_v9 = vld [vmem:[%s11100_s19 + $0x120] ss:$8 sps:$4 sm:$0xff]  }
 0x4aa   : > { %v2869_v35 = vadd.f32 %v2862_v34, %v2849_v59  ;;  %v2851_v6 = vmul.f32 %v2842_v32, %v2814_v15  ;;  %v2816_v10 = vpop.f32.mrb[27].mxu1  ;;  %v10095_v59 = vld [vmem:[%s11095_s14 + $0x18] sm:$0xff]  }
 0x4ab   : > { %v2870_v11 = vadd.f32 %v2866_v58, %v2850_v12  ;;  %v2852_v37 = vmul.f32 %v2846_v33, %v2816_v10  ;;  %v10109_v12 = vld [vmem:[%s11100_s19 + $0x134] ss:$8 sps:$4 sm:$0xff]   ;;  %v10107_v15 = vld [vmem:[%s11100_s19 + $0x130] ss:$8 sps:$4 sm:$0xff]  }
 0x4ac   : > { %v2871_v48 = vadd.f32 %v2862_v34, %v2851_v6  ;;  %v2877_v63 = vmax.f32 %v2869_v35, 0.0  ;;  %v10112_v35 = vld [vmem:[%s11100_s19 + $0x144] ss:$8 sps:$4 sm:$0xff]   ;;  %v10110_v6 = vld [vmem:[%s11100_s19 + $0x140] ss:$8 sps:$4 sm:$0xff]  }
 0x4ad   : > { %v2872_v61 = vadd.f32 %v2866_v58, %v2852_v37  ;;  %v2878_v36 = vmax.f32 %v2870_v11, 0.0  ;;  %v10115_v10 = vld [vmem:[%s11100_s19 + $0x154] ss:$8 sps:$4 sm:$0xff]   ;;  %v10113_v11 = vld [vmem:[%s11100_s19 + $0x150] ss:$8 sps:$4 sm:$0xff]  }
 0x4ae   : > { %v2879_v49 = vmax.f32 %v2871_v48, 0.0  ;;  %v10118_v37 = vld [vmem:[%s11100_s19 + $0x164] ss:$8 sps:$4 sm:$0xff]   ;;  %v10116_v48 = vld [vmem:[%s11100_s19 + $0x160] ss:$8 sps:$4 sm:$0xff]  }
 0x4af   : > { %v2880_v38 = vmax.f32 %v2872_v61, 0.0  ;;  %v2820_v40 = vpop.f32.mrb[28].mxu1  ;;  %v10121_v61 = vld [vmem:[%s11100_s19 + $0x174] ss:$8 sps:$4 sm:$0xff]  }
 0x4b0   : > { %v2885_v51 = vpack.c.bf16 %v2879_v49, %v2877_v63  ;;  %v2853_v50 = vmul.f32 %v2842_v32, %v2820_v40  ;;  %v2822_v52 = vpop.f32.mrb[29].mxu1  ;;  %v10119_v63 = vld [vmem:[%s11100_s19 + $0x170] ss:$8 sps:$4 sm:$0xff]   ;;  %v10124_v49 = vld [vmem:[%s11100_s19 + $0x184] ss:$8 sps:$4 sm:$0xff]  }
 0x4b1   : > { %v2854_v53 = vmul.f32 %v2846_v33, %v2822_v52  ;;  %v2824_v54 = vpop.f32.mrb[30].mxu1  ;;  %v2886_v55 = vpack.c.bf16 %v2880_v38, %v2878_v36  ;;  %v10122_v36 = vld [vmem:[%s11100_s19 + $0x180] ss:$8 sps:$4 sm:$0xff]   ;;  %v10127_v38 = vld [vmem:[%s11100_s19 + $0x194] ss:$8 sps:$4 sm:$0xff]  }
 0x4b2   : > { %v2873_v57 = vadd.f32 %v2862_v34, %v2853_v50  ;;  %v2855_v60 = vmul.f32 %v2842_v32, %v2824_v54  ;;  %v2826_v62 = vpop.f32.mrb[31].mxu1  ;;  %v10094_v32 = vld [vmem:[%s11095_s14 + $0x10] sm:$0xff]   ;;  %v10128_v50 = vld [vmem:[%s11100_s19 + $0x1a0] ss:$8 sps:$4 sm:$0xff]  }
 0x4b3   : > { %v2874_v0 = vadd.f32 %v2866_v58, %v2854_v53  ;;  %v2856_v1 = vmul.f32 %v2846_v33, %v2826_v62  ;;  %2909 = vmatprep.subr.bf16.mxu0 %v2886_v55  ;;  %3556 = vmatprep.subr.bf16.mxu1 %v2886_v55  ;;  %v10098_v33 = vld [vmem:[%s11100_s19 + $0x100] ss:$8 sps:$4 sm:$0xff]   ;;  %v10125_v40 = vld [vmem:[%s11100_s19 + $0x190] ss:$8 sps:$4 sm:$0xff]   ;;  %v10133_v52 = vld [vmem:[%s11100_s19 + $0x1b4] ss:$8 sps:$4 sm:$0xff]  }
 0x4b4   : > { %v2875_v2 = vadd.f32 %v2862_v34, %v2855_v60  ;;  %2910 = vmatpush1.bf16.msra.mxu0 %v2885_v51  ;;  %3557 = vmatpush1.bf16.msra.mxu1 %v2885_v51  ;;  %v2881_v4 = vmax.f32 %v2873_v57, 0.0  ;;  %v10103_v34 = vld [vmem:[%s11100_s19 + $0x114] ss:$8 sps:$4 sm:$0xff]   ;;  %v10131_v53 = vld [vmem:[%s11100_s19 + $0x1b0] ss:$8 sps:$4 sm:$0xff]  }
 0x4b5   : > { %v2876_v3 = vadd.f32 %v2866_v58, %v2856_v1  ;;  %v2882_v13 = vmax.f32 %v2874_v0, 0.0  ;;  %v10106_v58 = vld [vmem:[%s11100_s19 + $0x124] ss:$8 sps:$4 sm:$0xff]   ;;  %v10134_v54 = vld [vmem:[%s11100_s19 + $0x1c0] ss:$8 sps:$4 sm:$0xff]  }
 0x4b6   : > { %v2883_v8 = vmax.f32 %v2875_v2, 0.0  ;;  %v10139_v57 = vld [vmem:[%s11100_s19 + $0x1d4] ss:$8 sps:$4 sm:$0xff]   ;;  %v10137_v60 = vld [vmem:[%s11100_s19 + $0x1d0] ss:$8 sps:$4 sm:$0xff]  }
 0x4b7   : > { %v2884_v14 = vmax.f32 %v2876_v3, 0.0  ;;  %v10140_v62 = vld [vmem:[%s11100_s19 + $0x1e0] ss:$8 sps:$4 sm:$0xff]   ;;  %v10142_v0 = vld [vmem:[%s11100_s19 + $0x1e4] ss:$8 sps:$4 sm:$0xff]  }
 0x4b8   : > { %v2887_v16 = vpack.c.bf16 %v2883_v8, %v2881_v4  ;;  %v10145_v1 = vld [vmem:[%s11100_s19 + $0x1f4] ss:$8 sps:$4 sm:$0xff]   ;;  %v10143_v2 = vld [vmem:[%s11100_s19 + $0x1f0] ss:$8 sps:$4 sm:$0xff]   ;;  %v10148_v3 = vld [vmem:[%s11100_s19 + $0x4] ss:$8 sps:$4 sm:$0xff]  }
 0x4b9   : > { %v2888_v17 = vpack.c.bf16 %v2884_v14, %v2882_v13 }
 0x4bb   : > { %2911 = vmatprep.subr.bf16.mxu0 %v2888_v17  ;;  %3558 = vmatprep.subr.bf16.mxu1 %v2888_v17 }
 0x4bc   : > { %2912 = vmatpush1.bf16.msra.mxu0 %v2887_v16  ;;  %3559 = vmatpush1.bf16.msra.mxu1 %v2887_v16 }
 0x4bd   : > { %3019 = vmatprep.subr.bf16.mxu0 %v2886_v55  ;;  %v10136_v55 = vld [vmem:[%s11100_s19 + $0x1c4] ss:$8 sps:$4 sm:$0xff]  }
 0x4bf   : > { %8727 = vmatmul.mubr.msk.bf16.vlgmr.msra.gmra.mrb[20].mxu0 %vm1201_vm0, %v10092_v18  ;;  %8839 = vmatmul.mubr.msk.bf16.vlgmr.msra.gmra.mrb[32].mxu1 %vm1201_vm0, %v10096_v19 }
 0x4c0   : > { %3020 = vmatpush1.bf16.msra.mxu0 %v2885_v51  ;;  %2951 = vmatprep.mubr.bf16.mxu0 %v11040_v25  ;;  %v10130_v51 = vld [vmem:[%s11100_s19 + $0x1a4] ss:$8 sps:$4 sm:$0xff]  }
 0x4c1   : > { %3021 = vmatprep.subr.bf16.mxu0 %v2888_v17  ;;  %3598 = vmatprep.mubr.bf16.mxu1 %v11040_v25 }
 0x4c4   : > { %3022 = vmatpush1.bf16.msra.mxu0 %v2887_v16 }
 0x4c5   : > { %3269 = vmatprep.subr.bf16.mxu0 %v10100_v21 }
 0x4c7   : > { %8728 = vmatmul.mubr.msk.bf16.gmra.mrb[24].mxu0 %vm1201_vm0, %v10093_v29  ;;  %8840 = vmatmul.mubr.msk.bf16.gmra.mrb[36].mxu1 %vm1201_vm0, %v10097_v31 }
 0x4c8   : > { %3051 = vmatprep.mubr.bf16.mxu0 %v11040_v25  ;;  %3969 = vmatprep.mubr.bf16.mxu1 %v11040_v25 }
 0x4cf   : > { %8735 = vmatmul.mubr.msk.bf16.vlgmr.msra.gmra.mrb[28].mxu0 %vm1201_vm0, %v10094_v32 }
 0x4d0   : > { %3061 = vmatprep.mubr.bf16.mxu0 %v11040_v25  ;;  %3270 = vmatpush1.bf16.msra.mxu0 %v10098_v33 }
 0x4d1   : > { %3271 = vmatprep.subr.bf16.mxu0 %v10103_v34 }
 0x4d4   : > { %3272 = vmatpush1.bf16.msra.mxu0 %v10101_v56 }
 0x4d5   : > { %3273 = vmatprep.subr.bf16.mxu0 %v10106_v58 }
 0x4d7   : > { %8736 = vmatmul.mubr.msk.bf16.gmra.mrb[32].mxu0 %vm1201_vm0, %v10095_v59 }
 0x4d8   : > { %3274 = vmatpush1.bf16.msra.mxu0 %v10104_v9 }
 0x4d9   : > { %3275 = vmatprep.subr.bf16.mxu0 %v10109_v12 }
 0x4dc   : > { %3276 = vmatpush1.bf16.msra.mxu0 %v10107_v15 }
 0x4dd   : > { %3277 = vmatprep.subr.bf16.mxu0 %v10112_v35 }
 0x4e0   : > { %3278 = vmatpush1.bf16.msra.mxu0 %v10110_v6 }
 0x4e1   : > { %3279 = vmatprep.subr.bf16.mxu0 %v10115_v10 }
 0x4e4   : > { %3280 = vmatpush1.bf16.msra.mxu0 %v10113_v11 }
 0x4e5   : > { %3281 = vmatprep.subr.bf16.mxu0 %v10118_v37  ;;  %v10146_v37 = vld [vmem:[%s11100_s19] ss:$8 sps:$4 sm:$0xff]  }
 0x4e8   : > { %3282 = vmatpush1.bf16.msra.mxu0 %v10116_v48 }
 0x4e9   : > { %3283 = vmatprep.subr.bf16.mxu0 %v10121_v61  ;;  %v10151_v61 = vld [vmem:[%s11100_s19 + $0x14] ss:$8 sps:$4 sm:$0xff]  }
 0x4ec   : > { %3284 = vmatpush1.bf16.msra.mxu0 %v10119_v63 }
 0x4ed   : > { %3285 = vmatprep.subr.bf16.mxu0 %v10124_v49 }
 0x4f0   : > { %3286 = vmatpush1.bf16.msra.mxu0 %v10122_v36 }
 0x4f1   : > { %3287 = vmatprep.subr.bf16.mxu0 %v10127_v38 }
 0x4f4   : > { %3288 = vmatpush1.bf16.msra.mxu0 %v10125_v40 }
 0x4f5   : > { %3289 = vmatprep.subr.bf16.mxu0 %v10130_v51  ;;  %v10149_v51 = vld [vmem:[%s11100_s19 + $0x10] ss:$8 sps:$4 sm:$0xff]  }
 0x4f8   : > { %3290 = vmatpush1.bf16.msra.mxu0 %v10128_v50 }
 0x4f9   : > { %3291 = vmatprep.subr.bf16.mxu0 %v10133_v52 }
 0x4fc   : > { %3292 = vmatpush1.bf16.msra.mxu0 %v10131_v53  ;;  %v10154_v53 = vld [vmem:[%s11100_s19 + $0x24] ss:$8 sps:$4 sm:$0xff]  }
 0x4fd   : > { %3293 = vmatprep.subr.bf16.mxu0 %v10136_v55 }
 0x500   : > { %3294 = vmatpush1.bf16.msra.mxu0 %v10134_v54 }
 0x501   : > { %3295 = vmatprep.subr.bf16.mxu0 %v10139_v57 }
 0x504   : > { %3296 = vmatpush1.bf16.msra.mxu0 %v10137_v60 }
 0x505   : > { %3297 = vmatprep.subr.bf16.mxu0 %v10142_v0  ;;  %v10157_v0 = vld [vmem:[%s11100_s19 + $0x34] ss:$8 sps:$4 sm:$0xff]  }
 0x508   : > { %3298 = vmatpush1.bf16.msra.mxu0 %v10140_v62  ;;  %v10152_v62 = vld [vmem:[%s11100_s19 + $0x20] ss:$8 sps:$4 sm:$0xff]  }
 0x509   : > { %3299 = vmatprep.subr.bf16.mxu0 %v10145_v1  ;;  %v10155_v1 = vld [vmem:[%s11100_s19 + $0x30] ss:$8 sps:$4 sm:$0xff]  }
 0x50c   : > { %3300 = vmatpush1.bf16.msra.mxu0 %v10143_v2  ;;  %v10160_v2 = vld [vmem:[%s11100_s19 + $0x44] ss:$8 sps:$4 sm:$0xff]  }
 0x50d   : > { %3482 = vmatprep.subr.bf16.mxu0 %v10148_v3  ;;  %v10158_v3 = vld [vmem:[%s11100_s19 + $0x40] ss:$8 sps:$4 sm:$0xff]  }
 0x592   : > { %v11643_v4 = vpop.f32.mrb[20].mxu0  ;;  %v11661_v33 = vpop.f32.mrb[32].mxu1 }
 0x593   : > { %v2945_v8 = vpop.f32.mrb[21].mxu0  ;;  %v11663_v34 = vpop.f32.mrb[33].mxu1 }
 0x594   : > { %v11645_v13 = vpop.f32.mrb[22].mxu0  ;;  %v11665_v56 = vpop.f32.mrb[34].mxu1 }
 0x595   : > { %v2962_v14 = vpack.c.bf16 %v11645_v13, %v11643_v4  ;;  %v2949_v16 = vpop.f32.mrb[23].mxu0  ;;  %v3609_v58 = vpack.c.bf16 %v11665_v56, %v11661_v33  ;;  %v11669_v59 = vpop.f32.mrb[35].mxu1  ;;  %v10203_v4 = vld [vmem:[%s11100_s19 + $0x230] ss:$8 sps:$4 sm:$0xff]   ;;  %v10208_v13 = vld [vmem:[%s11100_s19 + $0x244] ss:$8 sps:$4 sm:$0xff]  }
 0x596   : > { %v2963_v17 = vpack.c.bf16 %v2949_v16, %v2945_v8  ;;  %v3610_v12 = vpack.c.bf16 %v11669_v59, %v11663_v34  ;;  %v10163_v8 = vld [vmem:[%s11100_s19 + $0x54] ss:$8 sps:$4 sm:$0xff]   ;;  %v10161_v16 = vld [vmem:[%s11100_s19 + $0x50] ss:$8 sps:$4 sm:$0xff]   ;;  %v10220_v34 = vld [vmem:[%s11100_s19 + $0x284] ss:$8 sps:$4 sm:$0xff]  }
 0x597   : > { %v10218_v59 = vld [vmem:[%s11100_s19 + $0x280] ss:$8 sps:$4 sm:$0xff]  }
 0x59a   : > { %v11649_v18 = vpop.f32.mrb[24].mxu0  ;;  %v11674_v48 = vpop.f32.mrb[36].mxu1 }
 0x59b   : > { %v11651_v19 = vpop.f32.mrb[25].mxu0  ;;  %v11677_v63 = vpop.f32.mrb[37].mxu1 }
 0x59c   : > { %v11653_v21 = vpop.f32.mrb[26].mxu0  ;;  %v11679_v49 = vpop.f32.mrb[38].mxu1 }
 0x59d   : > { %v2964_v29 = vpack.c.bf16 %v11653_v21, %v11649_v18  ;;  %v11657_v31 = vpop.f32.mrb[27].mxu0  ;;  %v3611_v36 = vpack.c.bf16 %v11679_v49, %v11674_v48  ;;  %v11683_v38 = vpop.f32.mrb[39].mxu1  ;;  %v10209_v18 = vld [vmem:[%s11100_s19 + $0x250] ss:$8 sps:$4 sm:$0xff]   ;;  %v10214_v21 = vld [vmem:[%s11100_s19 + $0x264] ss:$8 sps:$4 sm:$0xff]  }
 0x59e   : > { %v2965_v32 = vpack.c.bf16 %v11657_v31, %v11651_v19  ;;  %v3612_v50 = vpack.c.bf16 %v11683_v38, %v11677_v63  ;;  %v10211_v19 = vld [vmem:[%s11100_s19 + $0x254] ss:$8 sps:$4 sm:$0xff]  }
 0x59f   : > { %v10217_v31 = vld [vmem:[%s11100_s19 + $0x274] ss:$8 sps:$4 sm:$0xff]  }
 0x5a2   : > { %v3053_v9 = vpop.f32.mrb[28].mxu0 }
 0x5a3   : > { %v3055_v15 = vpop.f32.mrb[29].mxu0 }
 0x5a4   : > { %v3057_v35 = vpop.f32.mrb[30].mxu0 }
 0x5a5   : > { %v3072_v6 = vpack.c.bf16 %v3057_v35, %v3053_v9  ;;  %v3059_v10 = vpop.f32.mrb[31].mxu0  ;;  %v10166_v9 = vld [vmem:[%s11100_s19 + $0x64] ss:$8 sps:$4 sm:$0xff]   ;;  %v10167_v35 = vld [vmem:[%s11100_s19 + $0x70] ss:$8 sps:$4 sm:$0xff]  }
 0x5a6   : > { %v3073_v11 = vpack.c.bf16 %v3059_v10, %v3055_v15  ;;  %v10164_v15 = vld [vmem:[%s11100_s19 + $0x60] ss:$8 sps:$4 sm:$0xff]  }
 0x5a7   : > { %v10170_v10 = vld [vmem:[%s11100_s19 + $0x80] ss:$8 sps:$4 sm:$0xff]  }
 0x5a8   : > { %3301 = vmatprep.mubr.bf16.mxu0 %v3073_v11  ;;  %v10175_v11 = vld [vmem:[%s11100_s19 + $0x94] ss:$8 sps:$4 sm:$0xff]  }
 0x5a9   : > { %3302 = vmatmul.mubr.bf16.vlgmr.msra.gmra.mrb[36].mxu0 %v3072_v6  ;;  %v10172_v6 = vld [vmem:[%s11100_s19 + $0x84] ss:$8 sps:$4 sm:$0xff]  }
 0x5aa   : > { %3483 = vmatpush1.bf16.msra.mxu0 %v10146_v37  ;;  %v3063_v40 = vpop.f32.mrb[32].mxu0  ;;  %v10173_v37 = vld [vmem:[%s11100_s19 + $0x90] ss:$8 sps:$4 sm:$0xff]  }
 0x5ab   : > { %v3065_v52 = vpop.f32.mrb[33].mxu0  ;;  %3484 = vmatprep.subr.bf16.mxu0 %v10151_v61  ;;  %v10178_v61 = vld [vmem:[%s11100_s19 + $0xa4] ss:$8 sps:$4 sm:$0xff]  }
 0x5ac   : > { %v3067_v54 = vpop.f32.mrb[34].mxu0 }
 0x5ad   : > { %v3074_v55 = vpack.c.bf16 %v3067_v54, %v3063_v40  ;;  %v3069_v57 = vpop.f32.mrb[35].mxu0  ;;  %v10176_v40 = vld [vmem:[%s11100_s19 + $0xa0] ss:$8 sps:$4 sm:$0xff]  }
 0x5ae   : > { %v3075_v60 = vpack.c.bf16 %v3069_v57, %v3065_v52  ;;  %3485 = vmatpush1.bf16.msra.mxu0 %v10149_v51  ;;  %v10181_v51 = vld [vmem:[%s11100_s19 + $0xb4] ss:$8 sps:$4 sm:$0xff]   ;;  %v10179_v52 = vld [vmem:[%s11100_s19 + $0xb0] ss:$8 sps:$4 sm:$0xff]   ;;  %v10182_v54 = vld [vmem:[%s11100_s19 + $0xc0] ss:$8 sps:$4 sm:$0xff]  }
 0x5af   : > { %3486 = vmatprep.subr.bf16.mxu0 %v10154_v53  ;;  %v10184_v53 = vld [vmem:[%s11100_s19 + $0xc4] ss:$8 sps:$4 sm:$0xff]   ;;  %v10185_v57 = vld [vmem:[%s11100_s19 + $0xd0] ss:$8 sps:$4 sm:$0xff]  }
 0x5b0   : > { %3311 = vmatprep.mubr.bf16.mxu0 %v3075_v60  ;;  %v10190_v60 = vld [vmem:[%s11100_s19 + $0xe4] ss:$8 sps:$4 sm:$0xff]  }
 0x5b1   : > { %3312 = vmatmul.mubr.bf16.gmra.mrb[40].mxu0 %v3074_v55  ;;  %v10187_v55 = vld [vmem:[%s11100_s19 + $0xd4] ss:$8 sps:$4 sm:$0xff]  }
 0x5b2   : > { %3487 = vmatpush1.bf16.msra.mxu0 %v10152_v62  ;;  %3514 = vmatprep.mubr.bf16.mxu0 %v2963_v17  ;;  %v10169_v17 = vld [vmem:[%s11100_s19 + $0x74] ss:$8 sps:$4 sm:$0xff]   ;;  %v10188_v62 = vld [vmem:[%s11100_s19 + $0xe0] ss:$8 sps:$4 sm:$0xff]  }
 0x5b3   : > { %3488 = vmatprep.subr.bf16.mxu0 %v10157_v0  ;;  %v10193_v0 = vld [vmem:[%s11100_s19 + $0xf4] ss:$8 sps:$4 sm:$0xff]  }
 0x5b6   : > { %3489 = vmatpush1.bf16.msra.mxu0 %v10155_v1  ;;  %v10191_v1 = vld [vmem:[%s11100_s19 + $0xf0] ss:$8 sps:$4 sm:$0xff]  }
 0x5b7   : > { %3490 = vmatprep.subr.bf16.mxu0 %v10160_v2  ;;  %v10196_v2 = vld [vmem:[%s11100_s19 + $0x204] ss:$8 sps:$4 sm:$0xff]  }
 0x5ba   : > { %3491 = vmatpush1.bf16.msra.mxu0 %v10158_v3  ;;  %v10194_v3 = vld [vmem:[%s11100_s19 + $0x200] ss:$8 sps:$4 sm:$0xff]  }
 0x5bb   : > { %3492 = vmatprep.subr.bf16.mxu0 %v10163_v8  ;;  %v10199_v8 = vld [vmem:[%s11100_s19 + $0x214] ss:$8 sps:$4 sm:$0xff]  }
 0x5be   : > { %3493 = vmatpush1.bf16.msra.mxu0 %v10161_v16  ;;  %v10197_v16 = vld [vmem:[%s11100_s19 + $0x210] ss:$8 sps:$4 sm:$0xff]  }
 0x5bf   : > { %3494 = vmatprep.subr.bf16.mxu0 %v10166_v9  ;;  %v10202_v9 = vld [vmem:[%s11100_s19 + $0x224] ss:$8 sps:$4 sm:$0xff]  }
 0x5c2   : > { %3495 = vmatpush1.bf16.msra.mxu0 %v10164_v15  ;;  %v10200_v15 = vld [vmem:[%s11100_s19 + $0x220] ss:$8 sps:$4 sm:$0xff]  }
 0x5c3   : > { %3496 = vmatprep.subr.bf16.mxu0 %v10169_v17  ;;  %v10205_v17 = vld [vmem:[%s11100_s19 + $0x234] ss:$8 sps:$4 sm:$0xff]  }
 0x5c6   : > { %3497 = vmatpush1.bf16.msra.mxu0 %v10167_v35  ;;  %v10221_v35 = vld [vmem:[%s11100_s19 + $0x290] ss:$8 sps:$4 sm:$0xff]  }
 0x5c7   : > { %3498 = vmatprep.subr.bf16.mxu0 %v10172_v6  ;;  %v10226_v6 = vld [vmem:[%s11100_s19 + $0x2a4] ss:$8 sps:$4 sm:$0xff]  }
 0x5ca   : > { %3499 = vmatpush1.bf16.msra.mxu0 %v10170_v10  ;;  %v10224_v10 = vld [vmem:[%s11100_s19 + $0x2a0] ss:$8 sps:$4 sm:$0xff]  }
 0x5cb   : > { %3500 = vmatprep.subr.bf16.mxu0 %v10175_v11  ;;  %v10229_v11 = vld [vmem:[%s11100_s19 + $0x2b4] ss:$8 sps:$4 sm:$0xff]  }
 0x5ce   : > { %3501 = vmatpush1.bf16.msra.mxu0 %v10173_v37  ;;  %v10227_v37 = vld [vmem:[%s11100_s19 + $0x2b0] ss:$8 sps:$4 sm:$0xff]  }
 0x5cf   : > { %3502 = vmatprep.subr.bf16.mxu0 %v10178_v61  ;;  %v10232_v61 = vld [vmem:[%s11100_s19 + $0x2c4] ss:$8 sps:$4 sm:$0xff]  }
 0x5d2   : > { %3503 = vmatpush1.bf16.msra.mxu0 %v10176_v40  ;;  %v10230_v40 = vld [vmem:[%s11100_s19 + $0x2c0] ss:$8 sps:$4 sm:$0xff]  }
 0x5d3   : > { %3504 = vmatprep.subr.bf16.mxu0 %v10181_v51  ;;  %v10235_v51 = vld [vmem:[%s11100_s19 + $0x2d4] ss:$8 sps:$4 sm:$0xff]  }
 0x5d6   : > { %3505 = vmatpush1.bf16.msra.mxu0 %v10179_v52  ;;  %v10233_v52 = vld [vmem:[%s11100_s19 + $0x2d0] ss:$8 sps:$4 sm:$0xff]  }
 0x5d7   : > { %3506 = vmatprep.subr.bf16.mxu0 %v10184_v53  ;;  %v10238_v53 = vld [vmem:[%s11100_s19 + $0x2e4] ss:$8 sps:$4 sm:$0xff]  }
 0x5da   : > { %3507 = vmatpush1.bf16.msra.mxu0 %v10182_v54  ;;  %v10236_v54 = vld [vmem:[%s11100_s19 + $0x2e0] ss:$8 sps:$4 sm:$0xff]  }
 0x5db   : > { %3508 = vmatprep.subr.bf16.mxu0 %v10187_v55  ;;  %v10241_v55 = vld [vmem:[%s11100_s19 + $0x2f4] ss:$8 sps:$4 sm:$0xff]  }
 0x5de   : > { %3509 = vmatpush1.bf16.msra.mxu0 %v10185_v57  ;;  %v10239_v57 = vld [vmem:[%s11100_s19 + $0x2f0] ss:$8 sps:$4 sm:$0xff]  }
 0x5df   : > { %3510 = vmatprep.subr.bf16.mxu0 %v10190_v60  ;;  %v3867_v60 = vld [vmem:[%s11105_s24] sm:$0x3] }
 0x5e2   : > { %3511 = vmatpush1.bf16.msra.mxu0 %v10188_v62  ;;  %v3887_v62 = vld [vmem:[%s11110_s30] sm:$0x3] }
 0x5e3   : > { %3512 = vmatprep.subr.bf16.mxu0 %v10193_v0  ;;  %v3872_v0 = vrot.slane %v3867_v60, %v11360_v5  ;;  %v3896_v56 = vrot.slane %v3887_v62, %v11363_v7 }
 0x5e6   : > { %3513 = vmatpush1.bf16.msra.mxu0 %v10191_v1  ;;  %v3876_v1 = vrot.slane %v3867_v60, %v11363_v7  ;;  %v10259_v60 = vld [vmem:[%s12551_s10 + $0x144] ss:$8 sps:$4 sm:$0xff]  }
 0x5e7   : > { %3806 = vmatprep.subr.bf16.mxu0 %v10196_v2  ;;  %v3892_v2 = vrot.slane %v3887_v62, %v11360_v5  ;;  %v10257_v62 = vld [vmem:[%s12551_s10 + $0x140] ss:$8 sps:$4 sm:$0xff]  }
 0x5e9   : > { %3515 = vmatmul.mubr.bf16.vlgmr.msra.gmra.mrb[36].mxu0 %v2962_v14  ;;  %v10206_v14 = vld [vmem:[%s11100_s19 + $0x240] ss:$8 sps:$4 sm:$0xff]  }
 0x5ea   : > { %3524 = vmatprep.mubr.bf16.mxu0 %v2965_v32  ;;  %3807 = vmatpush1.bf16.msra.mxu0 %v10194_v3  ;;  %v10215_v32 = vld [vmem:[%s11100_s19 + $0x270] ss:$8 sps:$4 sm:$0xff]  }
 0x5eb   : > { %3808 = vmatprep.subr.bf16.mxu0 %v10199_v8 }
 0x5ee   : > { %3809 = vmatpush1.bf16.msra.mxu0 %v10197_v16 }
 0x5ef   : > { %3810 = vmatprep.subr.bf16.mxu0 %v10202_v9 }
 0x5f1   : > { %3525 = vmatmul.mubr.bf16.gmra.mrb[40].mxu0 %v2964_v29  ;;  %v10212_v29 = vld [vmem:[%s11100_s19 + $0x260] ss:$8 sps:$4 sm:$0xff]  }
 0x5f2   : > { %3811 = vmatpush1.bf16.msra.mxu0 %v10200_v15  ;;  %3838 = vmatprep.mubr.bf16.mxu0 %v3610_v12  ;;  %v10223_v12 = vld [vmem:[%s11100_s19 + $0x294] ss:$8 sps:$4 sm:$0xff]  }
 0x5f3   : > { %3812 = vmatprep.subr.bf16.mxu0 %v10205_v17 }
 0x5f6   : > { %3813 = vmatpush1.bf16.msra.mxu0 %v10203_v4 }
 0x5f7   : > { %3814 = vmatprep.subr.bf16.mxu0 %v10208_v13 }
 0x5fa   : > { %3815 = vmatpush1.bf16.msra.mxu0 %v10206_v14 }
 0x5fb   : > { %3816 = vmatprep.subr.bf16.mxu0 %v10211_v19 }
 0x5fe   : > { %3817 = vmatpush1.bf16.msra.mxu0 %v10209_v18 }
 0x5ff   : > { %3818 = vmatprep.subr.bf16.mxu0 %v10214_v21 }
 0x602   : > { %3819 = vmatpush1.bf16.msra.mxu0 %v10212_v29 }
 0x603   : > { %3820 = vmatprep.subr.bf16.mxu0 %v10217_v31 }
 0x606   : > { %3821 = vmatpush1.bf16.msra.mxu0 %v10215_v32 }
 0x607   : > { %3822 = vmatprep.subr.bf16.mxu0 %v10220_v34 }
 0x60a   : > { %3823 = vmatpush1.bf16.msra.mxu0 %v10218_v59 }
 0x60b   : > { %3824 = vmatprep.subr.bf16.mxu0 %v10223_v12 }
 0x60e   : > { %3825 = vmatpush1.bf16.msra.mxu0 %v10221_v35 }
 0x60f   : > { %3826 = vmatprep.subr.bf16.mxu0 %v10226_v6 }
 0x612   : > { %3827 = vmatpush1.bf16.msra.mxu0 %v10224_v10 }
 0x613   : > { %3828 = vmatprep.subr.bf16.mxu0 %v10229_v11 }
 0x616   : > { %3829 = vmatpush1.bf16.msra.mxu0 %v10227_v37 }
 0x617   : > { %3830 = vmatprep.subr.bf16.mxu0 %v10232_v61 }
 0x61a   : > { %3831 = vmatpush1.bf16.msra.mxu0 %v10230_v40  ;;  %v10245_v40 = vld [vmem:[%s12551_s10 + $0x100] ss:$8 sps:$4 sm:$0xff]  }
 0x61b   : > { %3832 = vmatprep.subr.bf16.mxu0 %v10235_v51  ;;  %v10250_v51 = vld [vmem:[%s12551_s10 + $0x114] ss:$8 sps:$4 sm:$0xff]  }
 0x61e   : > { %3833 = vmatpush1.bf16.msra.mxu0 %v10233_v52  ;;  %v10248_v52 = vld [vmem:[%s12551_s10 + $0x110] ss:$8 sps:$4 sm:$0xff]  }
 0x61f   : > { %3834 = vmatprep.subr.bf16.mxu0 %v10238_v53  ;;  %v10253_v53 = vld [vmem:[%s12551_s10 + $0x124] ss:$8 sps:$4 sm:$0xff]  }
 0x622   : > { %3835 = vmatpush1.bf16.msra.mxu0 %v10236_v54  ;;  %v10251_v54 = vld [vmem:[%s12551_s10 + $0x120] ss:$8 sps:$4 sm:$0xff]  }
 0x623   : > { %3836 = vmatprep.subr.bf16.mxu0 %v10241_v55  ;;  %v10256_v55 = vld [vmem:[%s12551_s10 + $0x134] ss:$8 sps:$4 sm:$0xff]  }
 0x626   : > { %3837 = vmatpush1.bf16.msra.mxu0 %v10239_v57  ;;  %v10254_v57 = vld [vmem:[%s12551_s10 + $0x130] ss:$8 sps:$4 sm:$0xff]  }
 0x629   : > { %3839 = vmatmul.mubr.bf16.vlgmr.msra.gmra.mrb[36].mxu0 %v3609_v58 }
 0x62a   : > { %3848 = vmatprep.mubr.bf16.mxu0 %v3612_v50 }
 0x631   : > { %3849 = vmatmul.mubr.bf16.gmra.mrb[40].mxu0 %v3611_v36 }
 0x632   : > { %4552 = vmatprep.mubr.bf16.mxu0 %v11040_v25 }
 0x6fc   : > { %v3840_v33 = vpop.f32.mrb[36].mxu0 }
 0x6fd   : > { %v3879_v58 = vmul.f32 %v3872_v0, %v3840_v33  ;;  %v3842_v63 = vpop.f32.mrb[37].mxu0  ;;  %v10263_v33 = vld [vmem:[%s12551_s10 + $0x160] ss:$8 sps:$4 sm:$0xff]  }
 0x6fe   : > { %v3880_v38 = vmul.f32 %v3876_v1, %v3842_v63  ;;  %v3844_v50 = vpop.f32.mrb[38].mxu0  ;;  %v10271_v63 = vld [vmem:[%s12551_s10 + $0x184] ss:$8 sps:$4 sm:$0xff]  }
 0x6ff   : > { %v3899_v3 = vadd.f32 %v3892_v2, %v3879_v58  ;;  %v3881_v48 = vmul.f32 %v3872_v0, %v3844_v50  ;;  %v3846_v49 = vpop.f32.mrb[39].mxu0  ;;  %v10266_v58 = vld [vmem:[%s12551_s10 + $0x170] ss:$8 sps:$4 sm:$0xff]   ;;  %v10274_v50 = vld [vmem:[%s12551_s10 + $0x194] ss:$8 sps:$4 sm:$0xff]  }
 0x700   : > { %v3900_v36 = vadd.f32 %v3896_v56, %v3880_v38  ;;  %v3882_v8 = vmul.f32 %v3876_v1, %v3846_v49  ;;  %v10269_v38 = vld [vmem:[%s12551_s10 + $0x180] ss:$8 sps:$4 sm:$0xff]  }
 0x701   : > { %v3907_v16 = vadd.f32 %v3899_v3, %v1847_v30  ;;  %v3901_v9 = vadd.f32 %v3892_v2, %v3881_v48  ;;  %v10272_v3 = vld [vmem:[%s12551_s10 + $0x190] ss:$8 sps:$4 sm:$0xff]   ;;  %v10277_v48 = vld [vmem:[%s12551_s10 + $0x1a4] ss:$8 sps:$4 sm:$0xff]   ;;  %v10275_v49 = vld [vmem:[%s12551_s10 + $0x1a0] ss:$8 sps:$4 sm:$0xff]  }
 0x702   : > { %v3908_v15 = vadd.f32 %v3900_v36, %v1848_v27  ;;  %v3902_v17 = vadd.f32 %v3896_v56, %v3882_v8  ;;  %v10280_v36 = vld [vmem:[%s12551_s10 + $0x1b4] ss:$8 sps:$4 sm:$0xff]   ;;  %v10278_v8 = vld [vmem:[%s12551_s10 + $0x1b0] ss:$8 sps:$4 sm:$0xff]  }
 0x703   : > { %v3909_v4 = vadd.f32 %v3901_v9, %v1849_v26  ;;  %v3915_v19 = vmax.f32 %v3907_v16, 0.0  ;;  %v10283_v16 = vld [vmem:[%s12551_s10 + $0x1c4] ss:$8 sps:$4 sm:$0xff]   ;;  %v10281_v9 = vld [vmem:[%s12551_s10 + $0x1c0] ss:$8 sps:$4 sm:$0xff]  }
 0x704   : > { %v3910_v13 = vadd.f32 %v3902_v17, %v1850_v28  ;;  %v3850_v14 = vpop.f32.mrb[40].mxu0  ;;  %v3916_v31 = vmax.f32 %v3908_v15, 0.0  ;;  %v10286_v15 = vld [vmem:[%s12551_s10 + $0x1d4] ss:$8 sps:$4 sm:$0xff]   ;;  %v10284_v17 = vld [vmem:[%s12551_s10 + $0x1d0] ss:$8 sps:$4 sm:$0xff]  }
 0x705   : > { %v3917_v18 = vmax.f32 %v3909_v4, 0.0  ;;  %v3883_v21 = vmul.f32 %v3872_v0, %v3850_v14  ;;  %v3852_v29 = vpop.f32.mrb[41].mxu0  ;;  %v10287_v4 = vld [vmem:[%s12551_s10 + $0x1e0] ss:$8 sps:$4 sm:$0xff]   ;;  %v10292_v14 = vld [vmem:[%s12551_s10 + $0x1f4] ss:$8 sps:$4 sm:$0xff]  }
 0x706   : > { %v3918_v32 = vmax.f32 %v3910_v13, 0.0  ;;  %v3884_v22 = vmul.f32 %v3876_v1, %v3852_v29  ;;  %v3854_v30 = vpop.f32.mrb[42].mxu0  ;;  %v10289_v13 = vld [vmem:[%s12551_s10 + $0x1e4] ss:$8 sps:$4 sm:$0xff]  }
 0x707   : > { %v11784_v34 = vpack.c.bf16 %v3917_v18, %v3915_v19  ;;  %v3903_v20 = vadd.f32 %v3892_v2, %v3883_v21  ;;  %v3885_v27 = vmul.f32 %v3872_v0, %v3854_v30  ;;  %v3856_v59 = vpop.f32.mrb[43].mxu0  ;;  %v10262_v0 = vld [vmem:[%s12551_s10 + $0x154] ss:$8 sps:$4 sm:$0xff]   ;;  %v10290_v19 = vld [vmem:[%s12551_s10 + $0x1f0] ss:$8 sps:$4 sm:$0xff]  }
 0x708   : > { %v11786_v12 = vpack.c.bf16 %v3918_v32, %v3916_v31  ;;  %v3904_v23 = vadd.f32 %v3896_v56, %v3884_v22  ;;  %v3886_v26 = vmul.f32 %v3876_v1, %v3856_v59  ;;  %v10260_v1 = vld [vmem:[%s12551_s10 + $0x150] ss:$8 sps:$4 sm:$0xff]   ;;  %v10295_v18 = vld [vmem:[%s12551_s10 + $0x4] ss:$8 sps:$4 sm:$0xff]  }
 0x709   : > { %v3911_v24 = vadd.f32 %v3903_v20, %v1851_v47  ;;  %v3905_v28 = vadd.f32 %v3892_v2, %v3885_v27  ;;  %v10265_v2 = vld [vmem:[%s12551_s10 + $0x164] ss:$8 sps:$4 sm:$0xff]  }
 0x70a   : > { %v3912_v35 = vadd.f32 %v3904_v23, %v1852_v45  ;;  %v3906_v6 = vadd.f32 %v3896_v56, %v3886_v26  ;;  %3937 = vmatprep.subr.bf16.mxu1 %v11786_v12  ;;  %4520 = vmatprep.subr.bf16.mxu0 %v11786_v12  ;;  %v10268_v56 = vld [vmem:[%s12551_s10 + $0x174] ss:$8 sps:$4 sm:$0xff]  }
 0x70b   : > { %v3913_v10 = vadd.f32 %v3905_v28, %v1853_v44  ;;  %3938 = vmatpush1.bf16.msra.mxu1 %v11784_v34  ;;  %4521 = vmatpush1.bf16.msra.mxu0 %v11784_v34  ;;  %v3919_v47 = vmax.f32 %v3911_v24, 0.0  ;;  %v10244_v44 = vld [vmem:[%s12545_s6 + $0x10] sm:$0xff]  }
 0x70c   : > { %v3914_v41 = vadd.f32 %v3906_v6, %v1854_v46  ;;  %v3920_v45 = vmax.f32 %v3912_v35, 0.0  ;;  %v10243_v46 = vld [vmem:[%s12545_s6 + $0x8] sm:$0xff]   ;;  %s12561_s6 = sld [smem:[#allocation16_spill]] }
 0x70d   : > { %v3921_v39 = vmax.f32 %v3913_v10, 0.0 }
 0x70e   : > { %v3922_v11 = vmax.f32 %v3914_v41, 0.0 }
 0x70f   : > { %v11800_v37 = vpack.c.bf16 %v3921_v39, %v3919_v47  ;;  %v10293_v39 = vld [vmem:[%s12551_s10] ss:$8 sps:$4 sm:$0xff]  }
 0x710   : > { %v11802_v61 = vpack.c.bf16 %v3922_v11, %v3920_v45  ;;  %v10298_v45 = vld [vmem:[%s12551_s10 + $0x14] ss:$8 sps:$4 sm:$0xff]   ;;  %v10296_v11 = vld [vmem:[%s12551_s10 + $0x10] ss:$8 sps:$4 sm:$0xff]  }
 0x712   : > { %3939 = vmatprep.subr.bf16.mxu1 %v11802_v61  ;;  %4522 = vmatprep.subr.bf16.mxu0 %v11802_v61 }
 0x713   : > { %3940 = vmatpush1.bf16.msra.mxu1 %v11800_v37  ;;  %4523 = vmatpush1.bf16.msra.mxu0 %v11800_v37 }
 0x714   : > { %4025 = vmatprep.subr.bf16.mxu1 %v11786_v12 }
 0x716   : > { %8906 = vmatmul.mubr.msk.bf16.vlgmr.msra.gmra.mrb[40].mxu1 %vm1201_vm0, %v10242_v42  ;;  %9010 = vmatmul.mubr.msk.bf16.vlgmr.msra.gmra.mrb[44].mxu0 %vm1201_vm0, %v10244_v44  ;;  %v10301_v42 = vld [vmem:[%s12551_s10 + $0x24] ss:$8 sps:$4 sm:$0xff]   ;;  %v10299_v44 = vld [vmem:[%s12551_s10 + $0x20] ss:$8 sps:$4 sm:$0xff]  }
 0x717   : > { %4026 = vmatpush1.bf16.msra.mxu1 %v11784_v34  ;;  %4057 = vmatprep.mubr.bf16.mxu1 %v11040_v25 }
 0x718   : > { %4027 = vmatprep.subr.bf16.mxu1 %v11802_v61  ;;  %4886 = vmatprep.mubr.bf16.mxu0 %v11040_v25 }
 0x71b   : > { %4028 = vmatpush1.bf16.msra.mxu1 %v11800_v37 }
 0x71c   : > { %4263 = vmatprep.subr.bf16.mxu1 %v10247_v43  ;;  %v10304_v43 = vld [vmem:[%s12551_s10 + $0x34] ss:$8 sps:$4 sm:$0xff]  }
 0x71e   : > { %8910 = vmatmul.mubr.msk.bf16.vlgmr.msra.gmra.mrb[44].mxu1 %vm1201_vm0, %v10243_v46  ;;  %v10302_v46 = vld [vmem:[%s12551_s10 + $0x30] ss:$8 sps:$4 sm:$0xff]  }
 0x71f   : > { %4264 = vmatpush1.bf16.msra.mxu1 %v10245_v40  ;;  %v10307_v40 = vld [vmem:[%s12551_s10 + $0x44] ss:$8 sps:$4 sm:$0xff]  }
 0x720   : > { %4265 = vmatprep.subr.bf16.mxu1 %v10250_v51  ;;  %v10305_v51 = vld [vmem:[%s12551_s10 + $0x40] ss:$8 sps:$4 sm:$0xff]  }
 0x723   : > { %4266 = vmatpush1.bf16.msra.mxu1 %v10248_v52  ;;  %v10310_v52 = vld [vmem:[%s12551_s10 + $0x54] ss:$8 sps:$4 sm:$0xff]  }
 0x724   : > { %4267 = vmatprep.subr.bf16.mxu1 %v10253_v53  ;;  %v10308_v53 = vld [vmem:[%s12551_s10 + $0x50] ss:$8 sps:$4 sm:$0xff]  }
 0x727   : > { %4268 = vmatpush1.bf16.msra.mxu1 %v10251_v54  ;;  %v10313_v54 = vld [vmem:[%s12551_s10 + $0x64] ss:$8 sps:$4 sm:$0xff]  }
 0x728   : > { %4269 = vmatprep.subr.bf16.mxu1 %v10256_v55  ;;  %v10311_v55 = vld [vmem:[%s12551_s10 + $0x60] ss:$8 sps:$4 sm:$0xff]  }
 0x72b   : > { %4270 = vmatpush1.bf16.msra.mxu1 %v10254_v57  ;;  %v10316_v57 = vld [vmem:[%s12551_s10 + $0x74] ss:$8 sps:$4 sm:$0xff]  }
 0x72c   : > { %4271 = vmatprep.subr.bf16.mxu1 %v10259_v60  ;;  %v10314_v60 = vld [vmem:[%s12551_s10 + $0x70] ss:$8 sps:$4 sm:$0xff]  }
 0x72f   : > { %4272 = vmatpush1.bf16.msra.mxu1 %v10257_v62  ;;  %v10319_v62 = vld [vmem:[%s12551_s10 + $0x84] ss:$8 sps:$4 sm:$0xff]  }
 0x730   : > { %4273 = vmatprep.subr.bf16.mxu1 %v10262_v0  ;;  %v10317_v0 = vld [vmem:[%s12551_s10 + $0x80] ss:$8 sps:$4 sm:$0xff]  }
 0x733   : > { %4274 = vmatpush1.bf16.msra.mxu1 %v10260_v1  ;;  %v10322_v1 = vld [vmem:[%s12551_s10 + $0x94] ss:$8 sps:$4 sm:$0xff]  }
 0x734   : > { %4275 = vmatprep.subr.bf16.mxu1 %v10265_v2  ;;  %v10320_v2 = vld [vmem:[%s12551_s10 + $0x90] ss:$8 sps:$4 sm:$0xff]  }
 0x737   : > { %4276 = vmatpush1.bf16.msra.mxu1 %v10263_v33  ;;  %v10325_v33 = vld [vmem:[%s12551_s10 + $0xa4] ss:$8 sps:$4 sm:$0xff]  }
 0x738   : > { %4277 = vmatprep.subr.bf16.mxu1 %v10268_v56  ;;  %v10323_v56 = vld [vmem:[%s12551_s10 + $0xa0] ss:$8 sps:$4 sm:$0xff]  }
 0x73b   : > { %4278 = vmatpush1.bf16.msra.mxu1 %v10266_v58  ;;  %v10328_v58 = vld [vmem:[%s12551_s10 + $0xb4] ss:$8 sps:$4 sm:$0xff]  }
 0x73c   : > { %4279 = vmatprep.subr.bf16.mxu1 %v10271_v63  ;;  %v10326_v63 = vld [vmem:[%s12551_s10 + $0xb0] ss:$8 sps:$4 sm:$0xff]  }
 0x73f   : > { %4280 = vmatpush1.bf16.msra.mxu1 %v10269_v38  ;;  %v10331_v38 = vld [vmem:[%s12551_s10 + $0xc4] ss:$8 sps:$4 sm:$0xff]  }
 0x740   : > { %4281 = vmatprep.subr.bf16.mxu1 %v10274_v50  ;;  %v10329_v50 = vld [vmem:[%s12551_s10 + $0xc0] ss:$8 sps:$4 sm:$0xff]  }
 0x743   : > { %4282 = vmatpush1.bf16.msra.mxu1 %v10272_v3  ;;  %v10334_v3 = vld [vmem:[%s12551_s10 + $0xd4] ss:$8 sps:$4 sm:$0xff]  }
 0x744   : > { %4283 = vmatprep.subr.bf16.mxu1 %v10277_v48  ;;  %v10332_v48 = vld [vmem:[%s12551_s10 + $0xd0] ss:$8 sps:$4 sm:$0xff]  }
 0x747   : > { %4284 = vmatpush1.bf16.msra.mxu1 %v10275_v49  ;;  %v10337_v49 = vld [vmem:[%s12551_s10 + $0xe4] ss:$8 sps:$4 sm:$0xff]  }
 0x748   : > { %4285 = vmatprep.subr.bf16.mxu1 %v10280_v36  ;;  %v10335_v36 = vld [vmem:[%s12551_s10 + $0xe0] ss:$8 sps:$4 sm:$0xff]  }
 0x74b   : > { %4286 = vmatpush1.bf16.msra.mxu1 %v10278_v8  ;;  %v10340_v8 = vld [vmem:[%s12551_s10 + $0xf4] ss:$8 sps:$4 sm:$0xff]  }
 0x74c   : > { %4287 = vmatprep.subr.bf16.mxu1 %v10283_v16  ;;  %v10338_v16 = vld [vmem:[%s12551_s10 + $0xf0] ss:$8 sps:$4 sm:$0xff]  }
 0x74f   : > { %4288 = vmatpush1.bf16.msra.mxu1 %v10281_v9  ;;  %v10343_v9 = vld [vmem:[%s12551_s10 + $0x204] ss:$8 sps:$4 sm:$0xff]  }
 0x750   : > { %4289 = vmatprep.subr.bf16.mxu1 %v10286_v15  ;;  %v10341_v15 = vld [vmem:[%s12551_s10 + $0x200] ss:$8 sps:$4 sm:$0xff]  }
 0x753   : > { %4290 = vmatpush1.bf16.msra.mxu1 %v10284_v17  ;;  %v10346_v17 = vld [vmem:[%s12551_s10 + $0x214] ss:$8 sps:$4 sm:$0xff]  }
 0x754   : > { %4291 = vmatprep.subr.bf16.mxu1 %v10289_v13  ;;  %v10349_v13 = vld [vmem:[%s12551_s10 + $0x224] ss:$8 sps:$4 sm:$0xff]  }
 0x757   : > { %4292 = vmatpush1.bf16.msra.mxu1 %v10287_v4  ;;  %v10344_v4 = vld [vmem:[%s12551_s10 + $0x210] ss:$8 sps:$4 sm:$0xff]  }
 0x758   : > { %4293 = vmatprep.subr.bf16.mxu1 %v10292_v14  ;;  %v10347_v14 = vld [vmem:[%s12551_s10 + $0x220] ss:$8 sps:$4 sm:$0xff]  }
 0x75b   : > { %4294 = vmatpush1.bf16.msra.mxu1 %v10290_v19  ;;  %v10352_v19 = vld [vmem:[%s12551_s10 + $0x234] ss:$8 sps:$4 sm:$0xff]  }
 0x75c   : > { %4466 = vmatprep.subr.bf16.mxu1 %v10295_v18  ;;  %v10350_v18 = vld [vmem:[%s12551_s10 + $0x230] ss:$8 sps:$4 sm:$0xff]  }
 0x7e9   : > { %v11853_v21 = vpop.f32.mrb[40].mxu1  ;;  %v11859_v20 = vpop.f32.mrb[44].mxu0 }
 0x7ea   : > { %v3973_v29 = vpop.f32.mrb[41].mxu1  ;;  %v11861_v27 = vpop.f32.mrb[45].mxu0 }
 0x7eb   : > { %v11855_v31 = vpop.f32.mrb[42].mxu1  ;;  %v11863_v59 = vpop.f32.mrb[46].mxu0 }
 0x7ec   : > { %v3980_v32 = vpack.c.bf16 %v11855_v31, %v11853_v21  ;;  %v3977_v22 = vpop.f32.mrb[43].mxu1  ;;  %v4563_v23 = vpack.c.bf16 %v11863_v59, %v11859_v20  ;;  %v11867_v26 = vpop.f32.mrb[47].mxu0  ;;  %v10355_v21 = vld [vmem:[%s12551_s10 + $0x244] ss:$8 sps:$4 sm:$0xff]   ;;  %v10358_v31 = vld [vmem:[%s12551_s10 + $0x254] ss:$8 sps:$4 sm:$0xff]  }
 0x7ed   : > { %v3981_v30 = vpack.c.bf16 %v3977_v22, %v3973_v29  ;;  %v4564_v28 = vpack.c.bf16 %v11867_v26, %v11861_v27  ;;  %v10353_v29 = vld [vmem:[%s12551_s10 + $0x240] ss:$8 sps:$4 sm:$0xff]   ;;  %v10361_v22 = vld [vmem:[%s12551_s10 + $0x264] ss:$8 sps:$4 sm:$0xff]   ;;  %v10364_v27 = vld [vmem:[%s12551_s10 + $0x274] ss:$8 sps:$4 sm:$0xff]  }
 0x7ee   : > { %v10362_v26 = vld [vmem:[%s12551_s10 + $0x270] ss:$8 sps:$4 sm:$0xff]  }
 0x7f1   : > { %v4059_v24 = vpop.f32.mrb[44].mxu1 }
 0x7f2   : > { %v4061_v35 = vpop.f32.mrb[45].mxu1 }
 0x7f3   : > { %v4063_v6 = vpop.f32.mrb[46].mxu1 }
 0x7f4   : > { %v4068_v10 = vpack.c.bf16 %v4063_v6, %v4059_v24  ;;  %v4065_v41 = vpop.f32.mrb[47].mxu1  ;;  %v10367_v24 = vld [vmem:[%s12551_s10 + $0x284] ss:$8 sps:$4 sm:$0xff]   ;;  %v10368_v6 = vld [vmem:[%s12551_s10 + $0x290] ss:$8 sps:$4 sm:$0xff]  }
 0x7f5   : > { %v4069_v47 = vpack.c.bf16 %v4065_v41, %v4061_v35  ;;  %v10370_v35 = vld [vmem:[%s12551_s10 + $0x294] ss:$8 sps:$4 sm:$0xff]   ;;  %v10371_v41 = vld [vmem:[%s12551_s10 + $0x2a0] ss:$8 sps:$4 sm:$0xff]  }
 0x7f7   : > { %4295 = vmatprep.mubr.bf16.mxu1 %v4069_v47  ;;  %v10376_v47 = vld [vmem:[%s12551_s10 + $0x2b4] ss:$8 sps:$4 sm:$0xff]  }
 0x7f8   : > { %4296 = vmatmul.mubr.bf16.vlgmr.msra.gmra.mrb[48].mxu1 %v4068_v10  ;;  %v10373_v10 = vld [vmem:[%s12551_s10 + $0x2a4] ss:$8 sps:$4 sm:$0xff]  }
 0x7f9   : > { %4467 = vmatpush1.bf16.msra.mxu1 %v10293_v39  ;;  %4498 = vmatprep.mubr.bf16.mxu1 %v3981_v30  ;;  %v10359_v30 = vld [vmem:[%s12551_s10 + $0x260] ss:$8 sps:$4 sm:$0xff]   ;;  %v10374_v39 = vld [vmem:[%s12551_s10 + $0x2b0] ss:$8 sps:$4 sm:$0xff]  }
 0x7fa   : > { %4468 = vmatprep.subr.bf16.mxu1 %v10298_v45  ;;  %v10379_v45 = vld [vmem:[%s12551_s10 + $0x2c4] ss:$8 sps:$4 sm:$0xff]  }
 0x7fd   : > { %4469 = vmatpush1.bf16.msra.mxu1 %v10296_v11  ;;  %v10377_v11 = vld [vmem:[%s12551_s10 + $0x2c0] ss:$8 sps:$4 sm:$0xff]  }
 0x7fe   : > { %4470 = vmatprep.subr.bf16.mxu1 %v10301_v42  ;;  %v10382_v42 = vld [vmem:[%s12551_s10 + $0x2d4] ss:$8 sps:$4 sm:$0xff]  }
 0x801   : > { %4471 = vmatpush1.bf16.msra.mxu1 %v10299_v44  ;;  %v10380_v44 = vld [vmem:[%s12551_s10 + $0x2d0] ss:$8 sps:$4 sm:$0xff]  }
 0x802   : > { %4472 = vmatprep.subr.bf16.mxu1 %v10304_v43  ;;  %v10385_v43 = vld [vmem:[%s12551_s10 + $0x2e4] ss:$8 sps:$4 sm:$0xff]  }
 0x805   : > { %4473 = vmatpush1.bf16.msra.mxu1 %v10302_v46  ;;  %v10383_v46 = vld [vmem:[%s12551_s10 + $0x2e0] ss:$8 sps:$4 sm:$0xff]  }
 0x806   : > { %4474 = vmatprep.subr.bf16.mxu1 %v10307_v40  ;;  %v10388_v40 = vld [vmem:[%s12551_s10 + $0x2f4] ss:$8 sps:$4 sm:$0xff]  }
 0x809   : > { %4475 = vmatpush1.bf16.msra.mxu1 %v10305_v51  ;;  %v10386_v51 = vld [vmem:[%s12551_s10 + $0x2f0] ss:$8 sps:$4 sm:$0xff]  }
 0x80a   : > { %4476 = vmatprep.subr.bf16.mxu1 %v10310_v52  ;;  %v4805_v52 = vld [vmem:[%s12552_s18] sm:$0x3]  ;;  %s12555_s18 = sld [smem:[#allocation14_spill]] }
 0x80d   : > { %4477 = vmatpush1.bf16.msra.mxu1 %v10308_v53  ;;  %v4821_v53 = vld [vmem:[%s12553_s1] sm:$0x3]  ;;  %s12556_s1 = sld [smem:[#allocation17_spill]] }
 0x80e   : > { %4478 = vmatprep.subr.bf16.mxu1 %v10313_v54  ;;  %v4810_v54 = vrot.slane %v4805_v52, %v11360_v5 }
 0x811   : > { %4479 = vmatpush1.bf16.msra.mxu1 %v10311_v55  ;;  %v4814_v55 = vrot.slane %v4805_v52, %v11363_v7 }
 0x812   : > { %4480 = vmatprep.subr.bf16.mxu1 %v10316_v57  ;;  %v4826_v57 = vrot.slane %v4821_v53, %v11360_v5 }
 0x815   : > { %4481 = vmatpush1.bf16.msra.mxu1 %v10314_v60 }
 0x816   : > { %4482 = vmatprep.subr.bf16.mxu1 %v10319_v62  ;;  %v4830_v62 = vrot.slane %v4821_v53, %v11363_v7 }
 0x819   : > { %4483 = vmatpush1.bf16.msra.mxu1 %v10317_v0 }
 0x81a   : > { %4484 = vmatprep.subr.bf16.mxu1 %v10322_v1 }
 0x81d   : > { %4485 = vmatpush1.bf16.msra.mxu1 %v10320_v2 }
 0x81e   : > { %4486 = vmatprep.subr.bf16.mxu1 %v10325_v33 }
 0x821   : > { %4487 = vmatpush1.bf16.msra.mxu1 %v10323_v56 }
 0x822   : > { %4488 = vmatprep.subr.bf16.mxu1 %v10328_v58 }
 0x825   : > { %4489 = vmatpush1.bf16.msra.mxu1 %v10326_v63 }
 0x826   : > { %4490 = vmatprep.subr.bf16.mxu1 %v10331_v38 }
 0x829   : > { %4491 = vmatpush1.bf16.msra.mxu1 %v10329_v50 }
 0x82a   : > { %4492 = vmatprep.subr.bf16.mxu1 %v10334_v3 }
 0x82d   : > { %4493 = vmatpush1.bf16.msra.mxu1 %v10332_v48 }
 0x82e   : > { %4494 = vmatprep.subr.bf16.mxu1 %v10337_v49 }
 0x831   : > { %4495 = vmatpush1.bf16.msra.mxu1 %v10335_v36 }
 0x832   : > { %4496 = vmatprep.subr.bf16.mxu1 %v10340_v8 }
 0x835   : > { %4497 = vmatpush1.bf16.msra.mxu1 %v10338_v16  ;;  %v10389_v16 = vld [vmem:[%s12554_s7] sm:$0xff]  }
 0x836   : > { %4758 = vmatprep.subr.bf16.mxu1 %v10343_v9  ;;  %v10390_v9 = vld [vmem:[%s12554_s7 + $0x10] sm:$0xff]  }
 0x838   : > { %4499 = vmatmul.mubr.bf16.vlgmr.msra.gmra.mrb[48].mxu1 %v3980_v32  ;;  %v10356_v32 = vld [vmem:[%s12551_s10 + $0x250] ss:$8 sps:$4 sm:$0xff]  }
 0x839   : > { %4759 = vmatpush1.bf16.msra.mxu1 %v10341_v15  ;;  %4790 = vmatprep.mubr.bf16.mxu1 %v4564_v28  ;;  %v10365_v28 = vld [vmem:[%s12551_s10 + $0x280] ss:$8 sps:$4 sm:$0xff]   ;;  %v10395_v15 = vld [vmem:[%s12555_s18 + $0x104] ss:$8 sps:$4 sm:$0xff]  }
 0x83a   : > { %4760 = vmatprep.subr.bf16.mxu1 %v10346_v17  ;;  %v10392_v17 = vld [vmem:[%s12556_s1] sm:$0xff]   ;;  %s12557_s1 = sld [smem:[#allocation18_spill]] }
 0x83d   : > { %4761 = vmatpush1.bf16.msra.mxu1 %v10344_v4  ;;  %v10393_v4 = vld [vmem:[%s12555_s18 + $0x100] ss:$8 sps:$4 sm:$0xff]  }
 0x83e   : > { %4762 = vmatprep.subr.bf16.mxu1 %v10349_v13  ;;  %v10398_v13 = vld [vmem:[%s12555_s18 + $0x114] ss:$8 sps:$4 sm:$0xff]  }
 0x840   : > { %v10488_v52 = vld [vmem:[%s12557_s1 + $0x4] ss:$8 sps:$4 sm:$0xff]   ;;  %v10486_v53 = vld [vmem:[%s12557_s1] ss:$8 sps:$4 sm:$0xff]  }
 0x841   : > { %4763 = vmatpush1.bf16.msra.mxu1 %v10347_v14  ;;  %v10399_v14 = vld [vmem:[%s12555_s18 + $0x120] ss:$8 sps:$4 sm:$0xff]  }
 0x842   : > { %4764 = vmatprep.subr.bf16.mxu1 %v10352_v19  ;;  %v10402_v19 = vld [vmem:[%s12555_s18 + $0x130] ss:$8 sps:$4 sm:$0xff]  }
 0x845   : > { %4765 = vmatpush1.bf16.msra.mxu1 %v10350_v18  ;;  %v10407_v18 = vld [vmem:[%s12555_s18 + $0x144] ss:$8 sps:$4 sm:$0xff]  }
 0x846   : > { %4766 = vmatprep.subr.bf16.mxu1 %v10355_v21  ;;  %v10405_v21 = vld [vmem:[%s12555_s18 + $0x140] ss:$8 sps:$4 sm:$0xff]  }
 0x849   : > { %4767 = vmatpush1.bf16.msra.mxu1 %v10353_v29  ;;  %v10410_v29 = vld [vmem:[%s12555_s18 + $0x154] ss:$8 sps:$4 sm:$0xff]  }
 0x84a   : > { %4768 = vmatprep.subr.bf16.mxu1 %v10358_v31  ;;  %v10408_v31 = vld [vmem:[%s12555_s18 + $0x150] ss:$8 sps:$4 sm:$0xff]  }
 0x84d   : > { %4769 = vmatpush1.bf16.msra.mxu1 %v10356_v32  ;;  %v10413_v32 = vld [vmem:[%s12555_s18 + $0x164] ss:$8 sps:$4 sm:$0xff]  }
 0x84e   : > { %4770 = vmatprep.subr.bf16.mxu1 %v10361_v22  ;;  %v10411_v22 = vld [vmem:[%s12555_s18 + $0x160] ss:$8 sps:$4 sm:$0xff]  }
 0x851   : > { %4771 = vmatpush1.bf16.msra.mxu1 %v10359_v30  ;;  %v10416_v30 = vld [vmem:[%s12555_s18 + $0x174] ss:$8 sps:$4 sm:$0xff]  }
 0x852   : > { %4772 = vmatprep.subr.bf16.mxu1 %v10364_v27  ;;  %v10414_v27 = vld [vmem:[%s12555_s18 + $0x170] ss:$8 sps:$4 sm:$0xff]  }
 0x855   : > { %4773 = vmatpush1.bf16.msra.mxu1 %v10362_v26  ;;  %v10419_v26 = vld [vmem:[%s12555_s18 + $0x184] ss:$8 sps:$4 sm:$0xff]  }
 0x856   : > { %4774 = vmatprep.subr.bf16.mxu1 %v10367_v24  ;;  %v10417_v24 = vld [vmem:[%s12555_s18 + $0x180] ss:$8 sps:$4 sm:$0xff]  }
 0x859   : > { %4775 = vmatpush1.bf16.msra.mxu1 %v10365_v28  ;;  %v10422_v28 = vld [vmem:[%s12555_s18 + $0x194] ss:$8 sps:$4 sm:$0xff]  }
 0x85a   : > { %4776 = vmatprep.subr.bf16.mxu1 %v10370_v35  ;;  %v10420_v35 = vld [vmem:[%s12555_s18 + $0x190] ss:$8 sps:$4 sm:$0xff]  }
 0x85d   : > { %4777 = vmatpush1.bf16.msra.mxu1 %v10368_v6  ;;  %v10425_v6 = vld [vmem:[%s12555_s18 + $0x1a4] ss:$8 sps:$4 sm:$0xff]  }
 0x85e   : > { %4778 = vmatprep.subr.bf16.mxu1 %v10373_v10  ;;  %v10423_v10 = vld [vmem:[%s12555_s18 + $0x1a0] ss:$8 sps:$4 sm:$0xff]  }
 0x861   : > { %4779 = vmatpush1.bf16.msra.mxu1 %v10371_v41  ;;  %v10428_v41 = vld [vmem:[%s12555_s18 + $0x1b4] ss:$8 sps:$4 sm:$0xff]  }
 0x862   : > { %4780 = vmatprep.subr.bf16.mxu1 %v10376_v47  ;;  %v10426_v47 = vld [vmem:[%s12555_s18 + $0x1b0] ss:$8 sps:$4 sm:$0xff]  }
 0x865   : > { %4781 = vmatpush1.bf16.msra.mxu1 %v10374_v39  ;;  %v10431_v39 = vld [vmem:[%s12555_s18 + $0x1c4] ss:$8 sps:$4 sm:$0xff]  }
 0x866   : > { %4782 = vmatprep.subr.bf16.mxu1 %v10379_v45  ;;  %v10429_v45 = vld [vmem:[%s12555_s18 + $0x1c0] ss:$8 sps:$4 sm:$0xff]  }
 0x869   : > { %4783 = vmatpush1.bf16.msra.mxu1 %v10377_v11  ;;  %v10434_v11 = vld [vmem:[%s12555_s18 + $0x1d4] ss:$8 sps:$4 sm:$0xff]  }
 0x86a   : > { %4784 = vmatprep.subr.bf16.mxu1 %v10382_v42  ;;  %v10432_v42 = vld [vmem:[%s12555_s18 + $0x1d0] ss:$8 sps:$4 sm:$0xff]  }
 0x86d   : > { %4785 = vmatpush1.bf16.msra.mxu1 %v10380_v44  ;;  %v10435_v44 = vld [vmem:[%s12555_s18 + $0x1e0] ss:$8 sps:$4 sm:$0xff]  }
 0x86e   : > { %4786 = vmatprep.subr.bf16.mxu1 %v10385_v43  ;;  %v10437_v43 = vld [vmem:[%s12555_s18 + $0x1e4] ss:$8 sps:$4 sm:$0xff]  }
 0x871   : > { %4787 = vmatpush1.bf16.msra.mxu1 %v10383_v46  ;;  %v10440_v46 = vld [vmem:[%s12555_s18 + $0x1f4] ss:$8 sps:$4 sm:$0xff]  }
 0x872   : > { %4788 = vmatprep.subr.bf16.mxu1 %v10388_v40  ;;  %v10438_v40 = vld [vmem:[%s12555_s18 + $0x1f0] ss:$8 sps:$4 sm:$0xff]  }
 0x875   : > { %4789 = vmatpush1.bf16.msra.mxu1 %v10386_v51  ;;  %v10443_v51 = vld [vmem:[%s12555_s18 + $0x4] ss:$8 sps:$4 sm:$0xff]  }
 0x878   : > { %4791 = vmatmul.mubr.bf16.vlgmr.msra.gmra.mrb[48].mxu1 %v4563_v23 }
 0x879   : > { %5469 = vmatprep.mubr.bf16.mxu1 %v11040_v25 }
 0x94b   : > { %v4792_v60 = vpop.f32.mrb[48].mxu1 }
 0x94c   : > { %v4817_v0 = vmul.f32 %v4810_v54, %v4792_v60  ;;  %v4794_v1 = vpop.f32.mrb[49].mxu1  ;;  %v10498_v60 = vld [vmem:[%s12557_s1 + $0x20] ss:$8 sps:$4 sm:$0xff]  }
 0x94d   : > { %v4818_v2 = vmul.f32 %v4814_v55, %v4794_v1  ;;  %v4796_v33 = vpop.f32.mrb[50].mxu1  ;;  %v10512_v1 = vld [vmem:[%s12557_s1 + $0x44] ss:$8 sps:$4 sm:$0xff]  }
 0x94e   : > { %v4833_v20 = vadd.f32 %v4826_v57, %v4817_v0  ;;  %v4819_v59 = vmul.f32 %v4810_v54, %v4796_v33  ;;  %v4798_v23 = vpop.f32.mrb[51].mxu1  ;;  %v10494_v54 = vld [vmem:[%s12557_s1 + $0x14] ss:$8 sps:$4 sm:$0xff]   ;;  %v10504_v0 = vld [vmem:[%s12557_s1 + $0x30] ss:$8 sps:$4 sm:$0xff]  }
 0x94f   : > { %v4834_v56 = vadd.f32 %v4830_v62, %v4818_v2  ;;  %v4820_v58 = vmul.f32 %v4814_v55, %v4798_v23  ;;  %v10492_v55 = vld [vmem:[%s12557_s1 + $0x10] ss:$8 sps:$4 sm:$0xff]   ;;  %v10510_v2 = vld [vmem:[%s12557_s1 + $0x40] ss:$8 sps:$4 sm:$0xff]   ;;  %v10518_v33 = vld [vmem:[%s12557_s1 + $0x54] ss:$8 sps:$4 sm:$0xff]  }
 0x950   : > { %v4835_v63 = vadd.f32 %v4826_v57, %v4819_v59  ;;  %v4837_v50 = vmax.f32 %v4833_v20, 0.0  ;;  %v10500_v57 = vld [vmem:[%s12557_s1 + $0x24] ss:$8 sps:$4 sm:$0xff]   ;;  %v10516_v20 = vld [vmem:[%s12557_s1 + $0x50] ss:$8 sps:$4 sm:$0xff]  }
 0x951   : > { %v4836_v38 = vadd.f32 %v4830_v62, %v4820_v58  ;;  %v4838_v48 = vmax.f32 %v4834_v56, 0.0  ;;  %v10506_v62 = vld [vmem:[%s12557_s1 + $0x34] ss:$8 sps:$4 sm:$0xff]   ;;  %v10524_v59 = vld [vmem:[%s12557_s1 + $0x64] ss:$8 sps:$4 sm:$0xff]  }
 0x952   : > { %v4839_v3 = vmax.f32 %v4835_v63, 0.0  ;;  %v10522_v23 = vld [vmem:[%s12557_s1 + $0x60] ss:$8 sps:$4 sm:$0xff]   ;;  %v10530_v56 = vld [vmem:[%s12557_s1 + $0x74] ss:$8 sps:$4 sm:$0xff]  }
 0x953   : > { %v4840_v49 = vmax.f32 %v4836_v38, 0.0  ;;  %v10528_v58 = vld [vmem:[%s12557_s1 + $0x70] ss:$8 sps:$4 sm:$0xff]   ;;  %v10536_v63 = vld [vmem:[%s12557_s1 + $0x84] ss:$8 sps:$4 sm:$0xff]  }
 0x954   : > { %v4841_v36 = vpack.c.bf16 %v4839_v3, %v4837_v50  ;;  %v10534_v38 = vld [vmem:[%s12557_s1 + $0x80] ss:$8 sps:$4 sm:$0xff]   ;;  %v10542_v50 = vld [vmem:[%s12557_s1 + $0x94] ss:$8 sps:$4 sm:$0xff]   ;;  %v10540_v3 = vld [vmem:[%s12557_s1 + $0x90] ss:$8 sps:$4 sm:$0xff]  }
 0x955   : > { %v4842_v8 = vpack.c.bf16 %v4840_v49, %v4838_v48  ;;  %v10548_v48 = vld [vmem:[%s12557_s1 + $0xa4] ss:$8 sps:$4 sm:$0xff]   ;;  %v10546_v49 = vld [vmem:[%s12557_s1 + $0xa0] ss:$8 sps:$4 sm:$0xff]  }
 0x957   : > { %4854 = vmatprep.subr.bf16.mxu0 %v4842_v8  ;;  %5437 = vmatprep.subr.bf16.mxu1 %v4842_v8 }
 0x958   : > { %4855 = vmatpush1.bf16.msra.mxu0 %v4841_v36  ;;  %5438 = vmatpush1.bf16.msra.mxu1 %v4841_v36 }
 0x959   : > { %4942 = vmatprep.subr.bf16.mxu0 %v4842_v8  ;;  %5764 = vmatprep.subr.bf16.mxu1 %v11786_v12  ;;  %v10391_v12 = vld [vmem:[%s12554_s7 + $0x8] sm:$0xff]   ;;  %v10552_v8 = vld [vmem:[%s12557_s1 + $0xb0] ss:$8 sps:$4 sm:$0xff]  }
 0x95b   : > { %9076 = vmatmul.mubr.msk.bf16.vlgmr.msra.gmra.mrb[48].mxu0 %vm4850_vm2, %v10389_v16  ;;  %9180 = vmatmul.mubr.msk.bf16.vlgmr.msra.gmra.mrb[52].mxu1 %vm4850_vm2, %v10390_v9  ;;  %v10560_v16 = vld [vmem:[%s12557_s1 + $0xc4] ss:$8 sps:$4 sm:$0xff]   ;;  %v10558_v9 = vld [vmem:[%s12557_s1 + $0xc0] ss:$8 sps:$4 sm:$0xff]  }
 0x95c   : > { %4943 = vmatpush1.bf16.msra.mxu0 %v4841_v36  ;;  %5765 = vmatpush1.bf16.msra.mxu1 %v11784_v34  ;;  %v10396_v34 = vld [vmem:[%s12555_s18 + $0x110] ss:$8 sps:$4 sm:$0xff]   ;;  %v10554_v36 = vld [vmem:[%s12557_s1 + $0xb4] ss:$8 sps:$4 sm:$0xff]  }
 0x95d   : > { %5766 = vmatprep.subr.bf16.mxu1 %v11802_v61  ;;  %4974 = vmatprep.mubr.bf16.mxu0 %v11040_v25  ;;  %v10401_v61 = vld [vmem:[%s12555_s18 + $0x124] ss:$8 sps:$4 sm:$0xff]  }
 0x95e   : > { %5796 = vmatprep.mubr.bf16.mxu1 %v11040_v25  ;;  %5180 = vmatprep.subr.bf16.mxu0 %v10395_v15  ;;  %v10566_v15 = vld [vmem:[%s12557_s1 + $0xd4] ss:$8 sps:$4 sm:$0xff]  }
 0x960   : > { %5767 = vmatpush1.bf16.msra.mxu1 %v11800_v37  ;;  %v10404_v37 = vld [vmem:[%s12555_s18 + $0x134] ss:$8 sps:$4 sm:$0xff]  }
 0x961   : > { %6001 = vmatprep.subr.bf16.mxu1 %v10488_v52  ;;  %v10452_v52 = vld [vmem:[%s12555_s18 + $0x34] ss:$8 sps:$4 sm:$0xff]  }
 0x963   : > { %9080 = vmatmul.mubr.msk.bf16.vlgmr.msra.gmra.mrb[52].mxu0 %vm4850_vm2, %v10391_v12  ;;  %9246 = vmatmul.mubr.msk.bf16.vlgmr.msra.gmra.mrb[56].mxu1 %vm1201_vm0, %v10392_v17  ;;  %v10564_v12 = vld [vmem:[%s12557_s1 + $0xd0] ss:$8 sps:$4 sm:$0xff]   ;;  %v10572_v17 = vld [vmem:[%s12557_s1 + $0xe4] ss:$8 sps:$4 sm:$0xff]  }
 0x964   : > { %5181 = vmatpush1.bf16.msra.mxu0 %v10393_v4  ;;  %6002 = vmatpush1.bf16.msra.mxu1 %v10486_v53  ;;  %v10570_v4 = vld [vmem:[%s12557_s1 + $0xe0] ss:$8 sps:$4 sm:$0xff]   ;;  %v10450_v53 = vld [vmem:[%s12555_s18 + $0x30] ss:$8 sps:$4 sm:$0xff]  }
 0x965   : > { %5182 = vmatprep.subr.bf16.mxu0 %v10398_v13  ;;  %6003 = vmatprep.subr.bf16.mxu1 %v10494_v54  ;;  %v10455_v54 = vld [vmem:[%s12555_s18 + $0x44] ss:$8 sps:$4 sm:$0xff]  }
 0x968   : > { %5183 = vmatpush1.bf16.msra.mxu0 %v10396_v34  ;;  %6004 = vmatpush1.bf16.msra.mxu1 %v10492_v55  ;;  %v10453_v55 = vld [vmem:[%s12555_s18 + $0x40] ss:$8 sps:$4 sm:$0xff]  }
 0x969   : > { %5184 = vmatprep.subr.bf16.mxu0 %v10401_v61  ;;  %6005 = vmatprep.subr.bf16.mxu1 %v10500_v57  ;;  %v10458_v57 = vld [vmem:[%s12555_s18 + $0x54] ss:$8 sps:$4 sm:$0xff]  }
 0x96c   : > { %5185 = vmatpush1.bf16.msra.mxu0 %v10399_v14  ;;  %6006 = vmatpush1.bf16.msra.mxu1 %v10498_v60  ;;  %v10456_v60 = vld [vmem:[%s12555_s18 + $0x50] ss:$8 sps:$4 sm:$0xff]  }
 0x96d   : > { %5186 = vmatprep.subr.bf16.mxu0 %v10404_v37  ;;  %6007 = vmatprep.subr.bf16.mxu1 %v10506_v62  ;;  %v10461_v62 = vld [vmem:[%s12555_s18 + $0x64] ss:$8 sps:$4 sm:$0xff]  }
 0x970   : > { %5187 = vmatpush1.bf16.msra.mxu0 %v10402_v19  ;;  %6008 = vmatpush1.bf16.msra.mxu1 %v10504_v0  ;;  %v10459_v0 = vld [vmem:[%s12555_s18 + $0x60] ss:$8 sps:$4 sm:$0xff]  }
 0x971   : > { %5188 = vmatprep.subr.bf16.mxu0 %v10407_v18  ;;  %6009 = vmatprep.subr.bf16.mxu1 %v10512_v1  ;;  %v10578_v18 = vld [vmem:[%s12557_s1 + $0xf4] ss:$8 sps:$4 sm:$0xff]  }
 0x972   : > { %v10464_v1 = vld [vmem:[%s12555_s18 + $0x74] ss:$8 sps:$4 sm:$0xff]  }
 0x974   : > { %5189 = vmatpush1.bf16.msra.mxu0 %v10405_v21  ;;  %6010 = vmatpush1.bf16.msra.mxu1 %v10510_v2  ;;  %v10462_v2 = vld [vmem:[%s12555_s18 + $0x70] ss:$8 sps:$4 sm:$0xff]  }
 0x975   : > { %5190 = vmatprep.subr.bf16.mxu0 %v10410_v29  ;;  %6011 = vmatprep.subr.bf16.mxu1 %v10518_v33  ;;  %v10467_v33 = vld [vmem:[%s12555_s18 + $0x84] ss:$8 sps:$4 sm:$0xff]  }
 0x978   : > { %5191 = vmatpush1.bf16.msra.mxu0 %v10408_v31  ;;  %6012 = vmatpush1.bf16.msra.mxu1 %v10516_v20  ;;  %v10465_v20 = vld [vmem:[%s12555_s18 + $0x80] ss:$8 sps:$4 sm:$0xff]  }
 0x979   : > { %5192 = vmatprep.subr.bf16.mxu0 %v10413_v32  ;;  %6013 = vmatprep.subr.bf16.mxu1 %v10524_v59  ;;  %v10470_v59 = vld [vmem:[%s12555_s18 + $0x94] ss:$8 sps:$4 sm:$0xff]  }
 0x97c   : > { %5193 = vmatpush1.bf16.msra.mxu0 %v10411_v22  ;;  %6014 = vmatpush1.bf16.msra.mxu1 %v10522_v23  ;;  %v10576_v22 = vld [vmem:[%s12557_s1 + $0xf0] ss:$8 sps:$4 sm:$0xff]   ;;  %s12558_s1 = sld [smem:[#allocation19_spill]] }
 0x97d   : > { %5194 = vmatprep.subr.bf16.mxu0 %v10416_v30  ;;  %6015 = vmatprep.subr.bf16.mxu1 %v10530_v56  ;;  %v10468_v23 = vld [vmem:[%s12555_s18 + $0x90] ss:$8 sps:$4 sm:$0xff]   ;;  %v10473_v56 = vld [vmem:[%s12555_s18 + $0xa4] ss:$8 sps:$4 sm:$0xff]  }
 0x980   : > { %5195 = vmatpush1.bf16.msra.mxu0 %v10414_v27  ;;  %6016 = vmatpush1.bf16.msra.mxu1 %v10528_v58  ;;  %v10471_v58 = vld [vmem:[%s12555_s18 + $0xa0] ss:$8 sps:$4 sm:$0xff]  }
 0x981   : > { %5196 = vmatprep.subr.bf16.mxu0 %v10419_v26  ;;  %6017 = vmatprep.subr.bf16.mxu1 %v10536_v63  ;;  %v10476_v63 = vld [vmem:[%s12555_s18 + $0xb4] ss:$8 sps:$4 sm:$0xff]  }
 0x984   : > { %5197 = vmatpush1.bf16.msra.mxu0 %v10417_v24  ;;  %6018 = vmatpush1.bf16.msra.mxu1 %v10534_v38  ;;  %v10474_v38 = vld [vmem:[%s12555_s18 + $0xb0] ss:$8 sps:$4 sm:$0xff]  }
 0x985   : > { %5198 = vmatprep.subr.bf16.mxu0 %v10422_v28  ;;  %6019 = vmatprep.subr.bf16.mxu1 %v10542_v50  ;;  %v10479_v50 = vld [vmem:[%s12555_s18 + $0xc4] ss:$8 sps:$4 sm:$0xff]  }
 0x988   : > { %5199 = vmatpush1.bf16.msra.mxu0 %v10420_v35  ;;  %6020 = vmatpush1.bf16.msra.mxu1 %v10540_v3  ;;  %v10477_v3 = vld [vmem:[%s12555_s18 + $0xc0] ss:$8 sps:$4 sm:$0xff]  }
 0x989   : > { %5200 = vmatprep.subr.bf16.mxu0 %v10425_v6  ;;  %6021 = vmatprep.subr.bf16.mxu1 %v10548_v48  ;;  %v10482_v48 = vld [vmem:[%s12555_s18 + $0xd4] ss:$8 sps:$4 sm:$0xff]  }
 0x98c   : > { %5201 = vmatpush1.bf16.msra.mxu0 %v10423_v10  ;;  %6022 = vmatpush1.bf16.msra.mxu1 %v10546_v49  ;;  %v10480_v49 = vld [vmem:[%s12555_s18 + $0xd0] ss:$8 sps:$4 sm:$0xff]  }
 0x98d   : > { %5202 = vmatprep.subr.bf16.mxu0 %v10428_v41  ;;  %6023 = vmatprep.subr.bf16.mxu1 %v10554_v36  ;;  %v10485_v36 = vld [vmem:[%s12555_s18 + $0xe4] ss:$8 sps:$4 sm:$0xff]  }
 0x990   : > { %5203 = vmatpush1.bf16.msra.mxu0 %v10426_v47  ;;  %6024 = vmatpush1.bf16.msra.mxu1 %v10552_v8  ;;  %v10483_v8 = vld [vmem:[%s12555_s18 + $0xe0] ss:$8 sps:$4 sm:$0xff]  }
 0x991   : > { %5204 = vmatprep.subr.bf16.mxu0 %v10431_v39  ;;  %6025 = vmatprep.subr.bf16.mxu1 %v10560_v16  ;;  %v10491_v16 = vld [vmem:[%s12555_s18 + $0xf4] ss:$8 sps:$4 sm:$0xff]  }
 0x994   : > { %5205 = vmatpush1.bf16.msra.mxu0 %v10429_v45  ;;  %6026 = vmatpush1.bf16.msra.mxu1 %v10558_v9  ;;  %v10489_v9 = vld [vmem:[%s12555_s18 + $0xf0] ss:$8 sps:$4 sm:$0xff]  }
 0x995   : > { %5206 = vmatprep.subr.bf16.mxu0 %v10434_v11  ;;  %6027 = vmatprep.subr.bf16.mxu1 %v10566_v15  ;;  %v10497_v15 = vld [vmem:[%s12555_s18 + $0x204] ss:$8 sps:$4 sm:$0xff]  }
 0x998   : > { %5207 = vmatpush1.bf16.msra.mxu0 %v10432_v42  ;;  %6028 = vmatpush1.bf16.msra.mxu1 %v10564_v12  ;;  %v10441_v42 = vld [vmem:[%s12555_s18] ss:$8 sps:$4 sm:$0xff]  }
 0x999   : > { %5208 = vmatprep.subr.bf16.mxu0 %v10437_v43  ;;  %6029 = vmatprep.subr.bf16.mxu1 %v10572_v17  ;;  %v10446_v43 = vld [vmem:[%s12555_s18 + $0x14] ss:$8 sps:$4 sm:$0xff]   ;;  %v10495_v12 = vld [vmem:[%s12555_s18 + $0x200] ss:$8 sps:$4 sm:$0xff]  }
 0x99a   : > { %v10503_v17 = vld [vmem:[%s12555_s18 + $0x214] ss:$8 sps:$4 sm:$0xff]  }
 0x99c   : > { %5209 = vmatpush1.bf16.msra.mxu0 %v10435_v44  ;;  %6030 = vmatpush1.bf16.msra.mxu1 %v10570_v4  ;;  %v10501_v4 = vld [vmem:[%s12555_s18 + $0x210] ss:$8 sps:$4 sm:$0xff]  }
 0x99d   : > { %5210 = vmatprep.subr.bf16.mxu0 %v10440_v46  ;;  %6031 = vmatprep.subr.bf16.mxu1 %v10578_v18  ;;  %v10444_v46 = vld [vmem:[%s12555_s18 + $0x10] ss:$8 sps:$4 sm:$0xff]   ;;  %v10507_v18 = vld [vmem:[%s12555_s18 + $0x220] ss:$8 sps:$4 sm:$0xff]  }
 0x9a0   : > { %5211 = vmatpush1.bf16.msra.mxu0 %v10438_v40  ;;  %6032 = vmatpush1.bf16.msra.mxu1 %v10576_v22  ;;  %v10449_v40 = vld [vmem:[%s12555_s18 + $0x24] ss:$8 sps:$4 sm:$0xff]  }
 0x9a1   : > { %5383 = vmatprep.subr.bf16.mxu0 %v10443_v51  ;;  %v10447_v51 = vld [vmem:[%s12555_s18 + $0x20] ss:$8 sps:$4 sm:$0xff]   ;;  %v10533_v22 = vld [vmem:[%s12555_s18 + $0x264] ss:$8 sps:$4 sm:$0xff]  }
 0xa2e   : > { %v12027_v13 = vpop.f32.mrb[48].mxu0  ;;  %v12029_v34 = vpop.f32.mrb[52].mxu1 }
 0xa2f   : > { %v4890_v61 = vpop.f32.mrb[49].mxu0  ;;  %v12031_v14 = vpop.f32.mrb[53].mxu1 }
 0xa30   : > { %v12033_v37 = vpop.f32.mrb[50].mxu0  ;;  %v12035_v19 = vpop.f32.mrb[54].mxu1 }
 0xa31   : > { %v4897_v21 = vpack.c.bf16 %v12033_v37, %v12027_v13  ;;  %v4894_v29 = vpop.f32.mrb[51].mxu0  ;;  %v5480_v31 = vpack.c.bf16 %v12035_v19, %v12029_v34  ;;  %v12042_v32 = vpop.f32.mrb[55].mxu1  ;;  %v10513_v13 = vld [vmem:[%s12555_s18 + $0x230] ss:$8 sps:$4 sm:$0xff]   ;;  %v10521_v37 = vld [vmem:[%s12555_s18 + $0x244] ss:$8 sps:$4 sm:$0xff]  }
 0xa32   : > { %v4898_v30 = vpack.c.bf16 %v4894_v29, %v4890_v61  ;;  %v5481_v27 = vpack.c.bf16 %v12042_v32, %v12031_v14  ;;  %v10509_v61 = vld [vmem:[%s12555_s18 + $0x224] ss:$8 sps:$4 sm:$0xff]   ;;  %v10515_v29 = vld [vmem:[%s12555_s18 + $0x234] ss:$8 sps:$4 sm:$0xff]   ;;  %v10525_v32 = vld [vmem:[%s12555_s18 + $0x250] ss:$8 sps:$4 sm:$0xff]  }
 0xa33   : > { %v10527_v14 = vld [vmem:[%s12555_s18 + $0x254] ss:$8 sps:$4 sm:$0xff]  }
 0xa36   : > { %v4976_v26 = vpop.f32.mrb[52].mxu0  ;;  %v5798_v24 = vpop.f32.mrb[56].mxu1 }
 0xa37   : > { %v4978_v28 = vpop.f32.mrb[53].mxu0  ;;  %v5800_v35 = vpop.f32.mrb[57].mxu1 }
 0xa38   : > { %v4980_v6 = vpop.f32.mrb[54].mxu0  ;;  %v5802_v10 = vpop.f32.mrb[58].mxu1 }
 0xa39   : > { %v4985_v41 = vpack.c.bf16 %v4980_v6, %v4976_v26  ;;  %v4982_v47 = vpop.f32.mrb[55].mxu0  ;;  %v5807_v39 = vpack.c.bf16 %v5802_v10, %v5798_v24  ;;  %v5804_v45 = vpop.f32.mrb[59].mxu1  ;;  %v10537_v26 = vld [vmem:[%s12555_s18 + $0x270] ss:$8 sps:$4 sm:$0xff]   ;;  %v10545_v24 = vld [vmem:[%s12555_s18 + $0x284] ss:$8 sps:$4 sm:$0xff]  }
 0xa3a   : > { %v4986_v11 = vpack.c.bf16 %v4982_v47, %v4978_v28  ;;  %v5808_v44 = vpack.c.bf16 %v5804_v45, %v5800_v35  ;;  %v10543_v28 = vld [vmem:[%s12555_s18 + $0x280] ss:$8 sps:$4 sm:$0xff]   ;;  %v10551_v35 = vld [vmem:[%s12555_s18 + $0x294] ss:$8 sps:$4 sm:$0xff]   ;;  %v10549_v6 = vld [vmem:[%s12555_s18 + $0x290] ss:$8 sps:$4 sm:$0xff]  }
 0xa3b   : > { %v10557_v10 = vld [vmem:[%s12555_s18 + $0x2a4] ss:$8 sps:$4 sm:$0xff]   ;;  %v10563_v47 = vld [vmem:[%s12555_s18 + $0x2b4] ss:$8 sps:$4 sm:$0xff]  }
 0xa3c   : > { %5212 = vmatprep.mubr.bf16.mxu0 %v4986_v11  ;;  %6033 = vmatprep.mubr.bf16.mxu1 %v5808_v44  ;;  %v10569_v45 = vld [vmem:[%s12555_s18 + $0x2c4] ss:$8 sps:$4 sm:$0xff]   ;;  %v10567_v11 = vld [vmem:[%s12555_s18 + $0x2c0] ss:$8 sps:$4 sm:$0xff]   ;;  %v10573_v44 = vld [vmem:[%s12555_s18 + $0x2d0] ss:$8 sps:$4 sm:$0xff]  }
 0xa3d   : > { %5213 = vmatmul.mubr.bf16.vlgmr.msra.gmra.mrb[56].mxu0 %v4985_v41  ;;  %6034 = vmatmul.mubr.bf16.vlgmr.msra.gmra.mrb[60].mxu1 %v5807_v39  ;;  %v10555_v41 = vld [vmem:[%s12555_s18 + $0x2a0] ss:$8 sps:$4 sm:$0xff]   ;;  %v10561_v39 = vld [vmem:[%s12555_s18 + $0x2b0] ss:$8 sps:$4 sm:$0xff]  }
 0xa3e   : > { %5384 = vmatpush1.bf16.msra.mxu0 %v10441_v42  ;;  %5415 = vmatprep.mubr.bf16.mxu0 %v4898_v30  ;;  %v10531_v30 = vld [vmem:[%s12555_s18 + $0x260] ss:$8 sps:$4 sm:$0xff]   ;;  %v10575_v42 = vld [vmem:[%s12555_s18 + $0x2d4] ss:$8 sps:$4 sm:$0xff]  }
 0xa3f   : > { %5385 = vmatprep.subr.bf16.mxu0 %v10446_v43  ;;  %6202 = vmatprep.mubr.bf16.mxu1 %v11040_v25  ;;  %v10581_v43 = vld [vmem:[%s12555_s18 + $0x2e4] ss:$8 sps:$4 sm:$0xff]  }
 0xa42   : > { %5386 = vmatpush1.bf16.msra.mxu0 %v10444_v46  ;;  %v10579_v46 = vld [vmem:[%s12555_s18 + $0x2e0] ss:$8 sps:$4 sm:$0xff]  }
 0xa43   : > { %5387 = vmatprep.subr.bf16.mxu0 %v10449_v40  ;;  %v10584_v40 = vld [vmem:[%s12555_s18 + $0x2f4] ss:$8 sps:$4 sm:$0xff]  }
 0xa46   : > { %5388 = vmatpush1.bf16.msra.mxu0 %v10447_v51  ;;  %v10582_v51 = vld [vmem:[%s12555_s18 + $0x2f0] ss:$8 sps:$4 sm:$0xff]  }
 0xa47   : > { %5389 = vmatprep.subr.bf16.mxu0 %v10452_v52 }
 0xa4a   : > { %5390 = vmatpush1.bf16.msra.mxu0 %v10450_v53 }
 0xa4b   : > { %5391 = vmatprep.subr.bf16.mxu0 %v10455_v54 }
 0xa4e   : > { %5392 = vmatpush1.bf16.msra.mxu0 %v10453_v55 }
 0xa4f   : > { %5393 = vmatprep.subr.bf16.mxu0 %v10458_v57  ;;  %v6044_v57 = vld [vmem:[%s12558_s1] sm:$0x3]  ;;  %s12565_s1 = sld [smem:[#allocation24_spill]] }
 0xa52   : > { %5394 = vmatpush1.bf16.msra.mxu0 %v10456_v60  ;;  %v5722_v60 = vld [vmem:[%s12559_s3] sm:$0x3]  ;;  %s12563_s3 = sld [smem:[#allocation21_spill]] }
 0xa53   : > { %5395 = vmatprep.subr.bf16.mxu0 %v10461_v62  ;;  %v6049_v62 = vrot.slane %v6044_v57, %v11360_v5 }
 0xa56   : > { %5396 = vmatpush1.bf16.msra.mxu0 %v10459_v0  ;;  %v6060_v0 = vld [vmem:[%s12560_s5] sm:$0x3]  ;;  %s12562_s5 = sld [smem:[#allocation22_spill]] }
 0xa57   : > { %5397 = vmatprep.subr.bf16.mxu0 %v10464_v1  ;;  %v6053_v1 = vrot.slane %v6044_v57, %v11363_v7  ;;  %v6065_v19 = vrot.slane %v6060_v0, %v11360_v5 }
 0xa5a   : > { %5398 = vmatpush1.bf16.msra.mxu0 %v10462_v2  ;;  %v5738_v2 = vld [vmem:[%s12561_s6] sm:$0x3]  ;;  %s12564_s6 = sld [smem:[#allocation23_spill]] }
 0xa5b   : > { %5399 = vmatprep.subr.bf16.mxu0 %v10467_v33  ;;  %v5727_v33 = vrot.slane %v5722_v60, %v11360_v5 }
 0xa5c   : > { %v10611_v57 = vld [vmem:[%s12562_s5 + $0x184] ss:$8 sps:$4 sm:$0xff]  }
 0xa5e   : > { %5400 = vmatpush1.bf16.msra.mxu0 %v10465_v20  ;;  %v5731_v20 = vrot.slane %v5722_v60, %v11363_v7  ;;  %v10609_v60 = vld [vmem:[%s12562_s5 + $0x180] ss:$8 sps:$4 sm:$0xff]  }
 0xa5f   : > { %5401 = vmatprep.subr.bf16.mxu0 %v10470_v59 }
 0xa62   : > { %5402 = vmatpush1.bf16.msra.mxu0 %v10468_v23  ;;  %v6069_v23 = vrot.slane %v6060_v0, %v11363_v7  ;;  %v10612_v0 = vld [vmem:[%s12562_s5 + $0x190] ss:$8 sps:$4 sm:$0xff]  }
 0xa63   : > { %5403 = vmatprep.subr.bf16.mxu0 %v10473_v56 }
 0xa66   : > { %5404 = vmatpush1.bf16.msra.mxu0 %v10471_v58  ;;  %v5747_v58 = vrot.slane %v5738_v2, %v11363_v7 }
 0xa67   : > { %5405 = vmatprep.subr.bf16.mxu0 %v10476_v63 }
 0xa6a   : > { %5406 = vmatpush1.bf16.msra.mxu0 %v10474_v38 }
 0xa6b   : > { %5407 = vmatprep.subr.bf16.mxu0 %v10479_v50 }
 0xa6e   : > { %5408 = vmatpush1.bf16.msra.mxu0 %v10477_v3 }
 0xa6f   : > { %5409 = vmatprep.subr.bf16.mxu0 %v10482_v48 }
 0xa72   : > { %5410 = vmatpush1.bf16.msra.mxu0 %v10480_v49 }
 0xa73   : > { %5411 = vmatprep.subr.bf16.mxu0 %v10485_v36 }
 0xa76   : > { %5412 = vmatpush1.bf16.msra.mxu0 %v10483_v8 }
 0xa77   : > { %5413 = vmatprep.subr.bf16.mxu0 %v10491_v16 }
 0xa7a   : > { %5414 = vmatpush1.bf16.msra.mxu0 %v10489_v9 }
 0xa7b   : > { %5675 = vmatprep.subr.bf16.mxu0 %v10497_v15 }
 0xa7d   : > { %5416 = vmatmul.mubr.bf16.vlgmr.msra.gmra.mrb[56].mxu0 %v4897_v21  ;;  %v10519_v21 = vld [vmem:[%s12555_s18 + $0x240] ss:$8 sps:$4 sm:$0xff]  }
 0xa7e   : > { %5676 = vmatpush1.bf16.msra.mxu0 %v10495_v12  ;;  %5707 = vmatprep.mubr.bf16.mxu0 %v5481_v27  ;;  %v10539_v27 = vld [vmem:[%s12555_s18 + $0x274] ss:$8 sps:$4 sm:$0xff]  }
 0xa7f   : > { %5677 = vmatprep.subr.bf16.mxu0 %v10503_v17 }
 0xa82   : > { %5678 = vmatpush1.bf16.msra.mxu0 %v10501_v4 }
 0xa83   : > { %5679 = vmatprep.subr.bf16.mxu0 %v10509_v61 }
 0xa86   : > { %5680 = vmatpush1.bf16.msra.mxu0 %v10507_v18 }
 0xa87   : > { %5681 = vmatprep.subr.bf16.mxu0 %v10515_v29 }
 0xa8a   : > { %5682 = vmatpush1.bf16.msra.mxu0 %v10513_v13 }
 0xa8b   : > { %5683 = vmatprep.subr.bf16.mxu0 %v10521_v37 }
 0xa8e   : > { %5684 = vmatpush1.bf16.msra.mxu0 %v10519_v21 }
 0xa8f   : > { %5685 = vmatprep.subr.bf16.mxu0 %v10527_v14 }
 0xa92   : > { %5686 = vmatpush1.bf16.msra.mxu0 %v10525_v32 }
 0xa93   : > { %5687 = vmatprep.subr.bf16.mxu0 %v10533_v22 }
 0xa96   : > { %5688 = vmatpush1.bf16.msra.mxu0 %v10531_v30 }
 0xa97   : > { %5689 = vmatprep.subr.bf16.mxu0 %v10539_v27 }
 0xa9a   : > { %5690 = vmatpush1.bf16.msra.mxu0 %v10537_v26 }
 0xa9b   : > { %5691 = vmatprep.subr.bf16.mxu0 %v10545_v24 }
 0xa9e   : > { %5692 = vmatpush1.bf16.msra.mxu0 %v10543_v28  ;;  %v10587_v28 = vld [vmem:[%s12562_s5 + $0x104] ss:$8 sps:$4 sm:$0xff]  }
 0xa9f   : > { %5693 = vmatprep.subr.bf16.mxu0 %v10551_v35  ;;  %v9280_v35 = vld [vmem:[%s12563_s3 + $0x4] sm:$0xf] }
 0xaa2   : > { %5694 = vmatpush1.bf16.msra.mxu0 %v10549_v6  ;;  %v6086_v6 = vld [vmem:[%s12563_s3] sm:$0xf] }
 0xaa3   : > { %5695 = vmatprep.subr.bf16.mxu0 %v10557_v10  ;;  %v10585_v10 = vld [vmem:[%s12562_s5 + $0x100] ss:$8 sps:$4 sm:$0xff]  }
 0xaa6   : > { %5696 = vmatpush1.bf16.msra.mxu0 %v10555_v41  ;;  %v10590_v41 = vld [vmem:[%s12562_s5 + $0x114] ss:$8 sps:$4 sm:$0xff]  }
 0xaa7   : > { %5697 = vmatprep.subr.bf16.mxu0 %v10563_v47  ;;  %v10588_v47 = vld [vmem:[%s12562_s5 + $0x110] ss:$8 sps:$4 sm:$0xff]  }
 0xaaa   : > { %5698 = vmatpush1.bf16.msra.mxu0 %v10561_v39  ;;  %v10593_v39 = vld [vmem:[%s12562_s5 + $0x124] ss:$8 sps:$4 sm:$0xff]  }
 0xaab   : > { %5699 = vmatprep.subr.bf16.mxu0 %v10569_v45  ;;  %v9378_v45 = vld [vmem:[%s12563_s3 + $0x8] sm:$0xf]  ;;  %s12566_s3 = sld [smem:[#allocation25_spill]] }
 0xaae   : > { %5700 = vmatpush1.bf16.msra.mxu0 %v10567_v11  ;;  %v10591_v11 = vld [vmem:[%s12562_s5 + $0x120] ss:$8 sps:$4 sm:$0xff]  }
 0xaaf   : > { %5701 = vmatprep.subr.bf16.mxu0 %v10575_v42  ;;  %v10596_v42 = vld [vmem:[%s12562_s5 + $0x134] ss:$8 sps:$4 sm:$0xff]  }
 0xab2   : > { %5702 = vmatpush1.bf16.msra.mxu0 %v10573_v44  ;;  %v10594_v44 = vld [vmem:[%s12562_s5 + $0x130] ss:$8 sps:$4 sm:$0xff]  }
 0xab3   : > { %5703 = vmatprep.subr.bf16.mxu0 %v10581_v43  ;;  %v10599_v43 = vld [vmem:[%s12562_s5 + $0x144] ss:$8 sps:$4 sm:$0xff]  }
 0xab6   : > { %5704 = vmatpush1.bf16.msra.mxu0 %v10579_v46  ;;  %v10597_v46 = vld [vmem:[%s12562_s5 + $0x140] ss:$8 sps:$4 sm:$0xff]  }
 0xab7   : > { %5705 = vmatprep.subr.bf16.mxu0 %v10584_v40  ;;  %v10602_v40 = vld [vmem:[%s12562_s5 + $0x154] ss:$8 sps:$4 sm:$0xff]  }
 0xaba   : > { %5706 = vmatpush1.bf16.msra.mxu0 %v10582_v51  ;;  %v10600_v51 = vld [vmem:[%s12562_s5 + $0x150] ss:$8 sps:$4 sm:$0xff]  }
 0xabd   : > { %5708 = vmatmul.mubr.bf16.vlgmr.msra.gmra.mrb[56].mxu0 %v5480_v31  ;;  %v5743_v31 = vrot.slane %v5738_v2, %v11360_v5  ;;  %v10615_v2 = vld [vmem:[%s12562_s5 + $0x1a0] ss:$8 sps:$4 sm:$0xff]  }
 0xabe   : > { %6122 = vmatprep.mubr.bf16.mxu0 %v11040_v25 }
 0xb10   : > { %v6035_v52 = vpop.f32.mrb[60].mxu1 }
 0xb11   : > { %v6037_v53 = vpop.f32.mrb[61].mxu1  ;;  %v6056_v34 = vmul.f32 %v6049_v62, %v6035_v52  ;;  %v10605_v52 = vld [vmem:[%s12562_s5 + $0x164] ss:$8 sps:$4 sm:$0xff]  }
 0xb12   : > { %v6039_v54 = vpop.f32.mrb[62].mxu1  ;;  %v6057_v59 = vmul.f32 %v6053_v1, %v6037_v53  ;;  %v10603_v53 = vld [vmem:[%s12562_s5 + $0x160] ss:$8 sps:$4 sm:$0xff]  }
 0xb13   : > { %v6041_v55 = vpop.f32.mrb[63].mxu1  ;;  %v6058_v63 = vmul.f32 %v6049_v62, %v6039_v54  ;;  %v6072_v36 = vadd.f32 %v6065_v19, %v6056_v34  ;;  %v10608_v54 = vld [vmem:[%s12562_s5 + $0x174] ss:$8 sps:$4 sm:$0xff]   ;;  %v10623_v34 = vld [vmem:[%s12562_s5 + $0x1c4] ss:$8 sps:$4 sm:$0xff]  }
 0xb14   : > { %v6059_v3 = vmul.f32 %v6053_v1, %v6041_v55  ;;  %v6073_v15 = vadd.f32 %v6069_v23, %v6057_v59  ;;  %v10606_v55 = vld [vmem:[%s12562_s5 + $0x170] ss:$8 sps:$4 sm:$0xff]   ;;  %v10614_v62 = vld [vmem:[%s12562_s5 + $0x194] ss:$8 sps:$4 sm:$0xff]   ;;  %v10617_v1 = vld [vmem:[%s12562_s5 + $0x1a4] ss:$8 sps:$4 sm:$0xff]  }
 0xb15   : > { %v6074_v4 = vadd.f32 %v6065_v19, %v6058_v63  ;;  %v10621_v19 = vld [vmem:[%s12562_s5 + $0x1c0] ss:$8 sps:$4 sm:$0xff]   ;;  %v10624_v59 = vld [vmem:[%s12562_s5 + $0x1d0] ss:$8 sps:$4 sm:$0xff]  }
 0xb16   : > { %v6075_v29 = vadd.f32 %v6069_v23, %v6059_v3  ;;  %v10629_v23 = vld [vmem:[%s12562_s5 + $0x1e4] ss:$8 sps:$4 sm:$0xff]   ;;  %v10630_v63 = vld [vmem:[%s12562_s5 + $0x1f0] ss:$8 sps:$4 sm:$0xff]  }
 0xb90   : > { %v5709_v56 = vpop.f32.mrb[56].mxu0 }
 0xb91   : > { %v5734_v38 = vmul.f32 %v5727_v33, %v5709_v56  ;;  %v5711_v50 = vpop.f32.mrb[57].mxu0  ;;  %v10627_v56 = vld [vmem:[%s12562_s5 + $0x1e0] ss:$8 sps:$4 sm:$0xff]  }
 0xb92   : > { %v5735_v48 = vmul.f32 %v5731_v20, %v5711_v50  ;;  %v5713_v49 = vpop.f32.mrb[58].mxu0 }
 0xb93   : > { %v5750_v8 = vadd.f32 %v5743_v31, %v5734_v38  ;;  %v5736_v16 = vmul.f32 %v5727_v33, %v5713_v49  ;;  %v5715_v9 = vpop.f32.mrb[59].mxu0  ;;  %v10620_v33 = vld [vmem:[%s12562_s5 + $0x1b4] ss:$8 sps:$4 sm:$0xff]   ;;  %v10635_v38 = vld [vmem:[%s12562_s5 + $0x4] ss:$8 sps:$4 sm:$0xff]  }
 0xb94   : > { %v5751_v12 = vadd.f32 %v5747_v58, %v5735_v48  ;;  %v5737_v17 = vmul.f32 %v5731_v20, %v5715_v9  ;;  %v10618_v20 = vld [vmem:[%s12562_s5 + $0x1b0] ss:$8 sps:$4 sm:$0xff]  }
 0xb95   : > { %v6076_v61 = vadd.f32 %v6072_v36, %v5750_v8  ;;  %v5752_v18 = vadd.f32 %v5743_v31, %v5736_v16  ;;  %v10626_v31 = vld [vmem:[%s12562_s5 + $0x1d4] ss:$8 sps:$4 sm:$0xff]   ;;  %v10633_v16 = vld [vmem:[%s12562_s5] ss:$8 sps:$4 sm:$0xff]  }
 0xb96   : > { %v6077_v13 = vadd.f32 %v6073_v15, %v5751_v12  ;;  %v5753_v37 = vadd.f32 %v5747_v58, %v5737_v17  ;;  %v10632_v58 = vld [vmem:[%s12562_s5 + $0x1f4] ss:$8 sps:$4 sm:$0xff]  }
 0xb97   : > { %v6078_v21 = vadd.f32 %v6074_v4, %v5752_v18  ;;  %v6080_v32 = vmax.f32 %v6076_v61, 0.0  ;;  %v10638_v4 = vld [vmem:[%s12562_s5 + $0x14] ss:$8 sps:$4 sm:$0xff]   ;;  %v10636_v18 = vld [vmem:[%s12562_s5 + $0x10] ss:$8 sps:$4 sm:$0xff]  }
 0xb98   : > { %v6079_v14 = vadd.f32 %v6075_v29, %v5753_v37  ;;  %v6081_v30 = vmax.f32 %v6077_v13, 0.0  ;;  %v10641_v29 = vld [vmem:[%s12562_s5 + $0x24] ss:$8 sps:$4 sm:$0xff]  }
 0xb99   : > { %v6082_v22 = vmax.f32 %v6078_v21, 0.0  ;;  %v10639_v21 = vld [vmem:[%s12562_s5 + $0x20] ss:$8 sps:$4 sm:$0xff]  }
 0xb9a   : > { %v6083_v27 = vmax.f32 %v6079_v14, 0.0 }
 0xb9b   : > { %v12133_v26 = vpack.c.bf16 %v6082_v22, %v6080_v32  ;;  %v10644_v32 = vld [vmem:[%s12562_s5 + $0x34] ss:$8 sps:$4 sm:$0xff]  }
 0xb9c   : > { %v12135_v24 = vpack.c.bf16 %v6083_v27, %v6081_v30  ;;  %v10642_v30 = vld [vmem:[%s12562_s5 + $0x30] ss:$8 sps:$4 sm:$0xff]   ;;  %v10647_v27 = vld [vmem:[%s12562_s5 + $0x44] ss:$8 sps:$4 sm:$0xff]  }
 0xb9e   : > { %6090 = vmatprep.subr.bf16.mxu0 %v12135_v24  ;;  %6170 = vmatprep.subr.bf16.mxu1 %v12135_v24 }
 0xb9f   : > { %6091 = vmatpush1.bf16.msra.mxu0 %v12133_v26  ;;  %6171 = vmatpush1.bf16.msra.mxu1 %v12133_v26 }
 0xba0   : > { %6653 = vmatprep.subr.bf16.mxu1 %v12135_v24  ;;  %6406 = vmatprep.subr.bf16.mxu0 %v10587_v28  ;;  %v10645_v28 = vld [vmem:[%s12562_s5 + $0x40] ss:$8 sps:$4 sm:$0xff]  }
 0xba2   : > { %9281 = vmatmul.mubr.msk.bf16.vlgmr.msra.gmra.mrb[64].mxu1 %vm4850_vm2, %v9280_v35  ;;  %9279 = vmatmul.mubr.msk.bf16.vlgmr.msra.gmra.mrb[60].mxu0 %vm4850_vm2, %v6086_v6  ;;  %v10650_v35 = vld [vmem:[%s12562_s5 + $0x54] ss:$8 sps:$4 sm:$0xff]   ;;  %v10648_v6 = vld [vmem:[%s12562_s5 + $0x50] ss:$8 sps:$4 sm:$0xff]  }
 0xba3   : > { %6654 = vmatpush1.bf16.msra.mxu1 %v12133_v26  ;;  %6685 = vmatprep.mubr.bf16.mxu1 %v11040_v25 }
 0xba4   : > { %6407 = vmatpush1.bf16.msra.mxu0 %v10585_v10  ;;  %v10653_v10 = vld [vmem:[%s12562_s5 + $0x64] ss:$8 sps:$4 sm:$0xff]  }
 0xba5   : > { %6408 = vmatprep.subr.bf16.mxu0 %v10590_v41  ;;  %v10651_v41 = vld [vmem:[%s12562_s5 + $0x60] ss:$8 sps:$4 sm:$0xff]  }
 0xba8   : > { %6409 = vmatpush1.bf16.msra.mxu0 %v10588_v47  ;;  %v10656_v47 = vld [vmem:[%s12562_s5 + $0x74] ss:$8 sps:$4 sm:$0xff]  }
 0xba9   : > { %6410 = vmatprep.subr.bf16.mxu0 %v10593_v39  ;;  %v10654_v39 = vld [vmem:[%s12562_s5 + $0x70] ss:$8 sps:$4 sm:$0xff]  }
 0xbaa   : > { %9379 = vmatmul.mubr.msk.bf16.vlgmr.msra.gmra.mrb[68].mxu1 %vm4850_vm2, %v9378_v45  ;;  %v10659_v45 = vld [vmem:[%s12562_s5 + $0x84] ss:$8 sps:$4 sm:$0xff]  }
 0xbab   : > { %7008 = vmatprep.mubr.bf16.mxu1 %v11040_v25 }
 0xbac   : > { %6411 = vmatpush1.bf16.msra.mxu0 %v10591_v11  ;;  %v10657_v11 = vld [vmem:[%s12562_s5 + $0x80] ss:$8 sps:$4 sm:$0xff]  }
 0xbad   : > { %6412 = vmatprep.subr.bf16.mxu0 %v10596_v42  ;;  %v10662_v42 = vld [vmem:[%s12562_s5 + $0x94] ss:$8 sps:$4 sm:$0xff]  }
 0xbb0   : > { %6413 = vmatpush1.bf16.msra.mxu0 %v10594_v44  ;;  %v10660_v44 = vld [vmem:[%s12562_s5 + $0x90] ss:$8 sps:$4 sm:$0xff]  }
 0xbb1   : > { %6414 = vmatprep.subr.bf16.mxu0 %v10599_v43  ;;  %v10665_v43 = vld [vmem:[%s12562_s5 + $0xa4] ss:$8 sps:$4 sm:$0xff]  }
 0xbb4   : > { %6415 = vmatpush1.bf16.msra.mxu0 %v10597_v46  ;;  %v10663_v46 = vld [vmem:[%s12562_s5 + $0xa0] ss:$8 sps:$4 sm:$0xff]  }
 0xbb5   : > { %6416 = vmatprep.subr.bf16.mxu0 %v10602_v40  ;;  %v10668_v40 = vld [vmem:[%s12562_s5 + $0xb4] ss:$8 sps:$4 sm:$0xff]  }
 0xbb8   : > { %6417 = vmatpush1.bf16.msra.mxu0 %v10600_v51  ;;  %v10666_v51 = vld [vmem:[%s12562_s5 + $0xb0] ss:$8 sps:$4 sm:$0xff]  }
 0xbb9   : > { %6418 = vmatprep.subr.bf16.mxu0 %v10605_v52  ;;  %v10671_v52 = vld [vmem:[%s12562_s5 + $0xc4] ss:$8 sps:$4 sm:$0xff]  }
 0xbbc   : > { %6419 = vmatpush1.bf16.msra.mxu0 %v10603_v53  ;;  %v10669_v53 = vld [vmem:[%s12562_s5 + $0xc0] ss:$8 sps:$4 sm:$0xff]  }
 0xbbd   : > { %6420 = vmatprep.subr.bf16.mxu0 %v10608_v54  ;;  %v10674_v54 = vld [vmem:[%s12562_s5 + $0xd4] ss:$8 sps:$4 sm:$0xff]  }
 0xbc0   : > { %6421 = vmatpush1.bf16.msra.mxu0 %v10606_v55  ;;  %v10672_v55 = vld [vmem:[%s12562_s5 + $0xd0] ss:$8 sps:$4 sm:$0xff]  }
 0xbc1   : > { %6422 = vmatprep.subr.bf16.mxu0 %v10611_v57  ;;  %v10677_v57 = vld [vmem:[%s12562_s5 + $0xe4] ss:$8 sps:$4 sm:$0xff]  }
 0xbc4   : > { %6423 = vmatpush1.bf16.msra.mxu0 %v10609_v60  ;;  %v10675_v60 = vld [vmem:[%s12562_s5 + $0xe0] ss:$8 sps:$4 sm:$0xff]  }
 0xbc5   : > { %6424 = vmatprep.subr.bf16.mxu0 %v10614_v62  ;;  %v10680_v62 = vld [vmem:[%s12562_s5 + $0xf4] ss:$8 sps:$4 sm:$0xff]  }
 0xbc8   : > { %6425 = vmatpush1.bf16.msra.mxu0 %v10612_v0  ;;  %v10678_v0 = vld [vmem:[%s12562_s5 + $0xf0] ss:$8 sps:$4 sm:$0xff]  }
 0xbc9   : > { %6426 = vmatprep.subr.bf16.mxu0 %v10617_v1  ;;  %v10683_v1 = vld [vmem:[%s12562_s5 + $0x204] ss:$8 sps:$4 sm:$0xff]  }
 0xbcc   : > { %6427 = vmatpush1.bf16.msra.mxu0 %v10615_v2 }
 0xbcd   : > { %6428 = vmatprep.subr.bf16.mxu0 %v10620_v33  ;;  %v10681_v33 = vld [vmem:[%s12562_s5 + $0x200] ss:$8 sps:$4 sm:$0xff]  }
 0xbd0   : > { %6429 = vmatpush1.bf16.msra.mxu0 %v10618_v20 }
 0xbd1   : > { %6430 = vmatprep.subr.bf16.mxu0 %v10623_v34  ;;  %v10686_v34 = vld [vmem:[%s12562_s5 + $0x214] ss:$8 sps:$4 sm:$0xff]  }
 0xbd4   : > { %6431 = vmatpush1.bf16.msra.mxu0 %v10621_v19  ;;  %v10684_v19 = vld [vmem:[%s12562_s5 + $0x210] ss:$8 sps:$4 sm:$0xff]  }
 0xbd5   : > { %6432 = vmatprep.subr.bf16.mxu0 %v10626_v31  ;;  %v10689_v31 = vld [vmem:[%s12562_s5 + $0x224] ss:$8 sps:$4 sm:$0xff]  }
 0xbd8   : > { %6433 = vmatpush1.bf16.msra.mxu0 %v10624_v59  ;;  %v10687_v59 = vld [vmem:[%s12562_s5 + $0x220] ss:$8 sps:$4 sm:$0xff]  }
 0xbd9   : > { %6434 = vmatprep.subr.bf16.mxu0 %v10629_v23  ;;  %v10692_v23 = vld [vmem:[%s12562_s5 + $0x234] ss:$8 sps:$4 sm:$0xff]  }
 0xbdc   : > { %6435 = vmatpush1.bf16.msra.mxu0 %v10627_v56  ;;  %v10690_v56 = vld [vmem:[%s12562_s5 + $0x230] ss:$8 sps:$4 sm:$0xff]  }
 0xbdd   : > { %6436 = vmatprep.subr.bf16.mxu0 %v10632_v58  ;;  %v10695_v58 = vld [vmem:[%s12562_s5 + $0x244] ss:$8 sps:$4 sm:$0xff]  }
 0xbe0   : > { %6437 = vmatpush1.bf16.msra.mxu0 %v10630_v63  ;;  %v10693_v63 = vld [vmem:[%s12562_s5 + $0x240] ss:$8 sps:$4 sm:$0xff]  }
 0xbe1   : > { %6607 = vmatprep.subr.bf16.mxu0 %v10635_v38  ;;  %v10698_v38 = vld [vmem:[%s12562_s5 + $0x254] ss:$8 sps:$4 sm:$0xff]  }
 0xc75   : > { %v6204_v50 = vpop.f32.mrb[64].mxu1  ;;  %v12184_v3 = vpop.f32.mrb[60].mxu0 }
 0xc76   : > { %v6206_v48 = vpop.f32.mrb[65].mxu1  ;;  %v6126_v49 = vpop.f32.mrb[61].mxu0  ;;  %v6211_v12 = vpack.c.bf16 %v6204_v50, %v6204_v50  ;;  %v6131_v2 = vpack.c.bf16 %v12184_v3, %v12184_v3  ;;  %v10696_v50 = vld [vmem:[%s12562_s5 + $0x250] ss:$8 sps:$4 sm:$0xff]   ;;  %v10701_v3 = vld [vmem:[%s12562_s5 + $0x264] ss:$8 sps:$4 sm:$0xff]  }
 0xc77   : > { %v6212_v36 = vpack.c.bf16 %v6206_v48, %v6206_v48  ;;  %v6208_v8 = vpop.f32.mrb[66].mxu1  ;;  %v6132_v9 = vpack.c.bf16 %v6126_v49, %v6126_v49  ;;  %v6128_v15 = vpop.f32.mrb[62].mxu0  ;;  %v10699_v48 = vld [vmem:[%s12562_s5 + $0x260] ss:$8 sps:$4 sm:$0xff]   ;;  %v10704_v49 = vld [vmem:[%s12562_s5 + $0x274] ss:$8 sps:$4 sm:$0xff]  }
 0xc78   : > { %v6209_v17 = vpop.f32.mrb[67].mxu1  ;;  %v6129_v61 = vpop.f32.mrb[63].mxu0  ;;  %v10707_v8 = vld [vmem:[%s12562_s5 + $0x284] ss:$8 sps:$4 sm:$0xff]   ;;  %v10708_v15 = vld [vmem:[%s12562_s5 + $0x290] ss:$8 sps:$4 sm:$0xff]  }
 0xc79   : > { %6438 = vmatprep.mubr.bf16.mxu0 %v6212_v36  ;;  %v10702_v36 = vld [vmem:[%s12562_s5 + $0x270] ss:$8 sps:$4 sm:$0xff]   ;;  %v10711_v17 = vld [vmem:[%s12562_s5 + $0x2a0] ss:$8 sps:$4 sm:$0xff]  }
 0xc7a   : > { %6439 = vmatmul.mubr.bf16.vlgmr.msra.gmra.mrb[64].mxu0 %v6211_v12  ;;  %v10713_v12 = vld [vmem:[%s12562_s5 + $0x2a4] ss:$8 sps:$4 sm:$0xff]   ;;  %v10714_v61 = vld [vmem:[%s12562_s5 + $0x2b0] ss:$8 sps:$4 sm:$0xff]  }
 0xc7b   : > { %6608 = vmatpush1.bf16.msra.mxu0 %v10633_v16  ;;  %6639 = vmatprep.mubr.bf16.mxu0 %v6132_v9  ;;  %v10705_v16 = vld [vmem:[%s12562_s5 + $0x280] ss:$8 sps:$4 sm:$0xff]   ;;  %v10710_v9 = vld [vmem:[%s12562_s5 + $0x294] ss:$8 sps:$4 sm:$0xff]  }
 0xc7c   : > { %6609 = vmatprep.subr.bf16.mxu0 %v10638_v4  ;;  %v10716_v4 = vld [vmem:[%s12562_s5 + $0x2b4] ss:$8 sps:$4 sm:$0xff]  }
 0xc7d   : > { %v12190_v13 = vpop.f32.mrb[68].mxu1 }
 0xc7e   : > { %v12192_v37 = vpop.f32.mrb[69].mxu1 }
 0xc7f   : > { %6610 = vmatpush1.bf16.msra.mxu0 %v10636_v18  ;;  %v6691_v14 = vpop.f32.mrb[70].mxu1  ;;  %v6695_v20 = vpack.c.bf16 %v12192_v37, %v12192_v37  ;;  %v10719_v18 = vld [vmem:[%s12562_s5 + $0x2c4] ss:$8 sps:$4 sm:$0xff]   ;;  %v10722_v37 = vld [vmem:[%s12562_s5 + $0x2d4] ss:$8 sps:$4 sm:$0xff]  }
 0xc80   : > { %6611 = vmatprep.subr.bf16.mxu0 %v10641_v29  ;;  %v6692_v22 = vpop.f32.mrb[71].mxu1  ;;  %v10717_v29 = vld [vmem:[%s12562_s5 + $0x2c0] ss:$8 sps:$4 sm:$0xff]   ;;  %v10725_v14 = vld [vmem:[%s12562_s5 + $0x2e4] ss:$8 sps:$4 sm:$0xff]  }
 0xc81   : > { %v10728_v22 = vld [vmem:[%s12562_s5 + $0x2f4] ss:$8 sps:$4 sm:$0xff]  }
 0xc83   : > { %6612 = vmatpush1.bf16.msra.mxu0 %v10639_v21  ;;  %v10720_v21 = vld [vmem:[%s12562_s5 + $0x2d0] ss:$8 sps:$4 sm:$0xff]  }
 0xc84   : > { %6613 = vmatprep.subr.bf16.mxu0 %v10644_v32  ;;  %v10723_v32 = vld [vmem:[%s12562_s5 + $0x2e0] ss:$8 sps:$4 sm:$0xff]  }
 0xc87   : > { %6614 = vmatpush1.bf16.msra.mxu0 %v10642_v30  ;;  %v10726_v30 = vld [vmem:[%s12562_s5 + $0x2f0] ss:$8 sps:$4 sm:$0xff]   ;;  %s12567_s5 = sld [smem:[#allocation26_spill]] }
 0xc88   : > { %6615 = vmatprep.subr.bf16.mxu0 %v10647_v27  ;;  %v6694_v27 = vpack.c.bf16 %v12190_v13, %v12190_v13 }
 0xc8b   : > { %6616 = vmatpush1.bf16.msra.mxu0 %v10645_v28  ;;  %v6932_v28 = vld [vmem:[%s12564_s6] sm:$0x3]  ;;  %s12568_s6 = sld [smem:[#allocation29_spill]] }
 0xc8c   : > { %6617 = vmatprep.subr.bf16.mxu0 %v10650_v35  ;;  %v6946_v35 = vld [vmem:[%s12565_s1] sm:$0x3]  ;;  %s12569_s1 = sld [smem:[#allocation30_spill]] }
 0xc8f   : > { %6618 = vmatpush1.bf16.msra.mxu0 %v10648_v6  ;;  %v6937_v6 = vrot.slane %v6932_v28, %v11360_v5 }
 0xc90   : > { %6619 = vmatprep.subr.bf16.mxu0 %v10653_v10  ;;  %v6941_v10 = vrot.slane %v6932_v28, %v11363_v7 }
 0xc92   : > { %v10848_v28 = vld [vmem:[%s12569_s1 + $0x34] ss:$8 sps:$4 sm:$0xff]  }
 0xc93   : > { %6620 = vmatpush1.bf16.msra.mxu0 %v10651_v41  ;;  %v6951_v41 = vrot.slane %v6946_v35, %v11360_v5 }
 0xc94   : > { %6621 = vmatprep.subr.bf16.mxu0 %v10656_v47 }
 0xc97   : > { %6622 = vmatpush1.bf16.msra.mxu0 %v10654_v39  ;;  %v6955_v39 = vrot.slane %v6946_v35, %v11363_v7  ;;  %v10846_v35 = vld [vmem:[%s12569_s1 + $0x30] ss:$8 sps:$4 sm:$0xff]  }
 0xc98   : > { %6623 = vmatprep.subr.bf16.mxu0 %v10659_v45 }
 0xc9b   : > { %6624 = vmatpush1.bf16.msra.mxu0 %v10657_v11 }
 0xc9c   : > { %6625 = vmatprep.subr.bf16.mxu0 %v10662_v42 }
 0xc9f   : > { %6626 = vmatpush1.bf16.msra.mxu0 %v10660_v44 }
 0xca0   : > { %6627 = vmatprep.subr.bf16.mxu0 %v10665_v43 }
 0xca3   : > { %6628 = vmatpush1.bf16.msra.mxu0 %v10663_v46 }
 0xca4   : > { %6629 = vmatprep.subr.bf16.mxu0 %v10668_v40 }
 0xca7   : > { %6630 = vmatpush1.bf16.msra.mxu0 %v10666_v51 }
 0xca8   : > { %6631 = vmatprep.subr.bf16.mxu0 %v10671_v52 }
 0xcab   : > { %6632 = vmatpush1.bf16.msra.mxu0 %v10669_v53  ;;  %v6964_v53 = vld [vmem:[%s12566_s3] sm:$0xf] }
 0xcac   : > { %6633 = vmatprep.subr.bf16.mxu0 %v10674_v54  ;;  %v10731_v54 = vld [vmem:[%s12567_s5 + $0x104] ss:$8 sps:$4 sm:$0xff]  }
 0xcaf   : > { %6634 = vmatpush1.bf16.msra.mxu0 %v10672_v55  ;;  %v9446_v55 = vld [vmem:[%s12566_s3 + $0x4] sm:$0xf] }
 0xcb0   : > { %6635 = vmatprep.subr.bf16.mxu0 %v10677_v57  ;;  %v10729_v57 = vld [vmem:[%s12567_s5 + $0x100] ss:$8 sps:$4 sm:$0xff]  }
 0xcb3   : > { %6636 = vmatpush1.bf16.msra.mxu0 %v10675_v60  ;;  %v10734_v60 = vld [vmem:[%s12567_s5 + $0x114] ss:$8 sps:$4 sm:$0xff]  }
 0xcb4   : > { %6637 = vmatprep.subr.bf16.mxu0 %v10680_v62  ;;  %v10732_v62 = vld [vmem:[%s12567_s5 + $0x110] ss:$8 sps:$4 sm:$0xff]  }
 0xcb7   : > { %6638 = vmatpush1.bf16.msra.mxu0 %v10678_v0  ;;  %v10737_v0 = vld [vmem:[%s12567_s5 + $0x124] ss:$8 sps:$4 sm:$0xff]  }
 0xcb8   : > { %6889 = vmatprep.subr.bf16.mxu0 %v10683_v1  ;;  %v10735_v1 = vld [vmem:[%s12567_s5 + $0x120] ss:$8 sps:$4 sm:$0xff]  }
 0xcba   : > { %6640 = vmatmul.mubr.bf16.vlgmr.msra.gmra.mrb[64].mxu0 %v6131_v2  ;;  %v10740_v2 = vld [vmem:[%s12567_s5 + $0x134] ss:$8 sps:$4 sm:$0xff]  }
 0xcbb   : > { %6890 = vmatpush1.bf16.msra.mxu0 %v10681_v33  ;;  %6921 = vmatprep.mubr.bf16.mxu0 %v6695_v20  ;;  %v10738_v33 = vld [vmem:[%s12567_s5 + $0x130] ss:$8 sps:$4 sm:$0xff]   ;;  %v10743_v20 = vld [vmem:[%s12567_s5 + $0x144] ss:$8 sps:$4 sm:$0xff]  }
 0xcbc   : > { %6891 = vmatprep.subr.bf16.mxu0 %v10686_v34  ;;  %v10741_v34 = vld [vmem:[%s12567_s5 + $0x140] ss:$8 sps:$4 sm:$0xff]  }
 0xcbf   : > { %6892 = vmatpush1.bf16.msra.mxu0 %v10684_v19  ;;  %v10746_v19 = vld [vmem:[%s12567_s5 + $0x154] ss:$8 sps:$4 sm:$0xff]  }
 0xcc0   : > { %6893 = vmatprep.subr.bf16.mxu0 %v10689_v31  ;;  %v10744_v31 = vld [vmem:[%s12567_s5 + $0x150] ss:$8 sps:$4 sm:$0xff]  }
 0xcc3   : > { %6894 = vmatpush1.bf16.msra.mxu0 %v10687_v59  ;;  %v10749_v59 = vld [vmem:[%s12567_s5 + $0x164] ss:$8 sps:$4 sm:$0xff]  }
 0xcc4   : > { %6895 = vmatprep.subr.bf16.mxu0 %v10692_v23  ;;  %v10747_v23 = vld [vmem:[%s12567_s5 + $0x160] ss:$8 sps:$4 sm:$0xff]  }
 0xcc7   : > { %6896 = vmatpush1.bf16.msra.mxu0 %v10690_v56  ;;  %v10752_v56 = vld [vmem:[%s12567_s5 + $0x174] ss:$8 sps:$4 sm:$0xff]  }
 0xcc8   : > { %6897 = vmatprep.subr.bf16.mxu0 %v10695_v58  ;;  %v10750_v58 = vld [vmem:[%s12567_s5 + $0x170] ss:$8 sps:$4 sm:$0xff]  }
 0xccb   : > { %6898 = vmatpush1.bf16.msra.mxu0 %v10693_v63  ;;  %v10755_v63 = vld [vmem:[%s12567_s5 + $0x184] ss:$8 sps:$4 sm:$0xff]  }
 0xccc   : > { %6899 = vmatprep.subr.bf16.mxu0 %v10698_v38  ;;  %v10753_v38 = vld [vmem:[%s12567_s5 + $0x180] ss:$8 sps:$4 sm:$0xff]  }
 0xccf   : > { %6900 = vmatpush1.bf16.msra.mxu0 %v10696_v50  ;;  %v10758_v50 = vld [vmem:[%s12567_s5 + $0x194] ss:$8 sps:$4 sm:$0xff]  }
 0xcd0   : > { %6901 = vmatprep.subr.bf16.mxu0 %v10701_v3  ;;  %v10756_v3 = vld [vmem:[%s12567_s5 + $0x190] ss:$8 sps:$4 sm:$0xff]  }
 0xcd3   : > { %6902 = vmatpush1.bf16.msra.mxu0 %v10699_v48  ;;  %v10761_v48 = vld [vmem:[%s12567_s5 + $0x1a4] ss:$8 sps:$4 sm:$0xff]  }
 0xcd4   : > { %6903 = vmatprep.subr.bf16.mxu0 %v10704_v49  ;;  %v10759_v49 = vld [vmem:[%s12567_s5 + $0x1a0] ss:$8 sps:$4 sm:$0xff]  }
 0xcd7   : > { %6904 = vmatpush1.bf16.msra.mxu0 %v10702_v36  ;;  %v10764_v36 = vld [vmem:[%s12567_s5 + $0x1b4] ss:$8 sps:$4 sm:$0xff]  }
 0xcd8   : > { %6905 = vmatprep.subr.bf16.mxu0 %v10707_v8  ;;  %v10762_v8 = vld [vmem:[%s12567_s5 + $0x1b0] ss:$8 sps:$4 sm:$0xff]  }
 0xcdb   : > { %6906 = vmatpush1.bf16.msra.mxu0 %v10705_v16  ;;  %v10767_v16 = vld [vmem:[%s12567_s5 + $0x1c4] ss:$8 sps:$4 sm:$0xff]  }
 0xcdc   : > { %6907 = vmatprep.subr.bf16.mxu0 %v10710_v9  ;;  %v10765_v9 = vld [vmem:[%s12567_s5 + $0x1c0] ss:$8 sps:$4 sm:$0xff]  }
 0xcdf   : > { %6908 = vmatpush1.bf16.msra.mxu0 %v10708_v15  ;;  %v10770_v15 = vld [vmem:[%s12567_s5 + $0x1d4] ss:$8 sps:$4 sm:$0xff]  }
 0xce0   : > { %6909 = vmatprep.subr.bf16.mxu0 %v10713_v12  ;;  %v10768_v12 = vld [vmem:[%s12567_s5 + $0x1d0] ss:$8 sps:$4 sm:$0xff]  }
 0xce3   : > { %6910 = vmatpush1.bf16.msra.mxu0 %v10711_v17  ;;  %v10773_v17 = vld [vmem:[%s12567_s5 + $0x1e4] ss:$8 sps:$4 sm:$0xff]  }
 0xce4   : > { %6911 = vmatprep.subr.bf16.mxu0 %v10716_v4  ;;  %v10771_v4 = vld [vmem:[%s12567_s5 + $0x1e0] ss:$8 sps:$4 sm:$0xff]  }
 0xce7   : > { %6912 = vmatpush1.bf16.msra.mxu0 %v10714_v61  ;;  %v10776_v61 = vld [vmem:[%s12567_s5 + $0x1f4] ss:$8 sps:$4 sm:$0xff]  }
 0xce8   : > { %6913 = vmatprep.subr.bf16.mxu0 %v10719_v18  ;;  %v10774_v18 = vld [vmem:[%s12567_s5 + $0x1f0] ss:$8 sps:$4 sm:$0xff]  }
 0xceb   : > { %6914 = vmatpush1.bf16.msra.mxu0 %v10717_v29  ;;  %v10779_v29 = vld [vmem:[%s12567_s5 + $0x4] ss:$8 sps:$4 sm:$0xff]  }
 0xcec   : > { %6915 = vmatprep.subr.bf16.mxu0 %v10722_v37  ;;  %v7846_v37 = vld [vmem:[%s12568_s6] sm:$0xf]  ;;  %s12570_s6 = sld [smem:[#allocation31_spill]] }
 0xcef   : > { %6916 = vmatpush1.bf16.msra.mxu0 %v10720_v21  ;;  %v10828_v21 = vld [vmem:[%s12569_s1] ss:$8 sps:$4 sm:$0xff]  }
 0xcf0   : > { %6917 = vmatprep.subr.bf16.mxu0 %v10725_v14  ;;  %v10830_v14 = vld [vmem:[%s12569_s1 + $0x4] ss:$8 sps:$4 sm:$0xff]  }
 0xcf3   : > { %6918 = vmatpush1.bf16.msra.mxu0 %v10723_v32  ;;  %v10836_v32 = vld [vmem:[%s12569_s1 + $0x14] ss:$8 sps:$4 sm:$0xff]  }
 0xcf4   : > { %6919 = vmatprep.subr.bf16.mxu0 %v10728_v22  ;;  %v10834_v22 = vld [vmem:[%s12569_s1 + $0x10] ss:$8 sps:$4 sm:$0xff]  }
 0xcf7   : > { %6920 = vmatpush1.bf16.msra.mxu0 %v10726_v30  ;;  %v10842_v30 = vld [vmem:[%s12569_s1 + $0x24] ss:$8 sps:$4 sm:$0xff]  }
 0xcf8   : > { %7850 = vmatprep.subr.bf16.mxu0 %v12135_v24 }
 0xcfa   : > { %6922 = vmatmul.mubr.bf16.vlgmr.msra.gmra.mrb[64].mxu0 %v6694_v27  ;;  %v10840_v27 = vld [vmem:[%s12569_s1 + $0x20] ss:$8 sps:$4 sm:$0xff]  }
 0xcfb   : > { %7851 = vmatpush1.bf16.msra.mxu0 %v12133_v26  ;;  %7882 = vmatprep.mubr.bf16.mxu0 %v11040_v25 }
 0xcfc   : > { %8085 = vmatprep.subr.bf16.mxu0 %v10830_v14  ;;  %v10809_v14 = vld [vmem:[%s12567_s5 + $0xa4] ss:$8 sps:$4 sm:$0xff]  }
 0xd02   : > { %9612 = vmatmul.mubr.msk.bf16.vlgmr.msra.gmra.mrb[68].mxu0 %vm4850_vm2, %v7846_v37  ;;  %v10806_v37 = vld [vmem:[%s12567_s5 + $0x94] ss:$8 sps:$4 sm:$0xff]  }
 0xd03   : > { %8086 = vmatpush1.bf16.msra.mxu0 %v10828_v21  ;;  %v10804_v21 = vld [vmem:[%s12567_s5 + $0x90] ss:$8 sps:$4 sm:$0xff]  }
 0xd04   : > { %8087 = vmatprep.subr.bf16.mxu0 %v10836_v32  ;;  %v10807_v32 = vld [vmem:[%s12567_s5 + $0xa0] ss:$8 sps:$4 sm:$0xff]  }
 0xd07   : > { %8088 = vmatpush1.bf16.msra.mxu0 %v10834_v22  ;;  %v10812_v22 = vld [vmem:[%s12567_s5 + $0xb4] ss:$8 sps:$4 sm:$0xff]  }
 0xd08   : > { %8089 = vmatprep.subr.bf16.mxu0 %v10842_v30  ;;  %v10810_v30 = vld [vmem:[%s12567_s5 + $0xb0] ss:$8 sps:$4 sm:$0xff]  }
 0xd0b   : > { %8090 = vmatpush1.bf16.msra.mxu0 %v10840_v27  ;;  %v10815_v27 = vld [vmem:[%s12567_s5 + $0xc4] ss:$8 sps:$4 sm:$0xff]  }
 0xd0c   : > { %8091 = vmatprep.subr.bf16.mxu0 %v10848_v28  ;;  %v10813_v28 = vld [vmem:[%s12567_s5 + $0xc0] ss:$8 sps:$4 sm:$0xff]  }
 0xd0f   : > { %8092 = vmatpush1.bf16.msra.mxu0 %v10846_v35  ;;  %v10818_v35 = vld [vmem:[%s12567_s5 + $0xd4] ss:$8 sps:$4 sm:$0xff]  }
 0xdcd   : > { %v6923_v47 = vpop.f32.mrb[64].mxu0 }
 0xdce   : > { %v6944_v13 = vmul.f32 %v6937_v6, %v6923_v47  ;;  %v6925_v45 = vpop.f32.mrb[65].mxu0  ;;  %v10854_v6 = vld [vmem:[%s12569_s1 + $0x44] ss:$8 sps:$4 sm:$0xff]   ;;  %v10858_v47 = vld [vmem:[%s12569_s1 + $0x50] ss:$8 sps:$4 sm:$0xff]  }
 0xdcf   : > { %v6945_v24 = vmul.f32 %v6941_v10, %v6925_v45  ;;  %v6927_v11 = vpop.f32.mrb[66].mxu0  ;;  %v10852_v10 = vld [vmem:[%s12569_s1 + $0x40] ss:$8 sps:$4 sm:$0xff]   ;;  %8093 = vmatprep.subr.bf16.mxu0 %v10854_v6  ;;  %v10872_v45 = vld [vmem:[%s12569_s1 + $0x74] ss:$8 sps:$4 sm:$0xff]  }
 0xdd0   : > { %v6958_v26 = vadd.f32 %v6951_v41, %v6944_v13  ;;  %v6928_v42 = vpop.f32.mrb[67].mxu0  ;;  %v10860_v41 = vld [vmem:[%s12569_s1 + $0x54] ss:$8 sps:$4 sm:$0xff]   ;;  %8094 = vmatpush1.bf16.msra.mxu0 %v10852_v10  ;;  %v10864_v13 = vld [vmem:[%s12569_s1 + $0x60] ss:$8 sps:$4 sm:$0xff]  }
 0xdd1   : > { %v6959_v44 = vadd.f32 %v6955_v39, %v6945_v24  ;;  %8095 = vmatprep.subr.bf16.mxu0 %v10860_v41  ;;  %v10866_v39 = vld [vmem:[%s12569_s1 + $0x64] ss:$8 sps:$4 sm:$0xff]   ;;  %v10870_v24 = vld [vmem:[%s12569_s1 + $0x70] ss:$8 sps:$4 sm:$0xff]   ;;  %v10884_v42 = vld [vmem:[%s12569_s1 + $0x94] ss:$8 sps:$4 sm:$0xff]  }
 0xdd2   : > { %v6960_v43 = vmax.f32 %v6958_v26, 0.0  ;;  %v10878_v11 = vld [vmem:[%s12569_s1 + $0x84] ss:$8 sps:$4 sm:$0xff]   ;;  %v10876_v26 = vld [vmem:[%s12569_s1 + $0x80] ss:$8 sps:$4 sm:$0xff]  }
 0xdd3   : > { %v6961_v46 = vmax.f32 %v6959_v44, 0.0  ;;  %v10882_v44 = vld [vmem:[%s12569_s1 + $0x90] ss:$8 sps:$4 sm:$0xff]   ;;  %v10821_v10 = vld [vmem:[%s12567_s5 + $0xe4] ss:$8 sps:$4 sm:$0xff]  }
 0xdd4   : > { %v6962_v40 = vpack.c.bf16 %v6960_v43, %v6960_v43  ;;  %8096 = vmatpush1.bf16.msra.mxu0 %v10858_v47  ;;  %v10890_v43 = vld [vmem:[%s12569_s1 + $0xa4] ss:$8 sps:$4 sm:$0xff]   ;;  %v10816_v6 = vld [vmem:[%s12567_s5 + $0xd0] ss:$8 sps:$4 sm:$0xff]   ;;  %v10819_v41 = vld [vmem:[%s12567_s5 + $0xe0] ss:$8 sps:$4 sm:$0xff]  }
 0xdd5   : > { %v12268_v51 = vpack.c.bf16 %v6961_v46, %v6961_v46  ;;  %8097 = vmatprep.subr.bf16.mxu0 %v10866_v39  ;;  %v10888_v46 = vld [vmem:[%s12569_s1 + $0xa0] ss:$8 sps:$4 sm:$0xff]   ;;  %v10824_v47 = vld [vmem:[%s12567_s5 + $0xf4] ss:$8 sps:$4 sm:$0xff]   ;;  %v10822_v39 = vld [vmem:[%s12567_s5 + $0xf0] ss:$8 sps:$4 sm:$0xff]  }
 0xdd6   : > { %v12271_v52 = vsel %vm6969_vm3, %v6962_v40, 0  ;;  %v10896_v40 = vld [vmem:[%s12569_s1 + $0xb4] ss:$8 sps:$4 sm:$0xff]  }
 0xdd7   : > { %9444 = vmatprep.subr.msk.bf16.mxu1 %vm6969_vm3, %v12268_v51 }
 0xdd8   : > { %6977 = vmatpush1.bf16.msra.mxu1 %v12271_v52  ;;  %8098 = vmatpush1.bf16.msra.mxu0 %v10864_v13 }
 0xdd9   : > { %9447 = vmatprep.subr.msk.bf16.mxu1 %vm6969_vm3, %v12268_v51  ;;  %8099 = vmatprep.subr.bf16.mxu0 %v10872_v45  ;;  %v10827_v45 = vld [vmem:[%s12567_s5 + $0x204] ss:$8 sps:$4 sm:$0xff]  }
 0xddb   : > { %9445 = vmatmul.mubr.msk.bf16.vlgmr.msra.gmra.mrb[72].mxu1 %vm6965_vm4, %v6964_v53 }
 0xddc   : > { %7057 = vmatpush1.bf16.msra.mxu1 %v12271_v52  ;;  %7088 = vmatprep.mubr.bf16.mxu1 %v11040_v25 }
 0xddd   : > { %7292 = vmatprep.subr.bf16.mxu1 %v10731_v54  ;;  %8100 = vmatpush1.bf16.msra.mxu0 %v10870_v24  ;;  %v9545_v24 = vld [vmem:[%s12566_s3 + $0x8] sm:$0xf]  ;;  %s12572_s3 = sld [smem:[#allocation28_spill]] }
 0xdde   : > { %8101 = vmatprep.subr.bf16.mxu0 %v10878_v11  ;;  %v10825_v11 = vld [vmem:[%s12567_s5 + $0x200] ss:$8 sps:$4 sm:$0xff]  }
 0xde1   : > { %8102 = vmatpush1.bf16.msra.mxu0 %v10876_v26  ;;  %v10833_v26 = vld [vmem:[%s12567_s5 + $0x214] ss:$8 sps:$4 sm:$0xff]  }
 0xde2   : > { %8103 = vmatprep.subr.bf16.mxu0 %v10884_v42  ;;  %v10831_v42 = vld [vmem:[%s12567_s5 + $0x210] ss:$8 sps:$4 sm:$0xff]  }
 0xde3   : > { %9448 = vmatmul.mubr.msk.bf16.vlgmr.msra.gmra.mrb[76].mxu1 %vm6965_vm4, %v9446_v55  ;;  %v10894_v55 = vld [vmem:[%s12569_s1 + $0xb0] ss:$8 sps:$4 sm:$0xff]  }
 0xde4   : > { %7293 = vmatpush1.bf16.msra.mxu1 %v10729_v57 }
 0xde5   : > { %7294 = vmatprep.subr.bf16.mxu1 %v10734_v60  ;;  %8104 = vmatpush1.bf16.msra.mxu0 %v10882_v44  ;;  %v10843_v44 = vld [vmem:[%s12567_s5 + $0x230] ss:$8 sps:$4 sm:$0xff]  }
 0xde6   : > { %8105 = vmatprep.subr.bf16.mxu0 %v10890_v43  ;;  %v10851_v43 = vld [vmem:[%s12567_s5 + $0x244] ss:$8 sps:$4 sm:$0xff]  }
 0xde8   : > { %7295 = vmatpush1.bf16.msra.mxu1 %v10732_v62  ;;  %v10902_v62 = vld [vmem:[%s12569_s1 + $0xc4] ss:$8 sps:$4 sm:$0xff]  }
 0xde9   : > { %7296 = vmatprep.subr.bf16.mxu1 %v10737_v0  ;;  %8106 = vmatpush1.bf16.msra.mxu0 %v10888_v46  ;;  %v10900_v0 = vld [vmem:[%s12569_s1 + $0xc0] ss:$8 sps:$4 sm:$0xff]  }
 0xdea   : > { %8107 = vmatprep.subr.bf16.mxu0 %v10896_v40  ;;  %v10849_v46 = vld [vmem:[%s12567_s5 + $0x240] ss:$8 sps:$4 sm:$0xff]   ;;  %v10857_v40 = vld [vmem:[%s12567_s5 + $0x254] ss:$8 sps:$4 sm:$0xff]  }
 0xdec   : > { %7297 = vmatpush1.bf16.msra.mxu1 %v10735_v1  ;;  %v10908_v1 = vld [vmem:[%s12569_s1 + $0xd4] ss:$8 sps:$4 sm:$0xff]  }
 0xded   : > { %7298 = vmatprep.subr.bf16.mxu1 %v10740_v2  ;;  %8108 = vmatpush1.bf16.msra.mxu0 %v10894_v55  ;;  %v10861_v55 = vld [vmem:[%s12567_s5 + $0x260] ss:$8 sps:$4 sm:$0xff]  }
 0xdee   : > { %8109 = vmatprep.subr.bf16.mxu0 %v10902_v62  ;;  %v10875_v62 = vld [vmem:[%s12567_s5 + $0x284] ss:$8 sps:$4 sm:$0xff]  }
 0xdf0   : > { %7299 = vmatpush1.bf16.msra.mxu1 %v10738_v33 }
 0xdf1   : > { %7300 = vmatprep.subr.bf16.mxu1 %v10743_v20  ;;  %8110 = vmatpush1.bf16.msra.mxu0 %v10900_v0  ;;  %v10906_v20 = vld [vmem:[%s12569_s1 + $0xd0] ss:$8 sps:$4 sm:$0xff]   ;;  %v10873_v0 = vld [vmem:[%s12567_s5 + $0x280] ss:$8 sps:$4 sm:$0xff]  }
 0xdf2   : > { %8111 = vmatprep.subr.bf16.mxu0 %v10908_v1  ;;  %v10881_v1 = vld [vmem:[%s12567_s5 + $0x294] ss:$8 sps:$4 sm:$0xff]  }
 0xdf4   : > { %7301 = vmatpush1.bf16.msra.mxu1 %v10741_v34 }
 0xdf5   : > { %7302 = vmatprep.subr.bf16.mxu1 %v10746_v19  ;;  %8112 = vmatpush1.bf16.msra.mxu0 %v10906_v20  ;;  %v10885_v20 = vld [vmem:[%s12567_s5 + $0x2a0] ss:$8 sps:$4 sm:$0xff]  }
 0xdf8   : > { %7303 = vmatpush1.bf16.msra.mxu1 %v10744_v31  ;;  %v10777_v31 = vld [vmem:[%s12567_s5] ss:$8 sps:$4 sm:$0xff]  }
 0xdf9   : > { %7304 = vmatprep.subr.bf16.mxu1 %v10749_v59 }
 0xdfc   : > { %7305 = vmatpush1.bf16.msra.mxu1 %v10747_v23 }
 0xdfd   : > { %7306 = vmatprep.subr.bf16.mxu1 %v10752_v56  ;;  %v10782_v56 = vld [vmem:[%s12567_s5 + $0x14] ss:$8 sps:$4 sm:$0xff]  }
 0xe00   : > { %7307 = vmatpush1.bf16.msra.mxu1 %v10750_v58  ;;  %v10914_v58 = vld [vmem:[%s12569_s1 + $0xe4] ss:$8 sps:$4 sm:$0xff]  }
 0xe01   : > { %7308 = vmatprep.subr.bf16.mxu1 %v10755_v63  ;;  %8113 = vmatprep.subr.bf16.mxu0 %v10914_v58  ;;  %v10911_v58 = vld [vmem:[%s12567_s5 + $0x2e4] ss:$8 sps:$4 sm:$0xff]  }
 0xe04   : > { %7309 = vmatpush1.bf16.msra.mxu1 %v10753_v38  ;;  %v10912_v38 = vld [vmem:[%s12569_s1 + $0xe0] ss:$8 sps:$4 sm:$0xff]  }
 0xe05   : > { %7310 = vmatprep.subr.bf16.mxu1 %v10758_v50  ;;  %v10780_v50 = vld [vmem:[%s12567_s5 + $0x10] ss:$8 sps:$4 sm:$0xff]   ;;  %8114 = vmatpush1.bf16.msra.mxu0 %v10912_v38  ;;  %v10920_v38 = vld [vmem:[%s12569_s1 + $0xf4] ss:$8 sps:$4 sm:$0xff]  }
 0xe06   : > { %8115 = vmatprep.subr.bf16.mxu0 %v10920_v38 }
 0xe08   : > { %7311 = vmatpush1.bf16.msra.mxu1 %v10756_v3  ;;  %v10785_v3 = vld [vmem:[%s12567_s5 + $0x24] ss:$8 sps:$4 sm:$0xff]  }
 0xe09   : > { %7312 = vmatprep.subr.bf16.mxu1 %v10761_v48  ;;  %v10783_v48 = vld [vmem:[%s12567_s5 + $0x20] ss:$8 sps:$4 sm:$0xff]  }
 0xe0c   : > { %7313 = vmatpush1.bf16.msra.mxu1 %v10759_v49  ;;  %v10788_v49 = vld [vmem:[%s12567_s5 + $0x34] ss:$8 sps:$4 sm:$0xff]  }
 0xe0d   : > { %7314 = vmatprep.subr.bf16.mxu1 %v10764_v36  ;;  %v10786_v36 = vld [vmem:[%s12567_s5 + $0x30] ss:$8 sps:$4 sm:$0xff]  }
 0xe10   : > { %7315 = vmatpush1.bf16.msra.mxu1 %v10762_v8  ;;  %v10791_v8 = vld [vmem:[%s12567_s5 + $0x44] ss:$8 sps:$4 sm:$0xff]  }
 0xe11   : > { %7316 = vmatprep.subr.bf16.mxu1 %v10767_v16  ;;  %v10789_v16 = vld [vmem:[%s12567_s5 + $0x40] ss:$8 sps:$4 sm:$0xff]  }
 0xe14   : > { %7317 = vmatpush1.bf16.msra.mxu1 %v10765_v9  ;;  %v10794_v9 = vld [vmem:[%s12567_s5 + $0x54] ss:$8 sps:$4 sm:$0xff]  }
 0xe15   : > { %7318 = vmatprep.subr.bf16.mxu1 %v10770_v15  ;;  %v10792_v15 = vld [vmem:[%s12567_s5 + $0x50] ss:$8 sps:$4 sm:$0xff]  }
 0xe18   : > { %7319 = vmatpush1.bf16.msra.mxu1 %v10768_v12  ;;  %v10797_v12 = vld [vmem:[%s12567_s5 + $0x64] ss:$8 sps:$4 sm:$0xff]  }
 0xe19   : > { %7320 = vmatprep.subr.bf16.mxu1 %v10773_v17  ;;  %v10795_v17 = vld [vmem:[%s12567_s5 + $0x60] ss:$8 sps:$4 sm:$0xff]  }
 0xe1c   : > { %7321 = vmatpush1.bf16.msra.mxu1 %v10771_v4  ;;  %v10800_v4 = vld [vmem:[%s12567_s5 + $0x74] ss:$8 sps:$4 sm:$0xff]  }
 0xe1d   : > { %7322 = vmatprep.subr.bf16.mxu1 %v10776_v61  ;;  %v10798_v61 = vld [vmem:[%s12567_s5 + $0x70] ss:$8 sps:$4 sm:$0xff]  }
 0xe20   : > { %7323 = vmatpush1.bf16.msra.mxu1 %v10774_v18  ;;  %v10803_v18 = vld [vmem:[%s12567_s5 + $0x84] ss:$8 sps:$4 sm:$0xff]  }
 0xe21   : > { %7493 = vmatprep.subr.bf16.mxu1 %v10779_v29  ;;  %v10801_v29 = vld [vmem:[%s12567_s5 + $0x80] ss:$8 sps:$4 sm:$0xff]  }
 0xeae   : > { %v12342_v53 = vpop.f32.mrb[72].mxu1 }
 0xeaf   : > { %v7012_v54 = vpop.f32.mrb[73].mxu1  ;;  %v7017_v13 = vpack.c.bf16 %v12342_v53, %v12342_v53  ;;  %v10855_v53 = vld [vmem:[%s12567_s5 + $0x250] ss:$8 sps:$4 sm:$0xff]  }
 0xeb0   : > { %v7014_v57 = vpop.f32.mrb[74].mxu1  ;;  %v7018_v63 = vpack.c.bf16 %v7012_v54, %v7012_v54  ;;  %v10863_v54 = vld [vmem:[%s12567_s5 + $0x264] ss:$8 sps:$4 sm:$0xff]  }
 0xeb1   : > { %v7015_v60 = vpop.f32.mrb[75].mxu1  ;;  %v10869_v57 = vld [vmem:[%s12567_s5 + $0x274] ss:$8 sps:$4 sm:$0xff]  }
 0xeb2   : > { %v10867_v60 = vld [vmem:[%s12567_s5 + $0x270] ss:$8 sps:$4 sm:$0xff]  }
 0xeb6   : > { %v7090_v2 = vpop.f32.mrb[76].mxu1 }
 0xeb7   : > { %v7092_v33 = vpop.f32.mrb[77].mxu1  ;;  %v7097_v59 = vpack.c.bf16 %v7090_v2, %v7090_v2  ;;  %v10879_v2 = vld [vmem:[%s12567_s5 + $0x290] ss:$8 sps:$4 sm:$0xff]  }
 0xeb8   : > { %v7098_v34 = vpack.c.bf16 %v7092_v33, %v7092_v33  ;;  %v7094_v19 = vpop.f32.mrb[78].mxu1  ;;  %v10887_v33 = vld [vmem:[%s12567_s5 + $0x2a4] ss:$8 sps:$4 sm:$0xff]  }
 0xeb9   : > { %v7095_v23 = vpop.f32.mrb[79].mxu1  ;;  %v10891_v19 = vld [vmem:[%s12567_s5 + $0x2b0] ss:$8 sps:$4 sm:$0xff]  }
 0xeba   : > { %7324 = vmatprep.mubr.bf16.mxu1 %v7098_v34  ;;  %v10893_v34 = vld [vmem:[%s12567_s5 + $0x2b4] ss:$8 sps:$4 sm:$0xff]  }
 0xebb   : > { %7325 = vmatmul.mubr.bf16.vlgmr.msra.gmra.mrb[80].mxu1 %v7097_v59  ;;  %v10897_v59 = vld [vmem:[%s12567_s5 + $0x2c0] ss:$8 sps:$4 sm:$0xff]   ;;  %v10905_v23 = vld [vmem:[%s12567_s5 + $0x2d4] ss:$8 sps:$4 sm:$0xff]  }
 0xebc   : > { %7494 = vmatpush1.bf16.msra.mxu1 %v10777_v31  ;;  %7525 = vmatprep.mubr.bf16.mxu1 %v7018_v63  ;;  %v10899_v31 = vld [vmem:[%s12567_s5 + $0x2c4] ss:$8 sps:$4 sm:$0xff]   ;;  %v10909_v63 = vld [vmem:[%s12567_s5 + $0x2e0] ss:$8 sps:$4 sm:$0xff]  }
 0xebd   : > { %7495 = vmatprep.subr.bf16.mxu1 %v10782_v56  ;;  %v10903_v56 = vld [vmem:[%s12567_s5 + $0x2d0] ss:$8 sps:$4 sm:$0xff]  }
 0xec0   : > { %7496 = vmatpush1.bf16.msra.mxu1 %v10780_v50  ;;  %v7884_v50 = vpop.f32.mrb[68].mxu0 }
 0xec1   : > { %7497 = vmatprep.subr.bf16.mxu1 %v10785_v3  ;;  %v10918_v3 = vld [vmem:[%s12569_s1 + $0xf0] ss:$8 sps:$4 sm:$0xff]   ;;  %s12571_s1 = sld [smem:[#allocation27_spill]] }
 0xec2   : > { %8116 = vmatpush1.bf16.msra.mxu0 %v10918_v3 }
 0xec4   : > { %7498 = vmatpush1.bf16.msra.mxu1 %v10783_v48  ;;  %v7886_v48 = vpop.f32.mrb[69].mxu0 }
 0xec5   : > { %7499 = vmatprep.subr.bf16.mxu1 %v10788_v49  ;;  %v7892_v49 = vpack.c.bf16 %v7886_v48, %v7886_v48 }
 0xec7   : > { %8117 = vmatprep.mubr.bf16.mxu0 %v7892_v49 }
 0xec8   : > { %7500 = vmatpush1.bf16.msra.mxu1 %v10786_v36  ;;  %v7888_v36 = vpop.f32.mrb[70].mxu0 }
 0xec9   : > { %7501 = vmatprep.subr.bf16.mxu1 %v10791_v8  ;;  %v7891_v8 = vpack.c.bf16 %v7884_v50, %v7884_v50 }
 0xecb   : > { %8118 = vmatmul.mubr.bf16.vlgmr.msra.gmra.mrb[72].mxu0 %v7891_v8 }
 0xecc   : > { %7502 = vmatpush1.bf16.msra.mxu1 %v10789_v16  ;;  %v7889_v16 = vpop.f32.mrb[71].mxu0 }
 0xecd   : > { %7503 = vmatprep.subr.bf16.mxu1 %v10794_v9  ;;  %v10917_v9 = vld [vmem:[%s12567_s5 + $0x2f4] ss:$8 sps:$4 sm:$0xff]  }
 0xed0   : > { %7504 = vmatpush1.bf16.msra.mxu1 %v10792_v15  ;;  %v10915_v15 = vld [vmem:[%s12567_s5 + $0x2f0] ss:$8 sps:$4 sm:$0xff]  }
 0xed1   : > { %7505 = vmatprep.subr.bf16.mxu1 %v10797_v12  ;;  %v10921_v12 = vld [vmem:[%s12544_s4 + $0x40] sm:$0xff]  }
 0xed4   : > { %7506 = vmatpush1.bf16.msra.mxu1 %v10795_v17 }
 0xed5   : > { %7507 = vmatprep.subr.bf16.mxu1 %v10800_v4 }
 0xed8   : > { %7508 = vmatpush1.bf16.msra.mxu1 %v10798_v61 }
 0xed9   : > { %7509 = vmatprep.subr.bf16.mxu1 %v10803_v18 }
 0xedc   : > { %7510 = vmatpush1.bf16.msra.mxu1 %v10801_v29  ;;  %v10922_v29 = vld [vmem:[%s12544_s4] sm:$0xff]  }
 0xedd   : > { %7511 = vmatprep.subr.bf16.mxu1 %v10806_v37 }
 0xee0   : > { %7512 = vmatpush1.bf16.msra.mxu1 %v10804_v21 }
 0xee1   : > { %7513 = vmatprep.subr.bf16.mxu1 %v10809_v14  ;;  %v10923_v14 = vld [vmem:[%s12544_s4 + $0x48] sm:$0xff]  }
 0xee4   : > { %7514 = vmatpush1.bf16.msra.mxu1 %v10807_v32 }
 0xee5   : > { %7515 = vmatprep.subr.bf16.mxu1 %v10812_v22 }
 0xee8   : > { %7516 = vmatpush1.bf16.msra.mxu1 %v10810_v30 }
 0xee9   : > { %7517 = vmatprep.subr.bf16.mxu1 %v10815_v27  ;;  %v10924_v27 = vld [vmem:[%s12544_s4 + $0x8] sm:$0xff]  }
 0xeec   : > { %7518 = vmatpush1.bf16.msra.mxu1 %v10813_v28 }
 0xeed   : > { %7519 = vmatprep.subr.bf16.mxu1 %v10818_v35  ;;  %v10925_v35 = vld [vmem:[%s12544_s4 + $0x50] sm:$0xff]  }
 0xef0   : > { %7520 = vmatpush1.bf16.msra.mxu1 %v10816_v6  ;;  %v10926_v6 = vld [vmem:[%s12544_s4 + $0x10] sm:$0xff]  }
 0xef1   : > { %7521 = vmatprep.subr.bf16.mxu1 %v10821_v10  ;;  %v10927_v10 = vld [vmem:[%s12544_s4 + $0x58] sm:$0xff]  }
 0xef4   : > { %7522 = vmatpush1.bf16.msra.mxu1 %v10819_v41  ;;  %v10928_v41 = vld [vmem:[%s12544_s4 + $0x18] sm:$0xff]  }
 0xef5   : > { %7523 = vmatprep.subr.bf16.mxu1 %v10824_v47  ;;  %v10929_v47 = vld [vmem:[%s12544_s4 + $0x60] sm:$0xff]  }
 0xef8   : > { %7524 = vmatpush1.bf16.msra.mxu1 %v10822_v39  ;;  %v10930_v39 = vld [vmem:[%s12544_s4 + $0x20] sm:$0xff]  }
 0xef9   : > { %9546 = vmatprep.subr.msk.bf16.mxu1 %vm6969_vm3, %v12268_v51  ;;  %v10839_v51 = vld [vmem:[%s12567_s5 + $0x224] ss:$8 sps:$4 sm:$0xff]  }
 0xefb   : > { %7526 = vmatmul.mubr.bf16.vlgmr.msra.gmra.mrb[80].mxu1 %v7017_v13  ;;  %v10931_v13 = vld [vmem:[%s12544_s4 + $0x68] sm:$0xff]  }
 0xefc   : > { %7540 = vmatpush1.bf16.msra.mxu1 %v12271_v52  ;;  %7571 = vmatprep.mubr.bf16.mxu1 %v11040_v25  ;;  %v10837_v52 = vld [vmem:[%s12567_s5 + $0x220] ss:$8 sps:$4 sm:$0xff]   ;;  %v10845_v25 = vld [vmem:[%s12567_s5 + $0x234] ss:$8 sps:$4 sm:$0xff]  }
 0xefd   : > { %7775 = vmatprep.subr.bf16.mxu1 %v10827_v45  ;;  %v10932_v45 = vld [vmem:[%s12544_s4 + $0x28] sm:$0xff]  }
 0xf03   : > { %9547 = vmatmul.mubr.msk.bf16.vlgmr.msra.gmra.mrb[84].mxu1 %vm6965_vm4, %v9545_v24  ;;  %v10933_v24 = vld [vmem:[%s12544_s4 + $0x70] sm:$0xff]  }
 0xf04   : > { %7776 = vmatpush1.bf16.msra.mxu1 %v10825_v11  ;;  %v10934_v11 = vld [vmem:[%s12544_s4 + $0x30] sm:$0xff]  }
 0xf05   : > { %7777 = vmatprep.subr.bf16.mxu1 %v10833_v26  ;;  %v10935_v26 = vld [vmem:[%s12544_s4 + $0x78] sm:$0xff]  }
 0xf08   : > { %7778 = vmatpush1.bf16.msra.mxu1 %v10831_v42  ;;  %v10936_v42 = vld [vmem:[%s12544_s4 + $0x38] sm:$0xff]  }
 0xf09   : > { %7779 = vmatprep.subr.bf16.mxu1 %v10839_v51  ;;  %v8126_v51 = vld [vmem:[%s12570_s6] sm:$0x3] }
 0xf0c   : > { %7780 = vmatpush1.bf16.msra.mxu1 %v10837_v52  ;;  %v7818_v52 = vld [vmem:[%s12571_s1] sm:$0x3]  ;;  %s9661_s1 = sshll.u32 %s11268_s0, 4  ;;  %s11041_s0 = smov [#allocation2]  }
 0xf0d   : > { %7781 = vmatprep.subr.bf16.mxu1 %v10845_v25  ;;  %v8131_v25 = vrot.slane %v8126_v51, %v11360_v5  ;;  %s12456_s5 = scalar_lea.hbm %s11245_s20, %s9661_s1  ;;  %s10941_s9 = sshll.u32 %s11041_s0, 4  ;;  %s10942_s9 = int_to_ptr.vmem [resolvable:$false] %s10941_s9 }
 0xf0e   : > { %s10943_s10 = scalar_lea.vmem %s10942_s9, 32 }
 0xf10   : > { %7782 = vmatpush1.bf16.msra.mxu1 %v10843_v44  ;;  %v7832_v44 = vld [vmem:[%s12572_s3] sm:$0x3]  ;;  %s1173_s3 = sand.u32 1, %s10991_s23  }
 0xf11   : > { %7783 = vmatprep.subr.bf16.mxu1 %v10851_v43  ;;  %v8140_v43 = vld [vmem:[%s11230_s27] sm:$0x3]  ;;  %s1174_s6 = scalar_lea.vmem [#allocation2], %s1173_s3  ;;  %s8347_s7 = scalar_lea.sflag [#allocation3], %s1173_s3 }
 0xf12   : > { %s8359_s4 = sshll.u32 %s1174_s6, 4  ;;  %s12458_s4 = int_to_ptr.vmem [resolvable:$true] %s8359_s4 }
 0xf13   : > { %s10937_s8 = scalar_lea.vmem %s12458_s4, 16  ;;  %p10944_p0 = scmp.lt.s32.totalorder %s12458_s4, %s10942_s9 }
 0xf14   : > { %7784 = vmatpush1.bf16.msra.mxu1 %v10849_v46  ;;  %v8135_v46 = vrot.slane %v8126_v51, %v11363_v7  ;;  %p10938_p11 = scmp.ne.s32.totalorder %s12458_s4, %s10937_s8  ;;  %p10945_p1 = scmp.lt.s32.totalorder %s10943_s10, %s10937_s8 }
 0xf15   : > { %7785 = vmatprep.subr.bf16.mxu1 %v10857_v40  ;;  %v7823_v40 = vrot.slane %v7818_v52, %v11360_v5 }
 0xf16   : > { %p10939_p12 = pnand %p10938_p11, %p11285_p5  ;;  %p10946_p2 = por %p10945_p1, %p10944_p0 }
 0xf18   : > { %7786 = vmatpush1.bf16.msra.mxu1 %v10855_v53  ;;  %v7827_v53 = vrot.slane %v7818_v52, %v11363_v7  ;;  %p10940_p13 = pneg %p10939_p12 }
 0xf19   : > { %7787 = vmatprep.subr.bf16.mxu1 %v10863_v54  ;;  %v7837_v54 = vrot.slane %v7832_v44, %v11360_v5 }
 0xf1a   : > { %p10947_p3 = pnand %p10946_p2, %p10940_p13 }
 0xf1c   : > { %7788 = vmatpush1.bf16.msra.mxu1 %v10861_v55 }
 0xf1d   : > { %7789 = vmatprep.subr.bf16.mxu1 %v10869_v57  ;;  %v8145_v57 = vrot.slane %v8140_v43, %v11360_v5 }
 0xf20   : > { %7790 = vmatpush1.bf16.msra.mxu1 %v10867_v60 }
 0xf21   : > { %7791 = vmatprep.subr.bf16.mxu1 %v10875_v62  ;;  %v7841_v62 = vrot.slane %v7832_v44, %v11363_v7 }
 0xf24   : > { %7792 = vmatpush1.bf16.msra.mxu1 %v10873_v0 }
 0xf25   : > { %7793 = vmatprep.subr.bf16.mxu1 %v10881_v1  ;;  %v8149_v1 = vrot.slane %v8140_v43, %v11363_v7 }
 0xf28   : > { %7794 = vmatpush1.bf16.msra.mxu1 %v10879_v2 }
 0xf29   : > { %7795 = vmatprep.subr.bf16.mxu1 %v10887_v33 }
 0xf2c   : > { %7796 = vmatpush1.bf16.msra.mxu1 %v10885_v20 }
 0xf2d   : > { %7797 = vmatprep.subr.bf16.mxu1 %v10893_v34 }
 0xf30   : > { %7798 = vmatpush1.bf16.msra.mxu1 %v10891_v19 }
 0xf31   : > { %7799 = vmatprep.subr.bf16.mxu1 %v10899_v31 }
 0xf34   : > { %7800 = vmatpush1.bf16.msra.mxu1 %v10897_v59 }
 0xf35   : > { %7801 = vmatprep.subr.bf16.mxu1 %v10905_v23 }
 0xf38   : > { %7802 = vmatpush1.bf16.msra.mxu1 %v10903_v56 }
 0xf39   : > { %7803 = vmatprep.subr.bf16.mxu1 %v10911_v58 }
 0xf3c   : > { %7804 = vmatpush1.bf16.msra.mxu1 %v10909_v63 }
 0xf3d   : > { %7805 = vmatprep.subr.bf16.mxu1 %v10917_v9 }
 0xf40   : > { %7806 = vmatpush1.bf16.msra.mxu1 %v10915_v15 }
 0xf41   : > { %9677 = vmatprep.subr.bf16.mxu1 %v10921_v12 }
 0xf9e   : > { %v8119_v32 = vpop.f32.mrb[72].mxu0 }
 0xf9f   : > { %v8121_v22 = vpop.f32.mrb[73].mxu0  ;;  %v8138_v55 = vmul.f32 %v8131_v25, %v8119_v32 }
 0xfa0   : > { %v8123_v30 = vpop.f32.mrb[74].mxu0  ;;  %v8139_v0 = vmul.f32 %v8135_v46, %v8121_v22 }
 0xfa1   : > { %v8124_v28 = vpop.f32.mrb[75].mxu0  ;;  %v8152_v31 = vadd.f32 %v8145_v57, %v8138_v55 }
 0xfa2   : > { %v8153_v56 = vadd.f32 %v8149_v1, %v8139_v0 }
 0xfd6   : > { %v7573_v17 = vpop.f32.mrb[84].mxu1 }
 0xfd7   : > { %v7575_v4 = vpop.f32.mrb[85].mxu1  ;;  %v7580_v37 = vpack.c.bf16 %v7573_v17, %v7573_v17 }
 0xfd8   : > { %v7581_v61 = vpack.c.bf16 %v7575_v4, %v7575_v4  ;;  %v7577_v18 = vpop.f32.mrb[86].mxu1 }
 0xfd9   : > { %v7578_v21 = vpop.f32.mrb[87].mxu1 }
 0xfda   : > { %7807 = vmatprep.mubr.bf16.mxu1 %v7581_v61  ;;  %v8207_v21 = vld [vmem:[%s11240_s12] sm:$0x1] }
 0xfdb   : > { %7808 = vmatmul.mubr.bf16.vlgmr.msra.gmra.mrb[80].mxu1 %v7580_v37 }
 0xfdc   : > { %9678 = vmatpush3.bf16.msra.mxu1 %v10922_v29 }
 0xfdd   : > { %9679 = vmatprep.subr.bf16.mxu1 %v10923_v14 }
 0xfe0   : > { %9680 = vmatpush3.bf16.msra.mxu1 %v10924_v27 }
 0xfe1   : > { %9681 = vmatprep.subr.bf16.mxu1 %v10925_v35 }
 0xfe4   : > { %9682 = vmatpush3.bf16.msra.mxu1 %v10926_v6 }
 0xfe5   : > { %9683 = vmatprep.subr.bf16.mxu1 %v10927_v10 }
 0xfe8   : > { %9684 = vmatpush3.bf16.msra.mxu1 %v10928_v41 }
 0xfe9   : > { %9685 = vmatprep.subr.bf16.mxu1 %v10929_v47 }
 0xfec   : > { %9686 = vmatpush3.bf16.msra.mxu1 %v10930_v39 }
 0xfed   : > { %9687 = vmatprep.subr.bf16.mxu1 %v10931_v13 }
 0xff0   : > { %9688 = vmatpush3.bf16.msra.mxu1 %v10932_v45 }
 0xff1   : > { %9689 = vmatprep.subr.bf16.mxu1 %v10933_v24 }
 0xff4   : > { %9690 = vmatpush3.bf16.msra.mxu1 %v10934_v11 }
 0xff5   : > { %9691 = vmatprep.subr.bf16.mxu1 %v10935_v26 }
 0xff8   : > { %9692 = vmatpush3.bf16.msra.mxu1 %v10936_v42 }
0x10ae   : > { %v7809_v60 = vpop.f32.mrb[80].mxu1 }
0x10af   : > { %v7830_v2 = vmul.f32 %v7823_v40, %v7809_v60  ;;  %v7811_v33 = vpop.f32.mrb[81].mxu1 }
0x10b0   : > { %v7831_v20 = vmul.f32 %v7827_v53, %v7811_v33  ;;  %v7813_v34 = vpop.f32.mrb[82].mxu1 }
0x10b1   : > { %v7844_v19 = vadd.f32 %v7837_v54, %v7830_v2  ;;  %v7814_v59 = vpop.f32.mrb[83].mxu1 }
0x10b2   : > { %v7845_v23 = vadd.f32 %v7841_v62, %v7831_v20 }
0x10b3   : > { %v8154_v58 = vadd.f32 %v8152_v31, %v7844_v19 }
0x10b4   : > { %v8155_v63 = vadd.f32 %v8153_v56, %v7845_v23 }
0x10b5   : > { %v8156_v38 = vmax.f32 %v8154_v58, 0.0 }
0x10b6   : > { %v8157_v50 = vmax.f32 %v8155_v63, 0.0 }
0x10b7   : > { %v8158_v5 = vrot.slane %v8156_v38, 4 }
0x10b8   : > { %v8164_v3 = vrot.slane %v8157_v50, 4 }
0x10b9   : > { %v8159_v48 = vadd.f32 %v8158_v5, %v8156_v38 }
0x10ba   : > { %v8165_v49 = vadd.f32 %v8164_v3, %v8157_v50 }
0x10bb   : > { %v8160_v36 = vrot.slane %v8159_v48, 2 }
0x10bc   : > { %v8166_v7 = vrot.slane %v8165_v49, 2 }
0x10bd   : > { %v8161_v8 = vadd.f32 %v8160_v36, %v8159_v48 }
0x10be   : > { %v8167_v16 = vadd.f32 %v8166_v7, %v8165_v49 }
0x10bf   : > { %v8162_v9 = vrot.slane %v8161_v8, 1 }
0x10c0   : > { %v8168_v15 = vrot.slane %v8167_v16, 1 }
0x10c1   : > { %v8163_v12 = vadd.f32 %v8162_v9, %v8161_v8 }
0x10c2   : > { %v8169_v17 = vadd.f32 %v8168_v15, %v8167_v16 }
0x10c3   : > { %v8171_v4 = vmul.f32 0.125, %v8163_v12 }
0x10c4   : > { %v8172_v61 = vmul.f32 0.125, %v8169_v17 }
0x10c5   : > { %v8173_v29 = vpack.c.bf16 %v8171_v4, %v8171_v4 }
0x10c6   : > { %v8174_v18 = vpack.c.bf16 %v8172_v61, %v8172_v61 }
0x10c8   : > { %8336 = vmatprep.mubr.bf16.mxu1 %v8174_v18 }
0x10c9   : > { %8337 = vmatmul.mubr.bf16.vlgmr.msra.gmra.mrb[88].mxu1 %v8173_v29 }
0x119c   : > { %v9693_v37 = vpop.f32.mrb[88].mxu1 }
0x119d   : > { %v9694_v14 = vpop.f32.mrb[89].mxu1 }
0x119e   : > { %v9695_v32 = vadd.f32 %v9694_v14, %v9693_v37  ;;  %v9696_v22 = vpop.f32.mrb[90].mxu1 }
0x119f   : > { %v9697_v30 = vpop.f32.mrb[91].mxu1 }
0x11a0   : > { %v8339_v27 = vadd.f32 %v9695_v32, %v8207_v21 }
0x11a2   : > { %8345 = vst.msk [vmem:[%s1174_s6] sm:$0x1] %vm8344_vm5, %v8339_v27 }
0x11a3   : > { %10950 = shalt.err (!%p10947_p3)
}
0x11a4   : > { %s10951_s3 = scalar_lea.hbm %s12456_s5, 16  ;;  %s10955_s1 = scalar_lea.hbm %s11245_s20, 32 }
0x11a5   : > { %p10952_p4 = scmp.ne.s32.totalorder %s12456_s5, %s10951_s3  ;;  %p10956_p9 = scmp.lt.u32.totalorder %s12456_s5, %s11245_s20 }
0x11a6   : > { %p10957_p10 = scmp.lt.u32.totalorder %s10955_s1, %s10951_s3  ;;  %p10959_p12 = scmp.lt.u32.totalorder %s10951_s3, %s12456_s5 }
0x11a7   : > { %p10953_p7 = pnand %p10952_p4, %p11285_p5 }
0x11a8   : > { %p10958_p11 = por %p10957_p10, %p10956_p9 }
0x11a9   : > { %p10954_p8 = pneg %p10953_p7 }
0x11aa   : > { %p10960_p0 = por %p10959_p12, %p10958_p11 }
0x11ac   : > { %p10961_p13 = pnand %p10960_p0, %p10954_p8 }
0x11ae   : > { %10964 = shalt.err (!%p10961_p13)
}
0x11af   : > { %9803 = dma.vmem_to_hbm [thread:$0]  (%p11285_p5), %s12458_s4, 16, %s12456_s5, %s8347_s7  }
0x11b0 PF: > { %p9809_p1 = scmp.ge.s32.totalorder %s10999_s28, 2  ;;  %s8371_s9 = sand.u32 1, %s10987_s22  }
0x11b1   : > { %s8372_s8 = scalar_lea.sflag [#allocation3], %s8371_s9 }
0x11b2   : > { %p9806_p2 = pnand %p9809_p1, %p11289_p6 }
0x11b4   : > { %10982 = dma.done.wait (!%p9806_p2), %s8372_s8, 16  }
0x11b5   : > { %10984 = vsyncadd (!%p9806_p2), %s8372_s8, 4294967280  ;;  %p89_p3 = scmp.ge.s32.totalorder %s11272_s2, 4   ;;  %s12573_s22 = smov %s10991_s23 }
0x11b6   : > { %s12574_s23 = smov %s10995_s26  ;;  %s12575_s26 = smov %s11283_s11 }
0x11b7   : > { %s12576_s28 = smov %s11272_s2  ;;  %91 = sbr.rel (!%p89_p3) target bundleno = 83 (0x53), region = 278 }
0x11be   :  { %8376 = vsyncpa [#allocation3], 1 }
0x11bf   :  { %8378 = vsyncpa [#allocation3 + $0x1], 1 }

</bundles_post_ra>
